<compile_context>
chip_gen: v7x
topology: tpu7x:2x2x1
jax: 0.10.0
libtpu: 0.0.40
codegen_flags: <defaults>
</compile_context>

<pallas_src>
import functools

import jax
import jax.numpy as jnp
from jax.experimental import pallas as pl
from jax.experimental.pallas import tpu as pltpu


def _spatial_attention_kernel(x_ref, w_ref, o_ref, sum_ref, max_ref, pad_ref,
                              *, C, H, W, K, P):
    # x_ref:   (TB, TC, H*W) lane-dense input block
    # w_ref:   (2*K*K,) conv taps in SMEM (scalar reads)
    # o_ref:   (TB, 1, H*W) lane-dense output block
    # sum_ref: (TB, H*W) f32 running channel sum (per-core scratch)
    # max_ref: (TB, H*W) running channel max, input dtype
    # pad_ref: (TB, 2, H+2P, W+2P) f32 zero-padded [avg, max] map for the conv
    c = pl.program_id(1)

    @pl.when(c == 0)
    def _():
        sum_ref[...] = jnp.zeros_like(sum_ref)
        max_ref[...] = jnp.full_like(max_ref, -jnp.inf)

    xb = x_ref[...]                                            # (TB, TC, HW)
    # Channel (sublane) reductions -> XLU; sum accumulates in f32, max stays
    # in the input dtype (avoids upcasting the whole block for bf16 inputs).
    sum_ref[...] += jnp.sum(xb.astype(jnp.float32), axis=1)
    max_ref[...] = jnp.maximum(max_ref[...], jnp.max(xb, axis=1))

    @pl.when(c == pl.num_programs(1) - 1)
    def _():
        TB = pad_ref.shape[0]
        avg_flat = sum_ref[...] * jnp.float32(1.0 / C)         # (TB, HW) f32
        max_flat = max_ref[...].astype(jnp.float32)            # (TB, HW) f32

        # Zero-padded 2-channel [avg, max] map; the zero border is exactly
        # the conv's zero padding.  Filled row by row from the flat maps with
        # static lane slices (no in-kernel reshape / relayout of the refs).
        pad_ref[...] = jnp.zeros_like(pad_ref)
        for h in range(H):
            pad_ref[:, 0, P + h, P:P + W] = avg_flat[:, h * W:(h + 1) * W]
            pad_ref[:, 1, P + h, P:P + W] = max_flat[:, h * W:(h + 1) * W]

        # KxK cross-correlation as scalar-weighted shifted slices (VPU).
        # Row strips hoisted out of the dx loop; 4 independent accumulators
        # break the serial mul-add dependency chain.
        accs = [jnp.zeros((TB, H, W), jnp.float32) for _ in range(4)]
        tap = 0
        for ci in range(2):
            for dy in range(K):
                strip = pad_ref[:, ci, dy:dy + H, :]           # (TB, H, W+2P)
                for dx in range(K):
                    wv = w_ref[ci * K * K + dy * K + dx]
                    accs[tap % 4] = accs[tap % 4] + wv * strip[:, :, dx:dx + W]
                    tap += 1
        acc = (accs[0] + accs[1]) + (accs[2] + accs[3])
        sig = jax.nn.sigmoid(acc)                              # (TB, H, W)

        # Drain into the lane-dense output block (static lane slices).
        for h in range(H):
            o_ref[:, 0, h * W:(h + 1) * W] = sig[:, h, :].astype(o_ref.dtype)


def _largest_divisor_le(n, cap):
    cap = max(1, min(n, cap))
    for d in range(cap, 0, -1):
        if n % d == 0:
            return d
    return 1


def _padded_block_bytes(shape, itemsize):
    # VMEM footprint of a block after (sublane, lane) tile padding.
    lead = 1
    for d in shape[:-2]:
        lead *= d
    sub = 8 * max(1, 4 // itemsize)            # 8 for f32, 16 for bf16, ...
    s = -(-shape[-2] // sub) * sub
    l = -(-shape[-1] // 128) * 128
    return lead * s * l * itemsize


def _tpu_vmem_and_cores():
    """Best-effort (VMEM bytes per core, TensorCores per chip)."""
    vmem, cores = 64 << 20, 2                  # conservative v7x-like default
    try:
        info = pltpu.get_tpu_info()
        vmem = int(getattr(info, "vmem_capacity_bytes", vmem))
        found = None
        for name in ("num_cores", "tensorcores_per_chip", "num_tensorcores",
                     "core_count"):
            v = getattr(info, name, None)
            if v:
                found = int(v)
                break
        # v7x: 64 MiB VMEM / TC and 2 TCs; v5e/v6e: 128 MiB / 1 TC.
        cores = found if found else (2 if vmem <= (64 << 20) else 1)
    except Exception:
        pass
    return vmem, cores


def spatial_attention(x, conv_weight, kernel_size=7):
    """x: (B, C, H, W); conv_weight: (1, 2, K, K). Returns sigmoid(conv([avg, max]))."""
    assert kernel_size in (3, 7), "kernel size must be 3 or 7"
    B, C, H, W = x.shape
    K = kernel_size
    P = 3 if K == 7 else 1
    Hp, Wp = H + 2 * P, W + 2 * P
    HW = H * W
    itemsize = x.dtype.itemsize

    vmem_cap, n_cores = _tpu_vmem_and_cores()

    # ---- tile selection on the lane-dense (TB, TC, HW) layout --------------
    # Per-block budget ~ VMEM/8 (double-buffered input dominates the footprint).
    budget = max(1 << 20, vmem_cap // 8)
    sub = 8 * max(1, 4 // itemsize)

    def blk_bytes(tb, tc):
        return _padded_block_bytes((tb, tc, HW), itemsize)

    # Keep >= n_cores blocks along the "parallel" batch axis (megacore on v7x).
    tb_cap = max(1, B // max(1, n_cores))
    if blk_bytes(1, C) <= budget:
        TC = C
        TB = _largest_divisor_le(B, min(tb_cap, max(1, budget // blk_bytes(1, C))))
    else:
        TB = 1
        TC = 1
        for d in range(C - 1, 0, -1):          # prefer sublane-aligned channel tiles
            if C % d == 0 and d % sub == 0 and blk_bytes(1, d) <= budget:
                TC = d
                break
        if TC == 1:
            TC = _largest_divisor_le(C, max(1, budget // blk_bytes(1, 1)))
    nb, nc = B // TB, C // TC

    w_flat = conv_weight.reshape(-1).astype(jnp.float32)       # (2*K*K,) -> SMEM

    kernel = functools.partial(_spatial_attention_kernel,
                               C=C, H=H, W=W, K=K, P=P)

    # ---- explicit VMEM limit from padded block + scratch bytes -------------
    x_blk = blk_bytes(TB, TC)
    o_blk = _padded_block_bytes((TB, 1, HW), itemsize)
    scr = (_padded_block_bytes((TB, HW), 4)                    # channel sum (f32)
           + _padded_block_bytes((TB, HW), itemsize)           # channel max
           + _padded_block_bytes((TB, 2, Hp, Wp), 4))          # padded [avg, max]
    vmem_est = 2 * (x_blk + o_blk) + scr
    # <= ~48 MiB on v7x (64 MiB physical / TC); up to ~100 MiB on v5e/v6e.
    vmem_ceiling = (48 << 20) if vmem_cap <= (64 << 20) else (100 << 20)
    vmem_limit = int(min(vmem_ceiling, max(32 << 20, vmem_est + (8 << 20))))

    x2d = x.reshape(B, C, HW)                 # free relabel outside the kernel

    out_flat = pl.pallas_call(
        kernel,
        out_shape=jax.ShapeDtypeStruct((B, 1, HW), x.dtype),
        grid=(nb, nc),
        in_specs=[
            # Batch axis first (parallel), channel reduction axis last.
            pl.BlockSpec((TB, TC, HW), lambda b, c: (b, c, 0)),
            # Small conv-weight vector lives in SMEM (scalar tap reads).
            pl.BlockSpec(memory_space=pltpu.MemorySpace.SMEM),
        ],
        out_specs=pl.BlockSpec((TB, 1, HW), lambda b, c: (b, 0, 0)),
        scratch_shapes=[
            pltpu.VMEM((TB, HW), jnp.float32),        # running channel sum
            pltpu.VMEM((TB, HW), x.dtype),            # running channel max
            pltpu.VMEM((TB, 2, Hp, Wp), jnp.float32), # zero-padded [avg, max]
        ],
        compiler_params=pltpu.CompilerParams(
            dimension_semantics=("parallel", "arbitrary"),
            vmem_limit_bytes=vmem_limit),
    )(x2d, w_flat)

    return out_flat.reshape(B, 1, H, W)


def _reference(x, conv_weight):
    avg = jnp.mean(x, axis=1, keepdims=True)
    mx = jnp.max(x, axis=1, keepdims=True)
    cat = jnp.concatenate([avg, mx], axis=1)
    K = conv_weight.shape[-1]
    P = (K - 1) // 2
    out = jax.lax.conv_general_dilated(
        cat, conv_weight, window_strides=(1, 1),
        padding=[(P, P), (P, P)],
        dimension_numbers=("NCHW", "OIHW", "NCHW"))
    return jax.nn.sigmoid(out)


if __name__ == "__main__":
    key = jax.random.PRNGKey(0)
    kx, kw = jax.random.split(key)

    B, C, H, W = 2, 4, 16, 16
    K = 7

    x = jax.random.normal(kx, (B, C, H, W), dtype=jnp.float32)
    # nn.Conv2d(2, 1, 7, padding=3, bias=False) weight, OIHW: (1, 2, 7, 7)
    conv_weight = 0.1 * jax.random.normal(kw, (1, 2, K, K), dtype=jnp.float32)

    out = spatial_attention(x, conv_weight, kernel_size=K)
    out = jax.block_until_ready(out)

    ref = _reference(x, conv_weight)
    assert out.shape == (B, 1, H, W)
    assert jnp.allclose(out, ref, atol=1e-5, rtol=1e-5), \
        float(jnp.max(jnp.abs(out - ref)))

    print("KERNEL_OK")
</pallas_src>

<mosaic_0001>
module attributes {stable_mosaic.version = 11 : i64} {
  func.func @_spatial_attention_kernel(%arg0: i32, %arg1: i32, %arg2: memref<1x4x256xf32, #tpu.memory_space<vmem>>, %arg3: memref<98xf32, #tpu.memory_space<smem>>, %arg4: memref<1x1x256xf32, #tpu.memory_space<vmem>>, %arg5: memref<1x256xf32, #tpu.memory_space<vmem>>, %arg6: memref<1x256xf32, #tpu.memory_space<vmem>>, %arg7: memref<1x2x22x22xf32, #tpu.memory_space<vmem>>) attributes {dimension_semantics = [#tpu.dimension_semantics<parallel>, #tpu.dimension_semantics<arbitrary>], iteration_bounds = array<i64: 2, 1>, scalar_prefetch = 0 : i64, scratch_operands = 3 : i64, tpu.core_type = #tpu.core_type<tc>, window_params = [{transform_indices = @transform_0, window_bounds = array<i64: 1, 4, 256>}, {transform_indices = @transform_1, window_bounds = array<i64: 98>}, {transform_indices = @transform_2, window_bounds = array<i64: 1, 1, 256>}]} {
    %c0_i32 = arith.constant 0 : i32
    %0 = arith.cmpi eq, %arg1, %c0_i32 : i32
    %1 = arith.extui %0 : i1 to i32
    %c0_i32_0 = arith.constant 0 : i32
    %2 = arith.cmpi ne, %1, %c0_i32_0 : i32
    scf.if %2 {
      %cst_14 = arith.constant 0.000000e+00 : f32
      %15 = vector.broadcast %cst_14 : f32 to vector<1x256xf32>
      %c0_15 = arith.constant 0 : index
      %c0_16 = arith.constant 0 : index
      %16 = vector.load %arg5[%c0_15, %c0_16] : memref<1x256xf32, #tpu.memory_space<vmem>>, vector<1x256xf32>
      tpu.vector_store %arg5[%c0_15, %c0_16], %15 {strides = array<i32>} : memref<1x256xf32, #tpu.memory_space<vmem>>, vector<1x256xf32>,
      %cst_17 = arith.constant 0xFF800000 : f32
      %17 = vector.broadcast %cst_17 : f32 to vector<1x256xf32>
      %c0_18 = arith.constant 0 : index
      %c0_19 = arith.constant 0 : index
      %18 = vector.load %arg6[%c0_18, %c0_19] : memref<1x256xf32, #tpu.memory_space<vmem>>, vector<1x256xf32>
      tpu.vector_store %arg6[%c0_18, %c0_19], %17 {strides = array<i32>} : memref<1x256xf32, #tpu.memory_space<vmem>>, vector<1x256xf32>,
    } else {
    }
    %c0 = arith.constant 0 : index
    %c0_1 = arith.constant 0 : index
    %c0_2 = arith.constant 0 : index
    %3 = vector.load %arg2[%c0, %c0_1, %c0_2] : memref<1x4x256xf32, #tpu.memory_space<vmem>>, vector<1x4x256xf32>
    %c0_3 = arith.constant 0 : index
    %c0_4 = arith.constant 0 : index
    %4 = vector.load %arg5[%c0_3, %c0_4] : memref<1x256xf32, #tpu.memory_space<vmem>>, vector<1x256xf32>
    %cst = arith.constant dense<0.000000e+00> : vector<1x256xf32>
    %5 = vector.multi_reduction <add>, %3, %cst [1] : vector<1x4x256xf32> to vector<1x256xf32>
    %6 = arith.addf %4, %5 : vector<1x256xf32>
    %c0_5 = arith.constant 0 : index
    %c0_6 = arith.constant 0 : index
    %7 = vector.load %arg5[%c0_5, %c0_6] : memref<1x256xf32, #tpu.memory_space<vmem>>, vector<1x256xf32>
    tpu.vector_store %arg5[%c0_5, %c0_6], %6 {strides = array<i32>} : memref<1x256xf32, #tpu.memory_space<vmem>>, vector<1x256xf32>,
    %c0_7 = arith.constant 0 : index
    %c0_8 = arith.constant 0 : index
    %8 = vector.load %arg6[%c0_7, %c0_8] : memref<1x256xf32, #tpu.memory_space<vmem>>, vector<1x256xf32>
    %cst_9 = arith.constant dense<0xFF800000> : vector<1x256xf32>
    %9 = vector.multi_reduction <maximumf>, %3, %cst_9 [1] : vector<1x4x256xf32> to vector<1x256xf32>
    %10 = arith.maximumf %8, %9 : vector<1x256xf32>
    %c0_10 = arith.constant 0 : index
    %c0_11 = arith.constant 0 : index
    %11 = vector.load %arg6[%c0_10, %c0_11] : memref<1x256xf32, #tpu.memory_space<vmem>>, vector<1x256xf32>
    tpu.vector_store %arg6[%c0_10, %c0_11], %10 {strides = array<i32>} : memref<1x256xf32, #tpu.memory_space<vmem>>, vector<1x256xf32>,
    %c0_i32_12 = arith.constant 0 : i32
    %12 = arith.cmpi eq, %arg1, %c0_i32_12 : i32
    %13 = arith.extui %12 : i1 to i32
    %c0_i32_13 = arith.constant 0 : i32
    %14 = arith.cmpi ne, %13, %c0_i32_13 : i32
    scf.if %14 {
      %c0_14 = arith.constant 0 : index
      %c0_15 = arith.constant 0 : index
      %15 = vector.load %arg5[%c0_14, %c0_15] : memref<1x256xf32, #tpu.memory_space<vmem>>, vector<1x256xf32>
      %cst_16 = arith.constant 2.500000e-01 : f32
      %16 = vector.broadcast %cst_16 : f32 to vector<1x256xf32>
      %17 = arith.mulf %15, %16 : vector<1x256xf32>
      %c0_17 = arith.constant 0 : index
      %c0_18 = arith.constant 0 : index
      %18 = vector.load %arg6[%c0_17, %c0_18] : memref<1x256xf32, #tpu.memory_space<vmem>>, vector<1x256xf32>
      %cst_19 = arith.constant 0.000000e+00 : f32
      %19 = vector.broadcast %cst_19 : f32 to vector<1x2x22x22xf32>
      %c0_20 = arith.constant 0 : index
      %c0_21 = arith.constant 0 : index
      %c0_22 = arith.constant 0 : index
      %c0_23 = arith.constant 0 : index
      %20 = vector.load %arg7[%c0_20, %c0_21, %c0_22, %c0_23] : memref<1x2x22x22xf32, #tpu.memory_space<vmem>>, vector<1x2x22x22xf32>
      tpu.vector_store %arg7[%c0_20, %c0_21, %c0_22, %c0_23], %19 {strides = array<i32>} : memref<1x2x22x22xf32, #tpu.memory_space<vmem>>, vector<1x2x22x22xf32>,
      %21 = vector.extract_strided_slice %17 {offsets = [0, 0], sizes = [1, 16], strides = [1, 1]} : vector<1x256xf32> to vector<1x16xf32>
      %c0_24 = arith.constant 0 : index
      %c0_25 = arith.constant 0 : index
      %c3 = arith.constant 3 : index
      %c3_26 = arith.constant 3 : index
      %22 = vector.load %arg7[%c0_24, %c0_25, %c3, %c3_26] : memref<1x2x22x22xf32, #tpu.memory_space<vmem>>, vector<1x1x1x16xf32>
      %23 = vector.shape_cast %22 : vector<1x1x1x16xf32> to vector<1x16xf32>
      %24 = vector.shape_cast %21 : vector<1x16xf32> to vector<1x1x1x16xf32>
      tpu.vector_store %arg7[%c0_24, %c0_25, %c3, %c3_26], %24 {strides = array<i32>} : memref<1x2x22x22xf32, #tpu.memory_space<vmem>>, vector<1x1x1x16xf32>,
      %25 = vector.extract_strided_slice %18 {offsets = [0, 0], sizes = [1, 16], strides = [1, 1]} : vector<1x256xf32> to vector<1x16xf32>
      %c0_27 = arith.constant 0 : index
      %c1 = arith.constant 1 : index
      %c3_28 = arith.constant 3 : index
      %c3_29 = arith.constant 3 : index
      %26 = vector.load %arg7[%c0_27, %c1, %c3_28, %c3_29] : memref<1x2x22x22xf32, #tpu.memory_space<vmem>>, vector<1x1x1x16xf32>
      %27 = vector.shape_cast %26 : vector<1x1x1x16xf32> to vector<1x16xf32>
      %28 = vector.shape_cast %25 : vector<1x16xf32> to vector<1x1x1x16xf32>
      tpu.vector_store %arg7[%c0_27, %c1, %c3_28, %c3_29], %28 {strides = array<i32>} : memref<1x2x22x22xf32, #tpu.memory_space<vmem>>, vector<1x1x1x16xf32>,
      %29 = vector.extract_strided_slice %17 {offsets = [0, 16], sizes = [1, 16], strides = [1, 1]} : vector<1x256xf32> to vector<1x16xf32>
      %c0_30 = arith.constant 0 : index
      %c0_31 = arith.constant 0 : index
      %c4 = arith.constant 4 : index
      %c3_32 = arith.constant 3 : index
      %30 = vector.load %arg7[%c0_30, %c0_31, %c4, %c3_32] : memref<1x2x22x22xf32, #tpu.memory_space<vmem>>, vector<1x1x1x16xf32>
      %31 = vector.shape_cast %30 : vector<1x1x1x16xf32> to vector<1x16xf32>
      %32 = vector.shape_cast %29 : vector<1x16xf32> to vector<1x1x1x16xf32>
      tpu.vector_store %arg7[%c0_30, %c0_31, %c4, %c3_32], %32 {strides = array<i32>} : memref<1x2x22x22xf32, #tpu.memory_space<vmem>>, vector<1x1x1x16xf32>,
      %33 = vector.extract_strided_slice %18 {offsets = [0, 16], sizes = [1, 16], strides = [1, 1]} : vector<1x256xf32> to vector<1x16xf32>
      %c0_33 = arith.constant 0 : index
      %c1_34 = arith.constant 1 : index
      %c4_35 = arith.constant 4 : index
      %c3_36 = arith.constant 3 : index
      %34 = vector.load %arg7[%c0_33, %c1_34, %c4_35, %c3_36] : memref<1x2x22x22xf32, #tpu.memory_space<vmem>>, vector<1x1x1x16xf32>
      %35 = vector.shape_cast %34 : vector<1x1x1x16xf32> to vector<1x16xf32>
      %36 = vector.shape_cast %33 : vector<1x16xf32> to vector<1x1x1x16xf32>
      tpu.vector_store %arg7[%c0_33, %c1_34, %c4_35, %c3_36], %36 {strides = array<i32>} : memref<1x2x22x22xf32, #tpu.memory_space<vmem>>, vector<1x1x1x16xf32>,
      %37 = vector.extract_strided_slice %17 {offsets = [0, 32], sizes = [1, 16], strides = [1, 1]} : vector<1x256xf32> to vector<1x16xf32>
      %c0_37 = arith.constant 0 : index
      %c0_38 = arith.constant 0 : index
      %c5 = arith.constant 5 : index
      %c3_39 = arith.constant 3 : index
      %38 = vector.load %arg7[%c0_37, %c0_38, %c5, %c3_39] : memref<1x2x22x22xf32, #tpu.memory_space<vmem>>, vector<1x1x1x16xf32>
      %39 = vector.shape_cast %38 : vector<1x1x1x16xf32> to vector<1x16xf32>
      %40 = vector.shape_cast %37 : vector<1x16xf32> to vector<1x1x1x16xf32>
      tpu.vector_store %arg7[%c0_37, %c0_38, %c5, %c3_39], %40 {strides = array<i32>} : memref<1x2x22x22xf32, #tpu.memory_space<vmem>>, vector<1x1x1x16xf32>,
      %41 = vector.extract_strided_slice %18 {offsets = [0, 32], sizes = [1, 16], strides = [1, 1]} : vector<1x256xf32> to vector<1x16xf32>
      %c0_40 = arith.constant 0 : index
      %c1_41 = arith.constant 1 : index
      %c5_42 = arith.constant 5 : index
      %c3_43 = arith.constant 3 : index
      %42 = vector.load %arg7[%c0_40, %c1_41, %c5_42, %c3_43] : memref<1x2x22x22xf32, #tpu.memory_space<vmem>>, vector<1x1x1x16xf32>
      %43 = vector.shape_cast %42 : vector<1x1x1x16xf32> to vector<1x16xf32>
      %44 = vector.shape_cast %41 : vector<1x16xf32> to vector<1x1x1x16xf32>
      tpu.vector_store %arg7[%c0_40, %c1_41, %c5_42, %c3_43], %44 {strides = array<i32>} : memref<1x2x22x22xf32, #tpu.memory_space<vmem>>, vector<1x1x1x16xf32>,
      %45 = vector.extract_strided_slice %17 {offsets = [0, 48], sizes = [1, 16], strides = [1, 1]} : vector<1x256xf32> to vector<1x16xf32>
      %c0_44 = arith.constant 0 : index
      %c0_45 = arith.constant 0 : index
      %c6 = arith.constant 6 : index
      %c3_46 = arith.constant 3 : index
      %46 = vector.load %arg7[%c0_44, %c0_45, %c6, %c3_46] : memref<1x2x22x22xf32, #tpu.memory_space<vmem>>, vector<1x1x1x16xf32>
      %47 = vector.shape_cast %46 : vector<1x1x1x16xf32> to vector<1x16xf32>
      %48 = vector.shape_cast %45 : vector<1x16xf32> to vector<1x1x1x16xf32>
      tpu.vector_store %arg7[%c0_44, %c0_45, %c6, %c3_46], %48 {strides = array<i32>} : memref<1x2x22x22xf32, #tpu.memory_space<vmem>>, vector<1x1x1x16xf32>,
      %49 = vector.extract_strided_slice %18 {offsets = [0, 48], sizes = [1, 16], strides = [1, 1]} : vector<1x256xf32> to vector<1x16xf32>
      %c0_47 = arith.constant 0 : index
      %c1_48 = arith.constant 1 : index
      %c6_49 = arith.constant 6 : index
      %c3_50 = arith.constant 3 : index
      %50 = vector.load %arg7[%c0_47, %c1_48, %c6_49, %c3_50] : memref<1x2x22x22xf32, #tpu.memory_space<vmem>>, vector<1x1x1x16xf32>
      %51 = vector.shape_cast %50 : vector<1x1x1x16xf32> to vector<1x16xf32>
      %52 = vector.shape_cast %49 : vector<1x16xf32> to vector<1x1x1x16xf32>
      tpu.vector_store %arg7[%c0_47, %c1_48, %c6_49, %c3_50], %52 {strides = array<i32>} : memref<1x2x22x22xf32, #tpu.memory_space<vmem>>, vector<1x1x1x16xf32>,
      %53 = vector.extract_strided_slice %17 {offsets = [0, 64], sizes = [1, 16], strides = [1, 1]} : vector<1x256xf32> to vector<1x16xf32>
      %c0_51 = arith.constant 0 : index
      %c0_52 = arith.constant 0 : index
      %c7 = arith.constant 7 : index
      %c3_53 = arith.constant 3 : index
      %54 = vector.load %arg7[%c0_51, %c0_52, %c7, %c3_53] : memref<1x2x22x22xf32, #tpu.memory_space<vmem>>, vector<1x1x1x16xf32>
      %55 = vector.shape_cast %54 : vector<1x1x1x16xf32> to vector<1x16xf32>
      %56 = vector.shape_cast %53 : vector<1x16xf32> to vector<1x1x1x16xf32>
      tpu.vector_store %arg7[%c0_51, %c0_52, %c7, %c3_53], %56 {strides = array<i32>} : memref<1x2x22x22xf32, #tpu.memory_space<vmem>>, vector<1x1x1x16xf32>,
      %57 = vector.extract_strided_slice %18 {offsets = [0, 64], sizes = [1, 16], strides = [1, 1]} : vector<1x256xf32> to vector<1x16xf32>
      %c0_54 = arith.constant 0 : index
      %c1_55 = arith.constant 1 : index
      %c7_56 = arith.constant 7 : index
      %c3_57 = arith.constant 3 : index
      %58 = vector.load %arg7[%c0_54, %c1_55, %c7_56, %c3_57] : memref<1x2x22x22xf32, #tpu.memory_space<vmem>>, vector<1x1x1x16xf32>
      %59 = vector.shape_cast %58 : vector<1x1x1x16xf32> to vector<1x16xf32>
      %60 = vector.shape_cast %57 : vector<1x16xf32> to vector<1x1x1x16xf32>
      tpu.vector_store %arg7[%c0_54, %c1_55, %c7_56, %c3_57], %60 {strides = array<i32>} : memref<1x2x22x22xf32, #tpu.memory_space<vmem>>, vector<1x1x1x16xf32>,
      %61 = vector.extract_strided_slice %17 {offsets = [0, 80], sizes = [1, 16], strides = [1, 1]} : vector<1x256xf32> to vector<1x16xf32>
      %c0_58 = arith.constant 0 : index
      %c0_59 = arith.constant 0 : index
      %c8 = arith.constant 8 : index
      %c3_60 = arith.constant 3 : index
      %62 = vector.load %arg7[%c0_58, %c0_59, %c8, %c3_60] : memref<1x2x22x22xf32, #tpu.memory_space<vmem>>, vector<1x1x1x16xf32>
      %63 = vector.shape_cast %62 : vector<1x1x1x16xf32> to vector<1x16xf32>
      %64 = vector.shape_cast %61 : vector<1x16xf32> to vector<1x1x1x16xf32>
      tpu.vector_store %arg7[%c0_58, %c0_59, %c8, %c3_60], %64 {strides = array<i32>} : memref<1x2x22x22xf32, #tpu.memory_space<vmem>>, vector<1x1x1x16xf32>,
      %65 = vector.extract_strided_slice %18 {offsets = [0, 80], sizes = [1, 16], strides = [1, 1]} : vector<1x256xf32> to vector<1x16xf32>
      %c0_61 = arith.constant 0 : index
      %c1_62 = arith.constant 1 : index
      %c8_63 = arith.constant 8 : index
      %c3_64 = arith.constant 3 : index
      %66 = vector.load %arg7[%c0_61, %c1_62, %c8_63, %c3_64] : memref<1x2x22x22xf32, #tpu.memory_space<vmem>>, vector<1x1x1x16xf32>
      %67 = vector.shape_cast %66 : vector<1x1x1x16xf32> to vector<1x16xf32>
      %68 = vector.shape_cast %65 : vector<1x16xf32> to vector<1x1x1x16xf32>
      tpu.vector_store %arg7[%c0_61, %c1_62, %c8_63, %c3_64], %68 {strides = array<i32>} : memref<1x2x22x22xf32, #tpu.memory_space<vmem>>, vector<1x1x1x16xf32>,
      %69 = vector.extract_strided_slice %17 {offsets = [0, 96], sizes = [1, 16], strides = [1, 1]} : vector<1x256xf32> to vector<1x16xf32>
      %c0_65 = arith.constant 0 : index
      %c0_66 = arith.constant 0 : index
      %c9 = arith.constant 9 : index
      %c3_67 = arith.constant 3 : index
      %70 = vector.load %arg7[%c0_65, %c0_66, %c9, %c3_67] : memref<1x2x22x22xf32, #tpu.memory_space<vmem>>, vector<1x1x1x16xf32>
      %71 = vector.shape_cast %70 : vector<1x1x1x16xf32> to vector<1x16xf32>
      %72 = vector.shape_cast %69 : vector<1x16xf32> to vector<1x1x1x16xf32>
      tpu.vector_store %arg7[%c0_65, %c0_66, %c9, %c3_67], %72 {strides = array<i32>} : memref<1x2x22x22xf32, #tpu.memory_space<vmem>>, vector<1x1x1x16xf32>,
      %73 = vector.extract_strided_slice %18 {offsets = [0, 96], sizes = [1, 16], strides = [1, 1]} : vector<1x256xf32> to vector<1x16xf32>
      %c0_68 = arith.constant 0 : index
      %c1_69 = arith.constant 1 : index
      %c9_70 = arith.constant 9 : index
      %c3_71 = arith.constant 3 : index
      %74 = vector.load %arg7[%c0_68, %c1_69, %c9_70, %c3_71] : memref<1x2x22x22xf32, #tpu.memory_space<vmem>>, vector<1x1x1x16xf32>
      %75 = vector.shape_cast %74 : vector<1x1x1x16xf32> to vector<1x16xf32>
      %76 = vector.shape_cast %73 : vector<1x16xf32> to vector<1x1x1x16xf32>
      tpu.vector_store %arg7[%c0_68, %c1_69, %c9_70, %c3_71], %76 {strides = array<i32>} : memref<1x2x22x22xf32, #tpu.memory_space<vmem>>, vector<1x1x1x16xf32>,
      %77 = vector.extract_strided_slice %17 {offsets = [0, 112], sizes = [1, 16], strides = [1, 1]} : vector<1x256xf32> to vector<1x16xf32>
      %c0_72 = arith.constant 0 : index
      %c0_73 = arith.constant 0 : index
      %c10 = arith.constant 10 : index
      %c3_74 = arith.constant 3 : index
      %78 = vector.load %arg7[%c0_72, %c0_73, %c10, %c3_74] : memref<1x2x22x22xf32, #tpu.memory_space<vmem>>, vector<1x1x1x16xf32>
      %79 = vector.shape_cast %78 : vector<1x1x1x16xf32> to vector<1x16xf32>
      %80 = vector.shape_cast %77 : vector<1x16xf32> to vector<1x1x1x16xf32>
      tpu.vector_store %arg7[%c0_72, %c0_73, %c10, %c3_74], %80 {strides = array<i32>} : memref<1x2x22x22xf32, #tpu.memory_space<vmem>>, vector<1x1x1x16xf32>,
      %81 = vector.extract_strided_slice %18 {offsets = [0, 112], sizes = [1, 16], strides = [1, 1]} : vector<1x256xf32> to vector<1x16xf32>
      %c0_75 = arith.constant 0 : index
      %c1_76 = arith.constant 1 : index
      %c10_77 = arith.constant 10 : index
      %c3_78 = arith.constant 3 : index
      %82 = vector.load %arg7[%c0_75, %c1_76, %c10_77, %c3_78] : memref<1x2x22x22xf32, #tpu.memory_space<vmem>>, vector<1x1x1x16xf32>
      %83 = vector.shape_cast %82 : vector<1x1x1x16xf32> to vector<1x16xf32>
      %84 = vector.shape_cast %81 : vector<1x16xf32> to vector<1x1x1x16xf32>
      tpu.vector_store %arg7[%c0_75, %c1_76, %c10_77, %c3_78], %84 {strides = array<i32>} : memref<1x2x22x22xf32, #tpu.memory_space<vmem>>, vector<1x1x1x16xf32>,
      %85 = vector.extract_strided_slice %17 {offsets = [0, 128], sizes = [1, 16], strides = [1, 1]} : vector<1x256xf32> to vector<1x16xf32>
      %c0_79 = arith.constant 0 : index
      %c0_80 = arith.constant 0 : index
      %c11 = arith.constant 11 : index
      %c3_81 = arith.constant 3 : index
      %86 = vector.load %arg7[%c0_79, %c0_80, %c11, %c3_81] : memref<1x2x22x22xf32, #tpu.memory_space<vmem>>, vector<1x1x1x16xf32>
      %87 = vector.shape_cast %86 : vector<1x1x1x16xf32> to vector<1x16xf32>
      %88 = vector.shape_cast %85 : vector<1x16xf32> to vector<1x1x1x16xf32>
      tpu.vector_store %arg7[%c0_79, %c0_80, %c11, %c3_81], %88 {strides = array<i32>} : memref<1x2x22x22xf32, #tpu.memory_space<vmem>>, vector<1x1x1x16xf32>,
      %89 = vector.extract_strided_slice %18 {offsets = [0, 128], sizes = [1, 16], strides = [1, 1]} : vector<1x256xf32> to vector<1x16xf32>
      %c0_82 = arith.constant 0 : index
      %c1_83 = arith.constant 1 : index
      %c11_84 = arith.constant 11 : index
      %c3_85 = arith.constant 3 : index
      %90 = vector.load %arg7[%c0_82, %c1_83, %c11_84, %c3_85] : memref<1x2x22x22xf32, #tpu.memory_space<vmem>>, vector<1x1x1x16xf32>
      %91 = vector.shape_cast %90 : vector<1x1x1x16xf32> to vector<1x16xf32>
      %92 = vector.shape_cast %89 : vector<1x16xf32> to vector<1x1x1x16xf32>
      tpu.vector_store %arg7[%c0_82, %c1_83, %c11_84, %c3_85], %92 {strides = array<i32>} : memref<1x2x22x22xf32, #tpu.memory_space<vmem>>, vector<1x1x1x16xf32>,
      %93 = vector.extract_strided_slice %17 {offsets = [0, 144], sizes = [1, 16], strides = [1, 1]} : vector<1x256xf32> to vector<1x16xf32>
      %c0_86 = arith.constant 0 : index
      %c0_87 = arith.constant 0 : index
      %c12 = arith.constant 12 : index
      %c3_88 = arith.constant 3 : index
      %94 = vector.load %arg7[%c0_86, %c0_87, %c12, %c3_88] : memref<1x2x22x22xf32, #tpu.memory_space<vmem>>, vector<1x1x1x16xf32>
      %95 = vector.shape_cast %94 : vector<1x1x1x16xf32> to vector<1x16xf32>
      %96 = vector.shape_cast %93 : vector<1x16xf32> to vector<1x1x1x16xf32>
      tpu.vector_store %arg7[%c0_86, %c0_87, %c12, %c3_88], %96 {strides = array<i32>} : memref<1x2x22x22xf32, #tpu.memory_space<vmem>>, vector<1x1x1x16xf32>,
      %97 = vector.extract_strided_slice %18 {offsets = [0, 144], sizes = [1, 16], strides = [1, 1]} : vector<1x256xf32> to vector<1x16xf32>
      %c0_89 = arith.constant 0 : index
      %c1_90 = arith.constant 1 : index
      %c12_91 = arith.constant 12 : index
      %c3_92 = arith.constant 3 : index
      %98 = vector.load %arg7[%c0_89, %c1_90, %c12_91, %c3_92] : memref<1x2x22x22xf32, #tpu.memory_space<vmem>>, vector<1x1x1x16xf32>
      %99 = vector.shape_cast %98 : vector<1x1x1x16xf32> to vector<1x16xf32>
      %100 = vector.shape_cast %97 : vector<1x16xf32> to vector<1x1x1x16xf32>
      tpu.vector_store %arg7[%c0_89, %c1_90, %c12_91, %c3_92], %100 {strides = array<i32>} : memref<1x2x22x22xf32, #tpu.memory_space<vmem>>, vector<1x1x1x16xf32>,
      %101 = vector.extract_strided_slice %17 {offsets = [0, 160], sizes = [1, 16], strides = [1, 1]} : vector<1x256xf32> to vector<1x16xf32>
      %c0_93 = arith.constant 0 : index
      %c0_94 = arith.constant 0 : index
      %c13 = arith.constant 13 : index
      %c3_95 = arith.constant 3 : index
      %102 = vector.load %arg7[%c0_93, %c0_94, %c13, %c3_95] : memref<1x2x22x22xf32, #tpu.memory_space<vmem>>, vector<1x1x1x16xf32>
      %103 = vector.shape_cast %102 : vector<1x1x1x16xf32> to vector<1x16xf32>
      %104 = vector.shape_cast %101 : vector<1x16xf32> to vector<1x1x1x16xf32>
      tpu.vector_store %arg7[%c0_93, %c0_94, %c13, %c3_95], %104 {strides = array<i32>} : memref<1x2x22x22xf32, #tpu.memory_space<vmem>>, vector<1x1x1x16xf32>,
      %105 = vector.extract_strided_slice %18 {offsets = [0, 160], sizes = [1, 16], strides = [1, 1]} : vector<1x256xf32> to vector<1x16xf32>
      %c0_96 = arith.constant 0 : index
      %c1_97 = arith.constant 1 : index
      %c13_98 = arith.constant 13 : index
      %c3_99 = arith.constant 3 : index
      %106 = vector.load %arg7[%c0_96, %c1_97, %c13_98, %c3_99] : memref<1x2x22x22xf32, #tpu.memory_space<vmem>>, vector<1x1x1x16xf32>
      %107 = vector.shape_cast %106 : vector<1x1x1x16xf32> to vector<1x16xf32>
      %108 = vector.shape_cast %105 : vector<1x16xf32> to vector<1x1x1x16xf32>
      tpu.vector_store %arg7[%c0_96, %c1_97, %c13_98, %c3_99], %108 {strides = array<i32>} : memref<1x2x22x22xf32, #tpu.memory_space<vmem>>, vector<1x1x1x16xf32>,
      %109 = vector.extract_strided_slice %17 {offsets = [0, 176], sizes = [1, 16], strides = [1, 1]} : vector<1x256xf32> to vector<1x16xf32>
      %c0_100 = arith.constant 0 : index
      %c0_101 = arith.constant 0 : index
      %c14 = arith.constant 14 : index
      %c3_102 = arith.constant 3 : index
      %110 = vector.load %arg7[%c0_100, %c0_101, %c14, %c3_102] : memref<1x2x22x22xf32, #tpu.memory_space<vmem>>, vector<1x1x1x16xf32>
      %111 = vector.shape_cast %110 : vector<1x1x1x16xf32> to vector<1x16xf32>
      %112 = vector.shape_cast %109 : vector<1x16xf32> to vector<1x1x1x16xf32>
      tpu.vector_store %arg7[%c0_100, %c0_101, %c14, %c3_102], %112 {strides = array<i32>} : memref<1x2x22x22xf32, #tpu.memory_space<vmem>>, vector<1x1x1x16xf32>,
      %113 = vector.extract_strided_slice %18 {offsets = [0, 176], sizes = [1, 16], strides = [1, 1]} : vector<1x256xf32> to vector<1x16xf32>
      %c0_103 = arith.constant 0 : index
      %c1_104 = arith.constant 1 : index
      %c14_105 = arith.constant 14 : index
      %c3_106 = arith.constant 3 : index
      %114 = vector.load %arg7[%c0_103, %c1_104, %c14_105, %c3_106] : memref<1x2x22x22xf32, #tpu.memory_space<vmem>>, vector<1x1x1x16xf32>
      %115 = vector.shape_cast %114 : vector<1x1x1x16xf32> to vector<1x16xf32>
      %116 = vector.shape_cast %113 : vector<1x16xf32> to vector<1x1x1x16xf32>
      tpu.vector_store %arg7[%c0_103, %c1_104, %c14_105, %c3_106], %116 {strides = array<i32>} : memref<1x2x22x22xf32, #tpu.memory_space<vmem>>, vector<1x1x1x16xf32>,
      %117 = vector.extract_strided_slice %17 {offsets = [0, 192], sizes = [1, 16], strides = [1, 1]} : vector<1x256xf32> to vector<1x16xf32>
      %c0_107 = arith.constant 0 : index
      %c0_108 = arith.constant 0 : index
      %c15 = arith.constant 15 : index
      %c3_109 = arith.constant 3 : index
      %118 = vector.load %arg7[%c0_107, %c0_108, %c15, %c3_109] : memref<1x2x22x22xf32, #tpu.memory_space<vmem>>, vector<1x1x1x16xf32>
      %119 = vector.shape_cast %118 : vector<1x1x1x16xf32> to vector<1x16xf32>
      %120 = vector.shape_cast %117 : vector<1x16xf32> to vector<1x1x1x16xf32>
      tpu.vector_store %arg7[%c0_107, %c0_108, %c15, %c3_109], %120 {strides = array<i32>} : memref<1x2x22x22xf32, #tpu.memory_space<vmem>>, vector<1x1x1x16xf32>,
      %121 = vector.extract_strided_slice %18 {offsets = [0, 192], sizes = [1, 16], strides = [1, 1]} : vector<1x256xf32> to vector<1x16xf32>
      %c0_110 = arith.constant 0 : index
      %c1_111 = arith.constant 1 : index
      %c15_112 = arith.constant 15 : index
      %c3_113 = arith.constant 3 : index
      %122 = vector.load %arg7[%c0_110, %c1_111, %c15_112, %c3_113] : memref<1x2x22x22xf32, #tpu.memory_space<vmem>>, vector<1x1x1x16xf32>
      %123 = vector.shape_cast %122 : vector<1x1x1x16xf32> to vector<1x16xf32>
      %124 = vector.shape_cast %121 : vector<1x16xf32> to vector<1x1x1x16xf32>
      tpu.vector_store %arg7[%c0_110, %c1_111, %c15_112, %c3_113], %124 {strides = array<i32>} : memref<1x2x22x22xf32, #tpu.memory_space<vmem>>, vector<1x1x1x16xf32>,
      %125 = vector.extract_strided_slice %17 {offsets = [0, 208], sizes = [1, 16], strides = [1, 1]} : vector<1x256xf32> to vector<1x16xf32>
      %c0_114 = arith.constant 0 : index
      %c0_115 = arith.constant 0 : index
      %c16 = arith.constant 16 : index
      %c3_116 = arith.constant 3 : index
      %126 = vector.load %arg7[%c0_114, %c0_115, %c16, %c3_116] : memref<1x2x22x22xf32, #tpu.memory_space<vmem>>, vector<1x1x1x16xf32>
      %127 = vector.shape_cast %126 : vector<1x1x1x16xf32> to vector<1x16xf32>
      %128 = vector.shape_cast %125 : vector<1x16xf32> to vector<1x1x1x16xf32>
      tpu.vector_store %arg7[%c0_114, %c0_115, %c16, %c3_116], %128 {strides = array<i32>} : memref<1x2x22x22xf32, #tpu.memory_space<vmem>>, vector<1x1x1x16xf32>,
      %129 = vector.extract_strided_slice %18 {offsets = [0, 208], sizes = [1, 16], strides = [1, 1]} : vector<1x256xf32> to vector<1x16xf32>
      %c0_117 = arith.constant 0 : index
      %c1_118 = arith.constant 1 : index
      %c16_119 = arith.constant 16 : index
      %c3_120 = arith.constant 3 : index
      %130 = vector.load %arg7[%c0_117, %c1_118, %c16_119, %c3_120] : memref<1x2x22x22xf32, #tpu.memory_space<vmem>>, vector<1x1x1x16xf32>
      %131 = vector.shape_cast %130 : vector<1x1x1x16xf32> to vector<1x16xf32>
      %132 = vector.shape_cast %129 : vector<1x16xf32> to vector<1x1x1x16xf32>
      tpu.vector_store %arg7[%c0_117, %c1_118, %c16_119, %c3_120], %132 {strides = array<i32>} : memref<1x2x22x22xf32, #tpu.memory_space<vmem>>, vector<1x1x1x16xf32>,
      %133 = vector.extract_strided_slice %17 {offsets = [0, 224], sizes = [1, 16], strides = [1, 1]} : vector<1x256xf32> to vector<1x16xf32>
      %c0_121 = arith.constant 0 : index
      %c0_122 = arith.constant 0 : index
      %c17 = arith.constant 17 : index
      %c3_123 = arith.constant 3 : index
      %134 = vector.load %arg7[%c0_121, %c0_122, %c17, %c3_123] : memref<1x2x22x22xf32, #tpu.memory_space<vmem>>, vector<1x1x1x16xf32>
      %135 = vector.shape_cast %134 : vector<1x1x1x16xf32> to vector<1x16xf32>
      %136 = vector.shape_cast %133 : vector<1x16xf32> to vector<1x1x1x16xf32>
      tpu.vector_store %arg7[%c0_121, %c0_122, %c17, %c3_123], %136 {strides = array<i32>} : memref<1x2x22x22xf32, #tpu.memory_space<vmem>>, vector<1x1x1x16xf32>,
      %137 = vector.extract_strided_slice %18 {offsets = [0, 224], sizes = [1, 16], strides = [1, 1]} : vector<1x256xf32> to vector<1x16xf32>
      %c0_124 = arith.constant 0 : index
      %c1_125 = arith.constant 1 : index
      %c17_126 = arith.constant 17 : index
      %c3_127 = arith.constant 3 : index
      %138 = vector.load %arg7[%c0_124, %c1_125, %c17_126, %c3_127] : memref<1x2x22x22xf32, #tpu.memory_space<vmem>>, vector<1x1x1x16xf32>
      %139 = vector.shape_cast %138 : vector<1x1x1x16xf32> to vector<1x16xf32>
      %140 = vector.shape_cast %137 : vector<1x16xf32> to vector<1x1x1x16xf32>
      tpu.vector_store %arg7[%c0_124, %c1_125, %c17_126, %c3_127], %140 {strides = array<i32>} : memref<1x2x22x22xf32, #tpu.memory_space<vmem>>, vector<1x1x1x16xf32>,
      %141 = vector.extract_strided_slice %17 {offsets = [0, 240], sizes = [1, 16], strides = [1, 1]} : vector<1x256xf32> to vector<1x16xf32>
      %c0_128 = arith.constant 0 : index
      %c0_129 = arith.constant 0 : index
      %c18 = arith.constant 18 : index
      %c3_130 = arith.constant 3 : index
      %142 = vector.load %arg7[%c0_128, %c0_129, %c18, %c3_130] : memref<1x2x22x22xf32, #tpu.memory_space<vmem>>, vector<1x1x1x16xf32>
      %143 = vector.shape_cast %142 : vector<1x1x1x16xf32> to vector<1x16xf32>
      %144 = vector.shape_cast %141 : vector<1x16xf32> to vector<1x1x1x16xf32>
      tpu.vector_store %arg7[%c0_128, %c0_129, %c18, %c3_130], %144 {strides = array<i32>} : memref<1x2x22x22xf32, #tpu.memory_space<vmem>>, vector<1x1x1x16xf32>,
      %145 = vector.extract_strided_slice %18 {offsets = [0, 240], sizes = [1, 16], strides = [1, 1]} : vector<1x256xf32> to vector<1x16xf32>
      %c0_131 = arith.constant 0 : index
      %c1_132 = arith.constant 1 : index
      %c18_133 = arith.constant 18 : index
      %c3_134 = arith.constant 3 : index
      %146 = vector.load %arg7[%c0_131, %c1_132, %c18_133, %c3_134] : memref<1x2x22x22xf32, #tpu.memory_space<vmem>>, vector<1x1x1x16xf32>
      %147 = vector.shape_cast %146 : vector<1x1x1x16xf32> to vector<1x16xf32>
      %148 = vector.shape_cast %145 : vector<1x16xf32> to vector<1x1x1x16xf32>
      tpu.vector_store %arg7[%c0_131, %c1_132, %c18_133, %c3_134], %148 {strides = array<i32>} : memref<1x2x22x22xf32, #tpu.memory_space<vmem>>, vector<1x1x1x16xf32>,
      %cst_135 = arith.constant 0.000000e+00 : f32
      %149 = vector.broadcast %cst_135 : f32 to vector<1x16x16xf32>
      %cst_136 = arith.constant 0.000000e+00 : f32
      %150 = vector.broadcast %cst_136 : f32 to vector<1x16x16xf32>
      %cst_137 = arith.constant 0.000000e+00 : f32
      %151 = vector.broadcast %cst_137 : f32 to vector<1x16x16xf32>
      %cst_138 = arith.constant 0.000000e+00 : f32
      %152 = vector.broadcast %cst_138 : f32 to vector<1x16x16xf32>
      %c0_139 = arith.constant 0 : index
      %c0_140 = arith.constant 0 : index
      %c0_141 = arith.constant 0 : index
      %c0_142 = arith.constant 0 : index
      %153 = vector.load %arg7[%c0_139, %c0_140, %c0_141, %c0_142] : memref<1x2x22x22xf32, #tpu.memory_space<vmem>>, vector<1x1x16x22xf32>
      %154 = vector.shape_cast %153 : vector<1x1x16x22xf32> to vector<1x16x22xf32>
      %c0_143 = arith.constant 0 : index
      %155 = memref.load %arg3[%c0_143] : memref<98xf32, #tpu.memory_space<smem>>
      %156 = vector.extract_strided_slice %154 {offsets = [0, 0, 0], sizes = [1, 16, 16], strides = [1, 1, 1]} : vector<1x16x22xf32> to vector<1x16x16xf32>
      %157 = vector.broadcast %155 : f32 to vector<1x16x16xf32>
      %158 = arith.mulf %157, %156 : vector<1x16x16xf32>
      %159 = arith.addf %149, %158 : vector<1x16x16xf32>
      %c1_144 = arith.constant 1 : index
      %160 = memref.load %arg3[%c1_144] : memref<98xf32, #tpu.memory_space<smem>>
      %161 = vector.extract_strided_slice %154 {offsets = [0, 0, 1], sizes = [1, 16, 16], strides = [1, 1, 1]} : vector<1x16x22xf32> to vector<1x16x16xf32>
      %162 = vector.broadcast %160 : f32 to vector<1x16x16xf32>
      %163 = arith.mulf %162, %161 : vector<1x16x16xf32>
      %164 = arith.addf %150, %163 : vector<1x16x16xf32>
      %c2 = arith.constant 2 : index
      %165 = memref.load %arg3[%c2] : memref<98xf32, #tpu.memory_space<smem>>
      %166 = vector.extract_strided_slice %154 {offsets = [0, 0, 2], sizes = [1, 16, 16], strides = [1, 1, 1]} : vector<1x16x22xf32> to vector<1x16x16xf32>
      %167 = vector.broadcast %165 : f32 to vector<1x16x16xf32>
      %168 = arith.mulf %167, %166 : vector<1x16x16xf32>
      %169 = arith.addf %151, %168 : vector<1x16x16xf32>
      %c3_145 = arith.constant 3 : index
      %170 = memref.load %arg3[%c3_145] : memref<98xf32, #tpu.memory_space<smem>>
      %171 = vector.extract_strided_slice %154 {offsets = [0, 0, 3], sizes = [1, 16, 16], strides = [1, 1, 1]} : vector<1x16x22xf32> to vector<1x16x16xf32>
      %172 = vector.broadcast %170 : f32 to vector<1x16x16xf32>
      %173 = arith.mulf %172, %171 : vector<1x16x16xf32>
      %174 = arith.addf %152, %173 : vector<1x16x16xf32>
      %c4_146 = arith.constant 4 : index
      %175 = memref.load %arg3[%c4_146] : memref<98xf32, #tpu.memory_space<smem>>
      %176 = vector.extract_strided_slice %154 {offsets = [0, 0, 4], sizes = [1, 16, 16], strides = [1, 1, 1]} : vector<1x16x22xf32> to vector<1x16x16xf32>
      %177 = vector.broadcast %175 : f32 to vector<1x16x16xf32>
      %178 = arith.mulf %177, %176 : vector<1x16x16xf32>
      %179 = arith.addf %159, %178 : vector<1x16x16xf32>
      %c5_147 = arith.constant 5 : index
      %180 = memref.load %arg3[%c5_147] : memref<98xf32, #tpu.memory_space<smem>>
      %181 = vector.extract_strided_slice %154 {offsets = [0, 0, 5], sizes = [1, 16, 16], strides = [1, 1, 1]} : vector<1x16x22xf32> to vector<1x16x16xf32>
      %182 = vector.broadcast %180 : f32 to vector<1x16x16xf32>
      %183 = arith.mulf %182, %181 : vector<1x16x16xf32>
      %184 = arith.addf %164, %183 : vector<1x16x16xf32>
      %c6_148 = arith.constant 6 : index
      %185 = memref.load %arg3[%c6_148] : memref<98xf32, #tpu.memory_space<smem>>
      %186 = vector.extract_strided_slice %154 {offsets = [0, 0, 6], sizes = [1, 16, 16], strides = [1, 1, 1]} : vector<1x16x22xf32> to vector<1x16x16xf32>
      %187 = vector.broadcast %185 : f32 to vector<1x16x16xf32>
      %188 = arith.mulf %187, %186 : vector<1x16x16xf32>
      %189 = arith.addf %169, %188 : vector<1x16x16xf32>
      %c0_149 = arith.constant 0 : index
      %c0_150 = arith.constant 0 : index
      %c1_151 = arith.constant 1 : index
      %c0_152 = arith.constant 0 : index
      %190 = vector.load %arg7[%c0_149, %c0_150, %c1_151, %c0_152] : memref<1x2x22x22xf32, #tpu.memory_space<vmem>>, vector<1x1x16x22xf32>
      %191 = vector.shape_cast %190 : vector<1x1x16x22xf32> to vector<1x16x22xf32>
      %c7_153 = arith.constant 7 : index
      %192 = memref.load %arg3[%c7_153] : memref<98xf32, #tpu.memory_space<smem>>
      %193 = vector.extract_strided_slice %191 {offsets = [0, 0, 0], sizes = [1, 16, 16], strides = [1, 1, 1]} : vector<1x16x22xf32> to vector<1x16x16xf32>
      %194 = vector.broadcast %192 : f32 to vector<1x16x16xf32>
      %195 = arith.mulf %194, %193 : vector<1x16x16xf32>
      %196 = arith.addf %174, %195 : vector<1x16x16xf32>
      %c8_154 = arith.constant 8 : index
      %197 = memref.load %arg3[%c8_154] : memref<98xf32, #tpu.memory_space<smem>>
      %198 = vector.extract_strided_slice %191 {offsets = [0, 0, 1], sizes = [1, 16, 16], strides = [1, 1, 1]} : vector<1x16x22xf32> to vector<1x16x16xf32>
      %199 = vector.broadcast %197 : f32 to vector<1x16x16xf32>
      %200 = arith.mulf %199, %198 : vector<1x16x16xf32>
      %201 = arith.addf %179, %200 : vector<1x16x16xf32>
      %c9_155 = arith.constant 9 : index
      %202 = memref.load %arg3[%c9_155] : memref<98xf32, #tpu.memory_space<smem>>
      %203 = vector.extract_strided_slice %191 {offsets = [0, 0, 2], sizes = [1, 16, 16], strides = [1, 1, 1]} : vector<1x16x22xf32> to vector<1x16x16xf32>
      %204 = vector.broadcast %202 : f32 to vector<1x16x16xf32>
      %205 = arith.mulf %204, %203 : vector<1x16x16xf32>
      %206 = arith.addf %184, %205 : vector<1x16x16xf32>
      %c10_156 = arith.constant 10 : index
      %207 = memref.load %arg3[%c10_156] : memref<98xf32, #tpu.memory_space<smem>>
      %208 = vector.extract_strided_slice %191 {offsets = [0, 0, 3], sizes = [1, 16, 16], strides = [1, 1, 1]} : vector<1x16x22xf32> to vector<1x16x16xf32>
      %209 = vector.broadcast %207 : f32 to vector<1x16x16xf32>
      %210 = arith.mulf %209, %208 : vector<1x16x16xf32>
      %211 = arith.addf %189, %210 : vector<1x16x16xf32>
      %c11_157 = arith.constant 11 : index
      %212 = memref.load %arg3[%c11_157] : memref<98xf32, #tpu.memory_space<smem>>
      %213 = vector.extract_strided_slice %191 {offsets = [0, 0, 4], sizes = [1, 16, 16], strides = [1, 1, 1]} : vector<1x16x22xf32> to vector<1x16x16xf32>
      %214 = vector.broadcast %212 : f32 to vector<1x16x16xf32>
      %215 = arith.mulf %214, %213 : vector<1x16x16xf32>
      %216 = arith.addf %196, %215 : vector<1x16x16xf32>
      %c12_158 = arith.constant 12 : index
      %217 = memref.load %arg3[%c12_158] : memref<98xf32, #tpu.memory_space<smem>>
      %218 = vector.extract_strided_slice %191 {offsets = [0, 0, 5], sizes = [1, 16, 16], strides = [1, 1, 1]} : vector<1x16x22xf32> to vector<1x16x16xf32>
      %219 = vector.broadcast %217 : f32 to vector<1x16x16xf32>
      %220 = arith.mulf %219, %218 : vector<1x16x16xf32>
      %221 = arith.addf %201, %220 : vector<1x16x16xf32>
      %c13_159 = arith.constant 13 : index
      %222 = memref.load %arg3[%c13_159] : memref<98xf32, #tpu.memory_space<smem>>
      %223 = vector.extract_strided_slice %191 {offsets = [0, 0, 6], sizes = [1, 16, 16], strides = [1, 1, 1]} : vector<1x16x22xf32> to vector<1x16x16xf32>
      %224 = vector.broadcast %222 : f32 to vector<1x16x16xf32>
      %225 = arith.mulf %224, %223 : vector<1x16x16xf32>
      %226 = arith.addf %206, %225 : vector<1x16x16xf32>
      %c0_160 = arith.constant 0 : index
      %c0_161 = arith.constant 0 : index
      %c2_162 = arith.constant 2 : index
      %c0_163 = arith.constant 0 : index
      %227 = vector.load %arg7[%c0_160, %c0_161, %c2_162, %c0_163] : memref<1x2x22x22xf32, #tpu.memory_space<vmem>>, vector<1x1x16x22xf32>
      %228 = vector.shape_cast %227 : vector<1x1x16x22xf32> to vector<1x16x22xf32>
      %c14_164 = arith.constant 14 : index
      %229 = memref.load %arg3[%c14_164] : memref<98xf32, #tpu.memory_space<smem>>
      %230 = vector.extract_strided_slice %228 {offsets = [0, 0, 0], sizes = [1, 16, 16], strides = [1, 1, 1]} : vector<1x16x22xf32> to vector<1x16x16xf32>
      %231 = vector.broadcast %229 : f32 to vector<1x16x16xf32>
      %232 = arith.mulf %231, %230 : vector<1x16x16xf32>
      %233 = arith.addf %211, %232 : vector<1x16x16xf32>
      %c15_165 = arith.constant 15 : index
      %234 = memref.load %arg3[%c15_165] : memref<98xf32, #tpu.memory_space<smem>>
      %235 = vector.extract_strided_slice %228 {offsets = [0, 0, 1], sizes = [1, 16, 16], strides = [1, 1, 1]} : vector<1x16x22xf32> to vector<1x16x16xf32>
      %236 = vector.broadcast %234 : f32 to vector<1x16x16xf32>
      %237 = arith.mulf %236, %235 : vector<1x16x16xf32>
      %238 = arith.addf %216, %237 : vector<1x16x16xf32>
      %c16_166 = arith.constant 16 : index
      %239 = memref.load %arg3[%c16_166] : memref<98xf32, #tpu.memory_space<smem>>
      %240 = vector.extract_strided_slice %228 {offsets = [0, 0, 2], sizes = [1, 16, 16], strides = [1, 1, 1]} : vector<1x16x22xf32> to vector<1x16x16xf32>
      %241 = vector.broadcast %239 : f32 to vector<1x16x16xf32>
      %242 = arith.mulf %241, %240 : vector<1x16x16xf32>
      %243 = arith.addf %221, %242 : vector<1x16x16xf32>
      %c17_167 = arith.constant 17 : index
      %244 = memref.load %arg3[%c17_167] : memref<98xf32, #tpu.memory_space<smem>>
      %245 = vector.extract_strided_slice %228 {offsets = [0, 0, 3], sizes = [1, 16, 16], strides = [1, 1, 1]} : vector<1x16x22xf32> to vector<1x16x16xf32>
      %246 = vector.broadcast %244 : f32 to vector<1x16x16xf32>
      %247 = arith.mulf %246, %245 : vector<1x16x16xf32>
      %248 = arith.addf %226, %247 : vector<1x16x16xf32>
      %c18_168 = arith.constant 18 : index
      %249 = memref.load %arg3[%c18_168] : memref<98xf32, #tpu.memory_space<smem>>
      %250 = vector.extract_strided_slice %228 {offsets = [0, 0, 4], sizes = [1, 16, 16], strides = [1, 1, 1]} : vector<1x16x22xf32> to vector<1x16x16xf32>
      %251 = vector.broadcast %249 : f32 to vector<1x16x16xf32>
      %252 = arith.mulf %251, %250 : vector<1x16x16xf32>
      %253 = arith.addf %233, %252 : vector<1x16x16xf32>
      %c19 = arith.constant 19 : index
      %254 = memref.load %arg3[%c19] : memref<98xf32, #tpu.memory_space<smem>>
      %255 = vector.extract_strided_slice %228 {offsets = [0, 0, 5], sizes = [1, 16, 16], strides = [1, 1, 1]} : vector<1x16x22xf32> to vector<1x16x16xf32>
      %256 = vector.broadcast %254 : f32 to vector<1x16x16xf32>
      %257 = arith.mulf %256, %255 : vector<1x16x16xf32>
      %258 = arith.addf %238, %257 : vector<1x16x16xf32>
      %c20 = arith.constant 20 : index
      %259 = memref.load %arg3[%c20] : memref<98xf32, #tpu.memory_space<smem>>
      %260 = vector.extract_strided_slice %228 {offsets = [0, 0, 6], sizes = [1, 16, 16], strides = [1, 1, 1]} : vector<1x16x22xf32> to vector<1x16x16xf32>
      %261 = vector.broadcast %259 : f32 to vector<1x16x16xf32>
      %262 = arith.mulf %261, %260 : vector<1x16x16xf32>
      %263 = arith.addf %243, %262 : vector<1x16x16xf32>
      %c0_169 = arith.constant 0 : index
      %c0_170 = arith.constant 0 : index
      %c3_171 = arith.constant 3 : index
      %c0_172 = arith.constant 0 : index
      %264 = vector.load %arg7[%c0_169, %c0_170, %c3_171, %c0_172] : memref<1x2x22x22xf32, #tpu.memory_space<vmem>>, vector<1x1x16x22xf32>
      %265 = vector.shape_cast %264 : vector<1x1x16x22xf32> to vector<1x16x22xf32>
      %c21 = arith.constant 21 : index
      %266 = memref.load %arg3[%c21] : memref<98xf32, #tpu.memory_space<smem>>
      %267 = vector.extract_strided_slice %265 {offsets = [0, 0, 0], sizes = [1, 16, 16], strides = [1, 1, 1]} : vector<1x16x22xf32> to vector<1x16x16xf32>
      %268 = vector.broadcast %266 : f32 to vector<1x16x16xf32>
      %269 = arith.mulf %268, %267 : vector<1x16x16xf32>
      %270 = arith.addf %248, %269 : vector<1x16x16xf32>
      %c22 = arith.constant 22 : index
      %271 = memref.load %arg3[%c22] : memref<98xf32, #tpu.memory_space<smem>>
      %272 = vector.extract_strided_slice %265 {offsets = [0, 0, 1], sizes = [1, 16, 16], strides = [1, 1, 1]} : vector<1x16x22xf32> to vector<1x16x16xf32>
      %273 = vector.broadcast %271 : f32 to vector<1x16x16xf32>
      %274 = arith.mulf %273, %272 : vector<1x16x16xf32>
      %275 = arith.addf %253, %274 : vector<1x16x16xf32>
      %c23 = arith.constant 23 : index
      %276 = memref.load %arg3[%c23] : memref<98xf32, #tpu.memory_space<smem>>
      %277 = vector.extract_strided_slice %265 {offsets = [0, 0, 2], sizes = [1, 16, 16], strides = [1, 1, 1]} : vector<1x16x22xf32> to vector<1x16x16xf32>
      %278 = vector.broadcast %276 : f32 to vector<1x16x16xf32>
      %279 = arith.mulf %278, %277 : vector<1x16x16xf32>
      %280 = arith.addf %258, %279 : vector<1x16x16xf32>
      %c24 = arith.constant 24 : index
      %281 = memref.load %arg3[%c24] : memref<98xf32, #tpu.memory_space<smem>>
      %282 = vector.extract_strided_slice %265 {offsets = [0, 0, 3], sizes = [1, 16, 16], strides = [1, 1, 1]} : vector<1x16x22xf32> to vector<1x16x16xf32>
      %283 = vector.broadcast %281 : f32 to vector<1x16x16xf32>
      %284 = arith.mulf %283, %282 : vector<1x16x16xf32>
      %285 = arith.addf %263, %284 : vector<1x16x16xf32>
      %c25 = arith.constant 25 : index
      %286 = memref.load %arg3[%c25] : memref<98xf32, #tpu.memory_space<smem>>
      %287 = vector.extract_strided_slice %265 {offsets = [0, 0, 4], sizes = [1, 16, 16], strides = [1, 1, 1]} : vector<1x16x22xf32> to vector<1x16x16xf32>
      %288 = vector.broadcast %286 : f32 to vector<1x16x16xf32>
      %289 = arith.mulf %288, %287 : vector<1x16x16xf32>
      %290 = arith.addf %270, %289 : vector<1x16x16xf32>
      %c26 = arith.constant 26 : index
      %291 = memref.load %arg3[%c26] : memref<98xf32, #tpu.memory_space<smem>>
      %292 = vector.extract_strided_slice %265 {offsets = [0, 0, 5], sizes = [1, 16, 16], strides = [1, 1, 1]} : vector<1x16x22xf32> to vector<1x16x16xf32>
      %293 = vector.broadcast %291 : f32 to vector<1x16x16xf32>
      %294 = arith.mulf %293, %292 : vector<1x16x16xf32>
      %295 = arith.addf %275, %294 : vector<1x16x16xf32>
      %c27 = arith.constant 27 : index
      %296 = memref.load %arg3[%c27] : memref<98xf32, #tpu.memory_space<smem>>
      %297 = vector.extract_strided_slice %265 {offsets = [0, 0, 6], sizes = [1, 16, 16], strides = [1, 1, 1]} : vector<1x16x22xf32> to vector<1x16x16xf32>
      %298 = vector.broadcast %296 : f32 to vector<1x16x16xf32>
      %299 = arith.mulf %298, %297 : vector<1x16x16xf32>
      %300 = arith.addf %280, %299 : vector<1x16x16xf32>
      %c0_173 = arith.constant 0 : index
      %c0_174 = arith.constant 0 : index
      %c4_175 = arith.constant 4 : index
      %c0_176 = arith.constant 0 : index
      %301 = vector.load %arg7[%c0_173, %c0_174, %c4_175, %c0_176] : memref<1x2x22x22xf32, #tpu.memory_space<vmem>>, vector<1x1x16x22xf32>
      %302 = vector.shape_cast %301 : vector<1x1x16x22xf32> to vector<1x16x22xf32>
      %c28 = arith.constant 28 : index
      %303 = memref.load %arg3[%c28] : memref<98xf32, #tpu.memory_space<smem>>
      %304 = vector.extract_strided_slice %302 {offsets = [0, 0, 0], sizes = [1, 16, 16], strides = [1, 1, 1]} : vector<1x16x22xf32> to vector<1x16x16xf32>
      %305 = vector.broadcast %303 : f32 to vector<1x16x16xf32>
      %306 = arith.mulf %305, %304 : vector<1x16x16xf32>
      %307 = arith.addf %285, %306 : vector<1x16x16xf32>
      %c29 = arith.constant 29 : index
      %308 = memref.load %arg3[%c29] : memref<98xf32, #tpu.memory_space<smem>>
      %309 = vector.extract_strided_slice %302 {offsets = [0, 0, 1], sizes = [1, 16, 16], strides = [1, 1, 1]} : vector<1x16x22xf32> to vector<1x16x16xf32>
      %310 = vector.broadcast %308 : f32 to vector<1x16x16xf32>
      %311 = arith.mulf %310, %309 : vector<1x16x16xf32>
      %312 = arith.addf %290, %311 : vector<1x16x16xf32>
      %c30 = arith.constant 30 : index
      %313 = memref.load %arg3[%c30] : memref<98xf32, #tpu.memory_space<smem>>
      %314 = vector.extract_strided_slice %302 {offsets = [0, 0, 2], sizes = [1, 16, 16], strides = [1, 1, 1]} : vector<1x16x22xf32> to vector<1x16x16xf32>
      %315 = vector.broadcast %313 : f32 to vector<1x16x16xf32>
      %316 = arith.mulf %315, %314 : vector<1x16x16xf32>
      %317 = arith.addf %295, %316 : vector<1x16x16xf32>
      %c31 = arith.constant 31 : index
      %318 = memref.load %arg3[%c31] : memref<98xf32, #tpu.memory_space<smem>>
      %319 = vector.extract_strided_slice %302 {offsets = [0, 0, 3], sizes = [1, 16, 16], strides = [1, 1, 1]} : vector<1x16x22xf32> to vector<1x16x16xf32>
      %320 = vector.broadcast %318 : f32 to vector<1x16x16xf32>
      %321 = arith.mulf %320, %319 : vector<1x16x16xf32>
      %322 = arith.addf %300, %321 : vector<1x16x16xf32>
      %c32 = arith.constant 32 : index
      %323 = memref.load %arg3[%c32] : memref<98xf32, #tpu.memory_space<smem>>
      %324 = vector.extract_strided_slice %302 {offsets = [0, 0, 4], sizes = [1, 16, 16], strides = [1, 1, 1]} : vector<1x16x22xf32> to vector<1x16x16xf32>
      %325 = vector.broadcast %323 : f32 to vector<1x16x16xf32>
      %326 = arith.mulf %325, %324 : vector<1x16x16xf32>
      %327 = arith.addf %307, %326 : vector<1x16x16xf32>
      %c33 = arith.constant 33 : index
      %328 = memref.load %arg3[%c33] : memref<98xf32, #tpu.memory_space<smem>>
      %329 = vector.extract_strided_slice %302 {offsets = [0, 0, 5], sizes = [1, 16, 16], strides = [1, 1, 1]} : vector<1x16x22xf32> to vector<1x16x16xf32>
      %330 = vector.broadcast %328 : f32 to vector<1x16x16xf32>
      %331 = arith.mulf %330, %329 : vector<1x16x16xf32>
      %332 = arith.addf %312, %331 : vector<1x16x16xf32>
      %c34 = arith.constant 34 : index
      %333 = memref.load %arg3[%c34] : memref<98xf32, #tpu.memory_space<smem>>
      %334 = vector.extract_strided_slice %302 {offsets = [0, 0, 6], sizes = [1, 16, 16], strides = [1, 1, 1]} : vector<1x16x22xf32> to vector<1x16x16xf32>
      %335 = vector.broadcast %333 : f32 to vector<1x16x16xf32>
      %336 = arith.mulf %335, %334 : vector<1x16x16xf32>
      %337 = arith.addf %317, %336 : vector<1x16x16xf32>
      %c0_177 = arith.constant 0 : index
      %c0_178 = arith.constant 0 : index
      %c5_179 = arith.constant 5 : index
      %c0_180 = arith.constant 0 : index
      %338 = vector.load %arg7[%c0_177, %c0_178, %c5_179, %c0_180] : memref<1x2x22x22xf32, #tpu.memory_space<vmem>>, vector<1x1x16x22xf32>
      %339 = vector.shape_cast %338 : vector<1x1x16x22xf32> to vector<1x16x22xf32>
      %c35 = arith.constant 35 : index
      %340 = memref.load %arg3[%c35] : memref<98xf32, #tpu.memory_space<smem>>
      %341 = vector.extract_strided_slice %339 {offsets = [0, 0, 0], sizes = [1, 16, 16], strides = [1, 1, 1]} : vector<1x16x22xf32> to vector<1x16x16xf32>
      %342 = vector.broadcast %340 : f32 to vector<1x16x16xf32>
      %343 = arith.mulf %342, %341 : vector<1x16x16xf32>
      %344 = arith.addf %322, %343 : vector<1x16x16xf32>
      %c36 = arith.constant 36 : index
      %345 = memref.load %arg3[%c36] : memref<98xf32, #tpu.memory_space<smem>>
      %346 = vector.extract_strided_slice %339 {offsets = [0, 0, 1], sizes = [1, 16, 16], strides = [1, 1, 1]} : vector<1x16x22xf32> to vector<1x16x16xf32>
      %347 = vector.broadcast %345 : f32 to vector<1x16x16xf32>
      %348 = arith.mulf %347, %346 : vector<1x16x16xf32>
      %349 = arith.addf %327, %348 : vector<1x16x16xf32>
      %c37 = arith.constant 37 : index
      %350 = memref.load %arg3[%c37] : memref<98xf32, #tpu.memory_space<smem>>
      %351 = vector.extract_strided_slice %339 {offsets = [0, 0, 2], sizes = [1, 16, 16], strides = [1, 1, 1]} : vector<1x16x22xf32> to vector<1x16x16xf32>
      %352 = vector.broadcast %350 : f32 to vector<1x16x16xf32>
      %353 = arith.mulf %352, %351 : vector<1x16x16xf32>
      %354 = arith.addf %332, %353 : vector<1x16x16xf32>
      %c38 = arith.constant 38 : index
      %355 = memref.load %arg3[%c38] : memref<98xf32, #tpu.memory_space<smem>>
      %356 = vector.extract_strided_slice %339 {offsets = [0, 0, 3], sizes = [1, 16, 16], strides = [1, 1, 1]} : vector<1x16x22xf32> to vector<1x16x16xf32>
      %357 = vector.broadcast %355 : f32 to vector<1x16x16xf32>
      %358 = arith.mulf %357, %356 : vector<1x16x16xf32>
      %359 = arith.addf %337, %358 : vector<1x16x16xf32>
      %c39 = arith.constant 39 : index
      %360 = memref.load %arg3[%c39] : memref<98xf32, #tpu.memory_space<smem>>
      %361 = vector.extract_strided_slice %339 {offsets = [0, 0, 4], sizes = [1, 16, 16], strides = [1, 1, 1]} : vector<1x16x22xf32> to vector<1x16x16xf32>
      %362 = vector.broadcast %360 : f32 to vector<1x16x16xf32>
      %363 = arith.mulf %362, %361 : vector<1x16x16xf32>
      %364 = arith.addf %344, %363 : vector<1x16x16xf32>
      %c40 = arith.constant 40 : index
      %365 = memref.load %arg3[%c40] : memref<98xf32, #tpu.memory_space<smem>>
      %366 = vector.extract_strided_slice %339 {offsets = [0, 0, 5], sizes = [1, 16, 16], strides = [1, 1, 1]} : vector<1x16x22xf32> to vector<1x16x16xf32>
      %367 = vector.broadcast %365 : f32 to vector<1x16x16xf32>
      %368 = arith.mulf %367, %366 : vector<1x16x16xf32>
      %369 = arith.addf %349, %368 : vector<1x16x16xf32>
      %c41 = arith.constant 41 : index
      %370 = memref.load %arg3[%c41] : memref<98xf32, #tpu.memory_space<smem>>
      %371 = vector.extract_strided_slice %339 {offsets = [0, 0, 6], sizes = [1, 16, 16], strides = [1, 1, 1]} : vector<1x16x22xf32> to vector<1x16x16xf32>
      %372 = vector.broadcast %370 : f32 to vector<1x16x16xf32>
      %373 = arith.mulf %372, %371 : vector<1x16x16xf32>
      %374 = arith.addf %354, %373 : vector<1x16x16xf32>
      %c0_181 = arith.constant 0 : index
      %c0_182 = arith.constant 0 : index
      %c6_183 = arith.constant 6 : index
      %c0_184 = arith.constant 0 : index
      %375 = vector.load %arg7[%c0_181, %c0_182, %c6_183, %c0_184] : memref<1x2x22x22xf32, #tpu.memory_space<vmem>>, vector<1x1x16x22xf32>
      %376 = vector.shape_cast %375 : vector<1x1x16x22xf32> to vector<1x16x22xf32>
      %c42 = arith.constant 42 : index
      %377 = memref.load %arg3[%c42] : memref<98xf32, #tpu.memory_space<smem>>
      %378 = vector.extract_strided_slice %376 {offsets = [0, 0, 0], sizes = [1, 16, 16], strides = [1, 1, 1]} : vector<1x16x22xf32> to vector<1x16x16xf32>
      %379 = vector.broadcast %377 : f32 to vector<1x16x16xf32>
      %380 = arith.mulf %379, %378 : vector<1x16x16xf32>
      %381 = arith.addf %359, %380 : vector<1x16x16xf32>
      %c43 = arith.constant 43 : index
      %382 = memref.load %arg3[%c43] : memref<98xf32, #tpu.memory_space<smem>>
      %383 = vector.extract_strided_slice %376 {offsets = [0, 0, 1], sizes = [1, 16, 16], strides = [1, 1, 1]} : vector<1x16x22xf32> to vector<1x16x16xf32>
      %384 = vector.broadcast %382 : f32 to vector<1x16x16xf32>
      %385 = arith.mulf %384, %383 : vector<1x16x16xf32>
      %386 = arith.addf %364, %385 : vector<1x16x16xf32>
      %c44 = arith.constant 44 : index
      %387 = memref.load %arg3[%c44] : memref<98xf32, #tpu.memory_space<smem>>
      %388 = vector.extract_strided_slice %376 {offsets = [0, 0, 2], sizes = [1, 16, 16], strides = [1, 1, 1]} : vector<1x16x22xf32> to vector<1x16x16xf32>
      %389 = vector.broadcast %387 : f32 to vector<1x16x16xf32>
      %390 = arith.mulf %389, %388 : vector<1x16x16xf32>
      %391 = arith.addf %369, %390 : vector<1x16x16xf32>
      %c45 = arith.constant 45 : index
      %392 = memref.load %arg3[%c45] : memref<98xf32, #tpu.memory_space<smem>>
      %393 = vector.extract_strided_slice %376 {offsets = [0, 0, 3], sizes = [1, 16, 16], strides = [1, 1, 1]} : vector<1x16x22xf32> to vector<1x16x16xf32>
      %394 = vector.broadcast %392 : f32 to vector<1x16x16xf32>
      %395 = arith.mulf %394, %393 : vector<1x16x16xf32>
      %396 = arith.addf %374, %395 : vector<1x16x16xf32>
      %c46 = arith.constant 46 : index
      %397 = memref.load %arg3[%c46] : memref<98xf32, #tpu.memory_space<smem>>
      %398 = vector.extract_strided_slice %376 {offsets = [0, 0, 4], sizes = [1, 16, 16], strides = [1, 1, 1]} : vector<1x16x22xf32> to vector<1x16x16xf32>
      %399 = vector.broadcast %397 : f32 to vector<1x16x16xf32>
      %400 = arith.mulf %399, %398 : vector<1x16x16xf32>
      %401 = arith.addf %381, %400 : vector<1x16x16xf32>
      %c47 = arith.constant 47 : index
      %402 = memref.load %arg3[%c47] : memref<98xf32, #tpu.memory_space<smem>>
      %403 = vector.extract_strided_slice %376 {offsets = [0, 0, 5], sizes = [1, 16, 16], strides = [1, 1, 1]} : vector<1x16x22xf32> to vector<1x16x16xf32>
      %404 = vector.broadcast %402 : f32 to vector<1x16x16xf32>
      %405 = arith.mulf %404, %403 : vector<1x16x16xf32>
      %406 = arith.addf %386, %405 : vector<1x16x16xf32>
      %c48 = arith.constant 48 : index
      %407 = memref.load %arg3[%c48] : memref<98xf32, #tpu.memory_space<smem>>
      %408 = vector.extract_strided_slice %376 {offsets = [0, 0, 6], sizes = [1, 16, 16], strides = [1, 1, 1]} : vector<1x16x22xf32> to vector<1x16x16xf32>
      %409 = vector.broadcast %407 : f32 to vector<1x16x16xf32>
      %410 = arith.mulf %409, %408 : vector<1x16x16xf32>
      %411 = arith.addf %391, %410 : vector<1x16x16xf32>
      %c0_185 = arith.constant 0 : index
      %c1_186 = arith.constant 1 : index
      %c0_187 = arith.constant 0 : index
      %c0_188 = arith.constant 0 : index
      %412 = vector.load %arg7[%c0_185, %c1_186, %c0_187, %c0_188] : memref<1x2x22x22xf32, #tpu.memory_space<vmem>>, vector<1x1x16x22xf32>
      %413 = vector.shape_cast %412 : vector<1x1x16x22xf32> to vector<1x16x22xf32>
      %c49 = arith.constant 49 : index
      %414 = memref.load %arg3[%c49] : memref<98xf32, #tpu.memory_space<smem>>
      %415 = vector.extract_strided_slice %413 {offsets = [0, 0, 0], sizes = [1, 16, 16], strides = [1, 1, 1]} : vector<1x16x22xf32> to vector<1x16x16xf32>
      %416 = vector.broadcast %414 : f32 to vector<1x16x16xf32>
      %417 = arith.mulf %416, %415 : vector<1x16x16xf32>
      %418 = arith.addf %396, %417 : vector<1x16x16xf32>
      %c50 = arith.constant 50 : index
      %419 = memref.load %arg3[%c50] : memref<98xf32, #tpu.memory_space<smem>>
      %420 = vector.extract_strided_slice %413 {offsets = [0, 0, 1], sizes = [1, 16, 16], strides = [1, 1, 1]} : vector<1x16x22xf32> to vector<1x16x16xf32>
      %421 = vector.broadcast %419 : f32 to vector<1x16x16xf32>
      %422 = arith.mulf %421, %420 : vector<1x16x16xf32>
      %423 = arith.addf %401, %422 : vector<1x16x16xf32>
      %c51 = arith.constant 51 : index
      %424 = memref.load %arg3[%c51] : memref<98xf32, #tpu.memory_space<smem>>
      %425 = vector.extract_strided_slice %413 {offsets = [0, 0, 2], sizes = [1, 16, 16], strides = [1, 1, 1]} : vector<1x16x22xf32> to vector<1x16x16xf32>
      %426 = vector.broadcast %424 : f32 to vector<1x16x16xf32>
      %427 = arith.mulf %426, %425 : vector<1x16x16xf32>
      %428 = arith.addf %406, %427 : vector<1x16x16xf32>
      %c52 = arith.constant 52 : index
      %429 = memref.load %arg3[%c52] : memref<98xf32, #tpu.memory_space<smem>>
      %430 = vector.extract_strided_slice %413 {offsets = [0, 0, 3], sizes = [1, 16, 16], strides = [1, 1, 1]} : vector<1x16x22xf32> to vector<1x16x16xf32>
      %431 = vector.broadcast %429 : f32 to vector<1x16x16xf32>
      %432 = arith.mulf %431, %430 : vector<1x16x16xf32>
      %433 = arith.addf %411, %432 : vector<1x16x16xf32>
      %c53 = arith.constant 53 : index
      %434 = memref.load %arg3[%c53] : memref<98xf32, #tpu.memory_space<smem>>
      %435 = vector.extract_strided_slice %413 {offsets = [0, 0, 4], sizes = [1, 16, 16], strides = [1, 1, 1]} : vector<1x16x22xf32> to vector<1x16x16xf32>
      %436 = vector.broadcast %434 : f32 to vector<1x16x16xf32>
      %437 = arith.mulf %436, %435 : vector<1x16x16xf32>
      %438 = arith.addf %418, %437 : vector<1x16x16xf32>
      %c54 = arith.constant 54 : index
      %439 = memref.load %arg3[%c54] : memref<98xf32, #tpu.memory_space<smem>>
      %440 = vector.extract_strided_slice %413 {offsets = [0, 0, 5], sizes = [1, 16, 16], strides = [1, 1, 1]} : vector<1x16x22xf32> to vector<1x16x16xf32>
      %441 = vector.broadcast %439 : f32 to vector<1x16x16xf32>
      %442 = arith.mulf %441, %440 : vector<1x16x16xf32>
      %443 = arith.addf %423, %442 : vector<1x16x16xf32>
      %c55 = arith.constant 55 : index
      %444 = memref.load %arg3[%c55] : memref<98xf32, #tpu.memory_space<smem>>
      %445 = vector.extract_strided_slice %413 {offsets = [0, 0, 6], sizes = [1, 16, 16], strides = [1, 1, 1]} : vector<1x16x22xf32> to vector<1x16x16xf32>
      %446 = vector.broadcast %444 : f32 to vector<1x16x16xf32>
      %447 = arith.mulf %446, %445 : vector<1x16x16xf32>
      %448 = arith.addf %428, %447 : vector<1x16x16xf32>
      %c0_189 = arith.constant 0 : index
      %c1_190 = arith.constant 1 : index
      %c1_191 = arith.constant 1 : index
      %c0_192 = arith.constant 0 : index
      %449 = vector.load %arg7[%c0_189, %c1_190, %c1_191, %c0_192] : memref<1x2x22x22xf32, #tpu.memory_space<vmem>>, vector<1x1x16x22xf32>
      %450 = vector.shape_cast %449 : vector<1x1x16x22xf32> to vector<1x16x22xf32>
      %c56 = arith.constant 56 : index
      %451 = memref.load %arg3[%c56] : memref<98xf32, #tpu.memory_space<smem>>
      %452 = vector.extract_strided_slice %450 {offsets = [0, 0, 0], sizes = [1, 16, 16], strides = [1, 1, 1]} : vector<1x16x22xf32> to vector<1x16x16xf32>
      %453 = vector.broadcast %451 : f32 to vector<1x16x16xf32>
      %454 = arith.mulf %453, %452 : vector<1x16x16xf32>
      %455 = arith.addf %433, %454 : vector<1x16x16xf32>
      %c57 = arith.constant 57 : index
      %456 = memref.load %arg3[%c57] : memref<98xf32, #tpu.memory_space<smem>>
      %457 = vector.extract_strided_slice %450 {offsets = [0, 0, 1], sizes = [1, 16, 16], strides = [1, 1, 1]} : vector<1x16x22xf32> to vector<1x16x16xf32>
      %458 = vector.broadcast %456 : f32 to vector<1x16x16xf32>
      %459 = arith.mulf %458, %457 : vector<1x16x16xf32>
      %460 = arith.addf %438, %459 : vector<1x16x16xf32>
      %c58 = arith.constant 58 : index
      %461 = memref.load %arg3[%c58] : memref<98xf32, #tpu.memory_space<smem>>
      %462 = vector.extract_strided_slice %450 {offsets = [0, 0, 2], sizes = [1, 16, 16], strides = [1, 1, 1]} : vector<1x16x22xf32> to vector<1x16x16xf32>
      %463 = vector.broadcast %461 : f32 to vector<1x16x16xf32>
      %464 = arith.mulf %463, %462 : vector<1x16x16xf32>
      %465 = arith.addf %443, %464 : vector<1x16x16xf32>
      %c59 = arith.constant 59 : index
      %466 = memref.load %arg3[%c59] : memref<98xf32, #tpu.memory_space<smem>>
      %467 = vector.extract_strided_slice %450 {offsets = [0, 0, 3], sizes = [1, 16, 16], strides = [1, 1, 1]} : vector<1x16x22xf32> to vector<1x16x16xf32>
      %468 = vector.broadcast %466 : f32 to vector<1x16x16xf32>
      %469 = arith.mulf %468, %467 : vector<1x16x16xf32>
      %470 = arith.addf %448, %469 : vector<1x16x16xf32>
      %c60 = arith.constant 60 : index
      %471 = memref.load %arg3[%c60] : memref<98xf32, #tpu.memory_space<smem>>
      %472 = vector.extract_strided_slice %450 {offsets = [0, 0, 4], sizes = [1, 16, 16], strides = [1, 1, 1]} : vector<1x16x22xf32> to vector<1x16x16xf32>
      %473 = vector.broadcast %471 : f32 to vector<1x16x16xf32>
      %474 = arith.mulf %473, %472 : vector<1x16x16xf32>
      %475 = arith.addf %455, %474 : vector<1x16x16xf32>
      %c61 = arith.constant 61 : index
      %476 = memref.load %arg3[%c61] : memref<98xf32, #tpu.memory_space<smem>>
      %477 = vector.extract_strided_slice %450 {offsets = [0, 0, 5], sizes = [1, 16, 16], strides = [1, 1, 1]} : vector<1x16x22xf32> to vector<1x16x16xf32>
      %478 = vector.broadcast %476 : f32 to vector<1x16x16xf32>
      %479 = arith.mulf %478, %477 : vector<1x16x16xf32>
      %480 = arith.addf %460, %479 : vector<1x16x16xf32>
      %c62 = arith.constant 62 : index
      %481 = memref.load %arg3[%c62] : memref<98xf32, #tpu.memory_space<smem>>
      %482 = vector.extract_strided_slice %450 {offsets = [0, 0, 6], sizes = [1, 16, 16], strides = [1, 1, 1]} : vector<1x16x22xf32> to vector<1x16x16xf32>
      %483 = vector.broadcast %481 : f32 to vector<1x16x16xf32>
      %484 = arith.mulf %483, %482 : vector<1x16x16xf32>
      %485 = arith.addf %465, %484 : vector<1x16x16xf32>
      %c0_193 = arith.constant 0 : index
      %c1_194 = arith.constant 1 : index
      %c2_195 = arith.constant 2 : index
      %c0_196 = arith.constant 0 : index
      %486 = vector.load %arg7[%c0_193, %c1_194, %c2_195, %c0_196] : memref<1x2x22x22xf32, #tpu.memory_space<vmem>>, vector<1x1x16x22xf32>
      %487 = vector.shape_cast %486 : vector<1x1x16x22xf32> to vector<1x16x22xf32>
      %c63 = arith.constant 63 : index
      %488 = memref.load %arg3[%c63] : memref<98xf32, #tpu.memory_space<smem>>
      %489 = vector.extract_strided_slice %487 {offsets = [0, 0, 0], sizes = [1, 16, 16], strides = [1, 1, 1]} : vector<1x16x22xf32> to vector<1x16x16xf32>
      %490 = vector.broadcast %488 : f32 to vector<1x16x16xf32>
      %491 = arith.mulf %490, %489 : vector<1x16x16xf32>
      %492 = arith.addf %470, %491 : vector<1x16x16xf32>
      %c64 = arith.constant 64 : index
      %493 = memref.load %arg3[%c64] : memref<98xf32, #tpu.memory_space<smem>>
      %494 = vector.extract_strided_slice %487 {offsets = [0, 0, 1], sizes = [1, 16, 16], strides = [1, 1, 1]} : vector<1x16x22xf32> to vector<1x16x16xf32>
      %495 = vector.broadcast %493 : f32 to vector<1x16x16xf32>
      %496 = arith.mulf %495, %494 : vector<1x16x16xf32>
      %497 = arith.addf %475, %496 : vector<1x16x16xf32>
      %c65 = arith.constant 65 : index
      %498 = memref.load %arg3[%c65] : memref<98xf32, #tpu.memory_space<smem>>
      %499 = vector.extract_strided_slice %487 {offsets = [0, 0, 2], sizes = [1, 16, 16], strides = [1, 1, 1]} : vector<1x16x22xf32> to vector<1x16x16xf32>
      %500 = vector.broadcast %498 : f32 to vector<1x16x16xf32>
      %501 = arith.mulf %500, %499 : vector<1x16x16xf32>
      %502 = arith.addf %480, %501 : vector<1x16x16xf32>
      %c66 = arith.constant 66 : index
      %503 = memref.load %arg3[%c66] : memref<98xf32, #tpu.memory_space<smem>>
      %504 = vector.extract_strided_slice %487 {offsets = [0, 0, 3], sizes = [1, 16, 16], strides = [1, 1, 1]} : vector<1x16x22xf32> to vector<1x16x16xf32>
      %505 = vector.broadcast %503 : f32 to vector<1x16x16xf32>
      %506 = arith.mulf %505, %504 : vector<1x16x16xf32>
      %507 = arith.addf %485, %506 : vector<1x16x16xf32>
      %c67 = arith.constant 67 : index
      %508 = memref.load %arg3[%c67] : memref<98xf32, #tpu.memory_space<smem>>
      %509 = vector.extract_strided_slice %487 {offsets = [0, 0, 4], sizes = [1, 16, 16], strides = [1, 1, 1]} : vector<1x16x22xf32> to vector<1x16x16xf32>
      %510 = vector.broadcast %508 : f32 to vector<1x16x16xf32>
      %511 = arith.mulf %510, %509 : vector<1x16x16xf32>
      %512 = arith.addf %492, %511 : vector<1x16x16xf32>
      %c68 = arith.constant 68 : index
      %513 = memref.load %arg3[%c68] : memref<98xf32, #tpu.memory_space<smem>>
      %514 = vector.extract_strided_slice %487 {offsets = [0, 0, 5], sizes = [1, 16, 16], strides = [1, 1, 1]} : vector<1x16x22xf32> to vector<1x16x16xf32>
      %515 = vector.broadcast %513 : f32 to vector<1x16x16xf32>
      %516 = arith.mulf %515, %514 : vector<1x16x16xf32>
      %517 = arith.addf %497, %516 : vector<1x16x16xf32>
      %c69 = arith.constant 69 : index
      %518 = memref.load %arg3[%c69] : memref<98xf32, #tpu.memory_space<smem>>
      %519 = vector.extract_strided_slice %487 {offsets = [0, 0, 6], sizes = [1, 16, 16], strides = [1, 1, 1]} : vector<1x16x22xf32> to vector<1x16x16xf32>
      %520 = vector.broadcast %518 : f32 to vector<1x16x16xf32>
      %521 = arith.mulf %520, %519 : vector<1x16x16xf32>
      %522 = arith.addf %502, %521 : vector<1x16x16xf32>
      %c0_197 = arith.constant 0 : index
      %c1_198 = arith.constant 1 : index
      %c3_199 = arith.constant 3 : index
      %c0_200 = arith.constant 0 : index
      %523 = vector.load %arg7[%c0_197, %c1_198, %c3_199, %c0_200] : memref<1x2x22x22xf32, #tpu.memory_space<vmem>>, vector<1x1x16x22xf32>
      %524 = vector.shape_cast %523 : vector<1x1x16x22xf32> to vector<1x16x22xf32>
      %c70 = arith.constant 70 : index
      %525 = memref.load %arg3[%c70] : memref<98xf32, #tpu.memory_space<smem>>
      %526 = vector.extract_strided_slice %524 {offsets = [0, 0, 0], sizes = [1, 16, 16], strides = [1, 1, 1]} : vector<1x16x22xf32> to vector<1x16x16xf32>
      %527 = vector.broadcast %525 : f32 to vector<1x16x16xf32>
      %528 = arith.mulf %527, %526 : vector<1x16x16xf32>
      %529 = arith.addf %507, %528 : vector<1x16x16xf32>
      %c71 = arith.constant 71 : index
      %530 = memref.load %arg3[%c71] : memref<98xf32, #tpu.memory_space<smem>>
      %531 = vector.extract_strided_slice %524 {offsets = [0, 0, 1], sizes = [1, 16, 16], strides = [1, 1, 1]} : vector<1x16x22xf32> to vector<1x16x16xf32>
      %532 = vector.broadcast %530 : f32 to vector<1x16x16xf32>
      %533 = arith.mulf %532, %531 : vector<1x16x16xf32>
      %534 = arith.addf %512, %533 : vector<1x16x16xf32>
      %c72 = arith.constant 72 : index
      %535 = memref.load %arg3[%c72] : memref<98xf32, #tpu.memory_space<smem>>
      %536 = vector.extract_strided_slice %524 {offsets = [0, 0, 2], sizes = [1, 16, 16], strides = [1, 1, 1]} : vector<1x16x22xf32> to vector<1x16x16xf32>
      %537 = vector.broadcast %535 : f32 to vector<1x16x16xf32>
      %538 = arith.mulf %537, %536 : vector<1x16x16xf32>
      %539 = arith.addf %517, %538 : vector<1x16x16xf32>
      %c73 = arith.constant 73 : index
      %540 = memref.load %arg3[%c73] : memref<98xf32, #tpu.memory_space<smem>>
      %541 = vector.extract_strided_slice %524 {offsets = [0, 0, 3], sizes = [1, 16, 16], strides = [1, 1, 1]} : vector<1x16x22xf32> to vector<1x16x16xf32>
      %542 = vector.broadcast %540 : f32 to vector<1x16x16xf32>
      %543 = arith.mulf %542, %541 : vector<1x16x16xf32>
      %544 = arith.addf %522, %543 : vector<1x16x16xf32>
      %c74 = arith.constant 74 : index
      %545 = memref.load %arg3[%c74] : memref<98xf32, #tpu.memory_space<smem>>
      %546 = vector.extract_strided_slice %524 {offsets = [0, 0, 4], sizes = [1, 16, 16], strides = [1, 1, 1]} : vector<1x16x22xf32> to vector<1x16x16xf32>
      %547 = vector.broadcast %545 : f32 to vector<1x16x16xf32>
      %548 = arith.mulf %547, %546 : vector<1x16x16xf32>
      %549 = arith.addf %529, %548 : vector<1x16x16xf32>
      %c75 = arith.constant 75 : index
      %550 = memref.load %arg3[%c75] : memref<98xf32, #tpu.memory_space<smem>>
      %551 = vector.extract_strided_slice %524 {offsets = [0, 0, 5], sizes = [1, 16, 16], strides = [1, 1, 1]} : vector<1x16x22xf32> to vector<1x16x16xf32>
      %552 = vector.broadcast %550 : f32 to vector<1x16x16xf32>
      %553 = arith.mulf %552, %551 : vector<1x16x16xf32>
      %554 = arith.addf %534, %553 : vector<1x16x16xf32>
      %c76 = arith.constant 76 : index
      %555 = memref.load %arg3[%c76] : memref<98xf32, #tpu.memory_space<smem>>
      %556 = vector.extract_strided_slice %524 {offsets = [0, 0, 6], sizes = [1, 16, 16], strides = [1, 1, 1]} : vector<1x16x22xf32> to vector<1x16x16xf32>
      %557 = vector.broadcast %555 : f32 to vector<1x16x16xf32>
      %558 = arith.mulf %557, %556 : vector<1x16x16xf32>
      %559 = arith.addf %539, %558 : vector<1x16x16xf32>
      %c0_201 = arith.constant 0 : index
      %c1_202 = arith.constant 1 : index
      %c4_203 = arith.constant 4 : index
      %c0_204 = arith.constant 0 : index
      %560 = vector.load %arg7[%c0_201, %c1_202, %c4_203, %c0_204] : memref<1x2x22x22xf32, #tpu.memory_space<vmem>>, vector<1x1x16x22xf32>
      %561 = vector.shape_cast %560 : vector<1x1x16x22xf32> to vector<1x16x22xf32>
      %c77 = arith.constant 77 : index
      %562 = memref.load %arg3[%c77] : memref<98xf32, #tpu.memory_space<smem>>
      %563 = vector.extract_strided_slice %561 {offsets = [0, 0, 0], sizes = [1, 16, 16], strides = [1, 1, 1]} : vector<1x16x22xf32> to vector<1x16x16xf32>
      %564 = vector.broadcast %562 : f32 to vector<1x16x16xf32>
      %565 = arith.mulf %564, %563 : vector<1x16x16xf32>
      %566 = arith.addf %544, %565 : vector<1x16x16xf32>
      %c78 = arith.constant 78 : index
      %567 = memref.load %arg3[%c78] : memref<98xf32, #tpu.memory_space<smem>>
      %568 = vector.extract_strided_slice %561 {offsets = [0, 0, 1], sizes = [1, 16, 16], strides = [1, 1, 1]} : vector<1x16x22xf32> to vector<1x16x16xf32>
      %569 = vector.broadcast %567 : f32 to vector<1x16x16xf32>
      %570 = arith.mulf %569, %568 : vector<1x16x16xf32>
      %571 = arith.addf %549, %570 : vector<1x16x16xf32>
      %c79 = arith.constant 79 : index
      %572 = memref.load %arg3[%c79] : memref<98xf32, #tpu.memory_space<smem>>
      %573 = vector.extract_strided_slice %561 {offsets = [0, 0, 2], sizes = [1, 16, 16], strides = [1, 1, 1]} : vector<1x16x22xf32> to vector<1x16x16xf32>
      %574 = vector.broadcast %572 : f32 to vector<1x16x16xf32>
      %575 = arith.mulf %574, %573 : vector<1x16x16xf32>
      %576 = arith.addf %554, %575 : vector<1x16x16xf32>
      %c80 = arith.constant 80 : index
      %577 = memref.load %arg3[%c80] : memref<98xf32, #tpu.memory_space<smem>>
      %578 = vector.extract_strided_slice %561 {offsets = [0, 0, 3], sizes = [1, 16, 16], strides = [1, 1, 1]} : vector<1x16x22xf32> to vector<1x16x16xf32>
      %579 = vector.broadcast %577 : f32 to vector<1x16x16xf32>
      %580 = arith.mulf %579, %578 : vector<1x16x16xf32>
      %581 = arith.addf %559, %580 : vector<1x16x16xf32>
      %c81 = arith.constant 81 : index
      %582 = memref.load %arg3[%c81] : memref<98xf32, #tpu.memory_space<smem>>
      %583 = vector.extract_strided_slice %561 {offsets = [0, 0, 4], sizes = [1, 16, 16], strides = [1, 1, 1]} : vector<1x16x22xf32> to vector<1x16x16xf32>
      %584 = vector.broadcast %582 : f32 to vector<1x16x16xf32>
      %585 = arith.mulf %584, %583 : vector<1x16x16xf32>
      %586 = arith.addf %566, %585 : vector<1x16x16xf32>
      %c82 = arith.constant 82 : index
      %587 = memref.load %arg3[%c82] : memref<98xf32, #tpu.memory_space<smem>>
      %588 = vector.extract_strided_slice %561 {offsets = [0, 0, 5], sizes = [1, 16, 16], strides = [1, 1, 1]} : vector<1x16x22xf32> to vector<1x16x16xf32>
      %589 = vector.broadcast %587 : f32 to vector<1x16x16xf32>
      %590 = arith.mulf %589, %588 : vector<1x16x16xf32>
      %591 = arith.addf %571, %590 : vector<1x16x16xf32>
      %c83 = arith.constant 83 : index
      %592 = memref.load %arg3[%c83] : memref<98xf32, #tpu.memory_space<smem>>
      %593 = vector.extract_strided_slice %561 {offsets = [0, 0, 6], sizes = [1, 16, 16], strides = [1, 1, 1]} : vector<1x16x22xf32> to vector<1x16x16xf32>
      %594 = vector.broadcast %592 : f32 to vector<1x16x16xf32>
      %595 = arith.mulf %594, %593 : vector<1x16x16xf32>
      %596 = arith.addf %576, %595 : vector<1x16x16xf32>
      %c0_205 = arith.constant 0 : index
      %c1_206 = arith.constant 1 : index
      %c5_207 = arith.constant 5 : index
      %c0_208 = arith.constant 0 : index
      %597 = vector.load %arg7[%c0_205, %c1_206, %c5_207, %c0_208] : memref<1x2x22x22xf32, #tpu.memory_space<vmem>>, vector<1x1x16x22xf32>
      %598 = vector.shape_cast %597 : vector<1x1x16x22xf32> to vector<1x16x22xf32>
      %c84 = arith.constant 84 : index
      %599 = memref.load %arg3[%c84] : memref<98xf32, #tpu.memory_space<smem>>
      %600 = vector.extract_strided_slice %598 {offsets = [0, 0, 0], sizes = [1, 16, 16], strides = [1, 1, 1]} : vector<1x16x22xf32> to vector<1x16x16xf32>
      %601 = vector.broadcast %599 : f32 to vector<1x16x16xf32>
      %602 = arith.mulf %601, %600 : vector<1x16x16xf32>
      %603 = arith.addf %581, %602 : vector<1x16x16xf32>
      %c85 = arith.constant 85 : index
      %604 = memref.load %arg3[%c85] : memref<98xf32, #tpu.memory_space<smem>>
      %605 = vector.extract_strided_slice %598 {offsets = [0, 0, 1], sizes = [1, 16, 16], strides = [1, 1, 1]} : vector<1x16x22xf32> to vector<1x16x16xf32>
      %606 = vector.broadcast %604 : f32 to vector<1x16x16xf32>
      %607 = arith.mulf %606, %605 : vector<1x16x16xf32>
      %608 = arith.addf %586, %607 : vector<1x16x16xf32>
      %c86 = arith.constant 86 : index
      %609 = memref.load %arg3[%c86] : memref<98xf32, #tpu.memory_space<smem>>
      %610 = vector.extract_strided_slice %598 {offsets = [0, 0, 2], sizes = [1, 16, 16], strides = [1, 1, 1]} : vector<1x16x22xf32> to vector<1x16x16xf32>
      %611 = vector.broadcast %609 : f32 to vector<1x16x16xf32>
      %612 = arith.mulf %611, %610 : vector<1x16x16xf32>
      %613 = arith.addf %591, %612 : vector<1x16x16xf32>
      %c87 = arith.constant 87 : index
      %614 = memref.load %arg3[%c87] : memref<98xf32, #tpu.memory_space<smem>>
      %615 = vector.extract_strided_slice %598 {offsets = [0, 0, 3], sizes = [1, 16, 16], strides = [1, 1, 1]} : vector<1x16x22xf32> to vector<1x16x16xf32>
      %616 = vector.broadcast %614 : f32 to vector<1x16x16xf32>
      %617 = arith.mulf %616, %615 : vector<1x16x16xf32>
      %618 = arith.addf %596, %617 : vector<1x16x16xf32>
      %c88 = arith.constant 88 : index
      %619 = memref.load %arg3[%c88] : memref<98xf32, #tpu.memory_space<smem>>
      %620 = vector.extract_strided_slice %598 {offsets = [0, 0, 4], sizes = [1, 16, 16], strides = [1, 1, 1]} : vector<1x16x22xf32> to vector<1x16x16xf32>
      %621 = vector.broadcast %619 : f32 to vector<1x16x16xf32>
      %622 = arith.mulf %621, %620 : vector<1x16x16xf32>
      %623 = arith.addf %603, %622 : vector<1x16x16xf32>
      %c89 = arith.constant 89 : index
      %624 = memref.load %arg3[%c89] : memref<98xf32, #tpu.memory_space<smem>>
      %625 = vector.extract_strided_slice %598 {offsets = [0, 0, 5], sizes = [1, 16, 16], strides = [1, 1, 1]} : vector<1x16x22xf32> to vector<1x16x16xf32>
      %626 = vector.broadcast %624 : f32 to vector<1x16x16xf32>
      %627 = arith.mulf %626, %625 : vector<1x16x16xf32>
      %628 = arith.addf %608, %627 : vector<1x16x16xf32>
      %c90 = arith.constant 90 : index
      %629 = memref.load %arg3[%c90] : memref<98xf32, #tpu.memory_space<smem>>
      %630 = vector.extract_strided_slice %598 {offsets = [0, 0, 6], sizes = [1, 16, 16], strides = [1, 1, 1]} : vector<1x16x22xf32> to vector<1x16x16xf32>
      %631 = vector.broadcast %629 : f32 to vector<1x16x16xf32>
      %632 = arith.mulf %631, %630 : vector<1x16x16xf32>
      %633 = arith.addf %613, %632 : vector<1x16x16xf32>
      %c0_209 = arith.constant 0 : index
      %c1_210 = arith.constant 1 : index
      %c6_211 = arith.constant 6 : index
      %c0_212 = arith.constant 0 : index
      %634 = vector.load %arg7[%c0_209, %c1_210, %c6_211, %c0_212] : memref<1x2x22x22xf32, #tpu.memory_space<vmem>>, vector<1x1x16x22xf32>
      %635 = vector.shape_cast %634 : vector<1x1x16x22xf32> to vector<1x16x22xf32>
      %c91 = arith.constant 91 : index
      %636 = memref.load %arg3[%c91] : memref<98xf32, #tpu.memory_space<smem>>
      %637 = vector.extract_strided_slice %635 {offsets = [0, 0, 0], sizes = [1, 16, 16], strides = [1, 1, 1]} : vector<1x16x22xf32> to vector<1x16x16xf32>
      %638 = vector.broadcast %636 : f32 to vector<1x16x16xf32>
      %639 = arith.mulf %638, %637 : vector<1x16x16xf32>
      %640 = arith.addf %618, %639 : vector<1x16x16xf32>
      %c92 = arith.constant 92 : index
      %641 = memref.load %arg3[%c92] : memref<98xf32, #tpu.memory_space<smem>>
      %642 = vector.extract_strided_slice %635 {offsets = [0, 0, 1], sizes = [1, 16, 16], strides = [1, 1, 1]} : vector<1x16x22xf32> to vector<1x16x16xf32>
      %643 = vector.broadcast %641 : f32 to vector<1x16x16xf32>
      %644 = arith.mulf %643, %642 : vector<1x16x16xf32>
      %645 = arith.addf %623, %644 : vector<1x16x16xf32>
      %c93 = arith.constant 93 : index
      %646 = memref.load %arg3[%c93] : memref<98xf32, #tpu.memory_space<smem>>
      %647 = vector.extract_strided_slice %635 {offsets = [0, 0, 2], sizes = [1, 16, 16], strides = [1, 1, 1]} : vector<1x16x22xf32> to vector<1x16x16xf32>
      %648 = vector.broadcast %646 : f32 to vector<1x16x16xf32>
      %649 = arith.mulf %648, %647 : vector<1x16x16xf32>
      %650 = arith.addf %628, %649 : vector<1x16x16xf32>
      %c94 = arith.constant 94 : index
      %651 = memref.load %arg3[%c94] : memref<98xf32, #tpu.memory_space<smem>>
      %652 = vector.extract_strided_slice %635 {offsets = [0, 0, 3], sizes = [1, 16, 16], strides = [1, 1, 1]} : vector<1x16x22xf32> to vector<1x16x16xf32>
      %653 = vector.broadcast %651 : f32 to vector<1x16x16xf32>
      %654 = arith.mulf %653, %652 : vector<1x16x16xf32>
      %655 = arith.addf %633, %654 : vector<1x16x16xf32>
      %c95 = arith.constant 95 : index
      %656 = memref.load %arg3[%c95] : memref<98xf32, #tpu.memory_space<smem>>
      %657 = vector.extract_strided_slice %635 {offsets = [0, 0, 4], sizes = [1, 16, 16], strides = [1, 1, 1]} : vector<1x16x22xf32> to vector<1x16x16xf32>
      %658 = vector.broadcast %656 : f32 to vector<1x16x16xf32>
      %659 = arith.mulf %658, %657 : vector<1x16x16xf32>
      %660 = arith.addf %640, %659 : vector<1x16x16xf32>
      %c96 = arith.constant 96 : index
      %661 = memref.load %arg3[%c96] : memref<98xf32, #tpu.memory_space<smem>>
      %662 = vector.extract_strided_slice %635 {offsets = [0, 0, 5], sizes = [1, 16, 16], strides = [1, 1, 1]} : vector<1x16x22xf32> to vector<1x16x16xf32>
      %663 = vector.broadcast %661 : f32 to vector<1x16x16xf32>
      %664 = arith.mulf %663, %662 : vector<1x16x16xf32>
      %665 = arith.addf %645, %664 : vector<1x16x16xf32>
      %c97 = arith.constant 97 : index
      %666 = memref.load %arg3[%c97] : memref<98xf32, #tpu.memory_space<smem>>
      %667 = vector.extract_strided_slice %635 {offsets = [0, 0, 6], sizes = [1, 16, 16], strides = [1, 1, 1]} : vector<1x16x22xf32> to vector<1x16x16xf32>
      %668 = vector.broadcast %666 : f32 to vector<1x16x16xf32>
      %669 = arith.mulf %668, %667 : vector<1x16x16xf32>
      %670 = arith.addf %650, %669 : vector<1x16x16xf32>
      %671 = arith.addf %665, %670 : vector<1x16x16xf32>
      %672 = arith.addf %655, %660 : vector<1x16x16xf32>
      %673 = arith.addf %671, %672 : vector<1x16x16xf32>
      %674 = arith.negf %673 : vector<1x16x16xf32>
      %675 = math.exp %674 : vector<1x16x16xf32>
      %cst_213 = arith.constant 1.000000e+00 : f32
      %676 = vector.broadcast %cst_213 : f32 to vector<1x16x16xf32>
      %677 = arith.addf %676, %675 : vector<1x16x16xf32>
      %678 = arith.divf %676, %677 : vector<1x16x16xf32>
      %679 = vector.extract_strided_slice %678 {offsets = [0, 0, 0], sizes = [1, 1, 16], strides = [1, 1, 1]} : vector<1x16x16xf32> to vector<1x1x16xf32>
      %680 = vector.shape_cast %679 : vector<1x1x16xf32> to vector<1x16xf32>
      %c0_214 = arith.constant 0 : index
      %c0_215 = arith.constant 0 : index
      %c0_216 = arith.constant 0 : index
      %681 = vector.load %arg4[%c0_214, %c0_215, %c0_216] : memref<1x1x256xf32, #tpu.memory_space<vmem>>, vector<1x1x16xf32>
      %682 = vector.shape_cast %681 : vector<1x1x16xf32> to vector<1x16xf32>
      %683 = vector.shape_cast %680 : vector<1x16xf32> to vector<1x1x16xf32>
      tpu.vector_store %arg4[%c0_214, %c0_215, %c0_216], %683 {strides = array<i32>} : memref<1x1x256xf32, #tpu.memory_space<vmem>>, vector<1x1x16xf32>,
      %684 = vector.extract_strided_slice %678 {offsets = [0, 1, 0], sizes = [1, 1, 16], strides = [1, 1, 1]} : vector<1x16x16xf32> to vector<1x1x16xf32>
      %685 = vector.shape_cast %684 : vector<1x1x16xf32> to vector<1x16xf32>
      %c0_217 = arith.constant 0 : index
      %c0_218 = arith.constant 0 : index
      %c16_219 = arith.constant 16 : index
      %686 = vector.load %arg4[%c0_217, %c0_218, %c16_219] : memref<1x1x256xf32, #tpu.memory_space<vmem>>, vector<1x1x16xf32>
      %687 = vector.shape_cast %686 : vector<1x1x16xf32> to vector<1x16xf32>
      %688 = vector.shape_cast %685 : vector<1x16xf32> to vector<1x1x16xf32>
      tpu.vector_store %arg4[%c0_217, %c0_218, %c16_219], %688 {strides = array<i32>} : memref<1x1x256xf32, #tpu.memory_space<vmem>>, vector<1x1x16xf32>,
      %689 = vector.extract_strided_slice %678 {offsets = [0, 2, 0], sizes = [1, 1, 16], strides = [1, 1, 1]} : vector<1x16x16xf32> to vector<1x1x16xf32>
      %690 = vector.shape_cast %689 : vector<1x1x16xf32> to vector<1x16xf32>
      %c0_220 = arith.constant 0 : index
      %c0_221 = arith.constant 0 : index
      %c32_222 = arith.constant 32 : index
      %691 = vector.load %arg4[%c0_220, %c0_221, %c32_222] : memref<1x1x256xf32, #tpu.memory_space<vmem>>, vector<1x1x16xf32>
      %692 = vector.shape_cast %691 : vector<1x1x16xf32> to vector<1x16xf32>
      %693 = vector.shape_cast %690 : vector<1x16xf32> to vector<1x1x16xf32>
      tpu.vector_store %arg4[%c0_220, %c0_221, %c32_222], %693 {strides = array<i32>} : memref<1x1x256xf32, #tpu.memory_space<vmem>>, vector<1x1x16xf32>,
      %694 = vector.extract_strided_slice %678 {offsets = [0, 3, 0], sizes = [1, 1, 16], strides = [1, 1, 1]} : vector<1x16x16xf32> to vector<1x1x16xf32>
      %695 = vector.shape_cast %694 : vector<1x1x16xf32> to vector<1x16xf32>
      %c0_223 = arith.constant 0 : index
      %c0_224 = arith.constant 0 : index
      %c48_225 = arith.constant 48 : index
      %696 = vector.load %arg4[%c0_223, %c0_224, %c48_225] : memref<1x1x256xf32, #tpu.memory_space<vmem>>, vector<1x1x16xf32>
      %697 = vector.shape_cast %696 : vector<1x1x16xf32> to vector<1x16xf32>
      %698 = vector.shape_cast %695 : vector<1x16xf32> to vector<1x1x16xf32>
      tpu.vector_store %arg4[%c0_223, %c0_224, %c48_225], %698 {strides = array<i32>} : memref<1x1x256xf32, #tpu.memory_space<vmem>>, vector<1x1x16xf32>,
      %699 = vector.extract_strided_slice %678 {offsets = [0, 4, 0], sizes = [1, 1, 16], strides = [1, 1, 1]} : vector<1x16x16xf32> to vector<1x1x16xf32>
      %700 = vector.shape_cast %699 : vector<1x1x16xf32> to vector<1x16xf32>
      %c0_226 = arith.constant 0 : index
      %c0_227 = arith.constant 0 : index
      %c64_228 = arith.constant 64 : index
      %701 = vector.load %arg4[%c0_226, %c0_227, %c64_228] : memref<1x1x256xf32, #tpu.memory_space<vmem>>, vector<1x1x16xf32>
      %702 = vector.shape_cast %701 : vector<1x1x16xf32> to vector<1x16xf32>
      %703 = vector.shape_cast %700 : vector<1x16xf32> to vector<1x1x16xf32>
      tpu.vector_store %arg4[%c0_226, %c0_227, %c64_228], %703 {strides = array<i32>} : memref<1x1x256xf32, #tpu.memory_space<vmem>>, vector<1x1x16xf32>,
      %704 = vector.extract_strided_slice %678 {offsets = [0, 5, 0], sizes = [1, 1, 16], strides = [1, 1, 1]} : vector<1x16x16xf32> to vector<1x1x16xf32>
      %705 = vector.shape_cast %704 : vector<1x1x16xf32> to vector<1x16xf32>
      %c0_229 = arith.constant 0 : index
      %c0_230 = arith.constant 0 : index
      %c80_231 = arith.constant 80 : index
      %706 = vector.load %arg4[%c0_229, %c0_230, %c80_231] : memref<1x1x256xf32, #tpu.memory_space<vmem>>, vector<1x1x16xf32>
      %707 = vector.shape_cast %706 : vector<1x1x16xf32> to vector<1x16xf32>
      %708 = vector.shape_cast %705 : vector<1x16xf32> to vector<1x1x16xf32>
      tpu.vector_store %arg4[%c0_229, %c0_230, %c80_231], %708 {strides = array<i32>} : memref<1x1x256xf32, #tpu.memory_space<vmem>>, vector<1x1x16xf32>,
      %709 = vector.extract_strided_slice %678 {offsets = [0, 6, 0], sizes = [1, 1, 16], strides = [1, 1, 1]} : vector<1x16x16xf32> to vector<1x1x16xf32>
      %710 = vector.shape_cast %709 : vector<1x1x16xf32> to vector<1x16xf32>
      %c0_232 = arith.constant 0 : index
      %c0_233 = arith.constant 0 : index
      %c96_234 = arith.constant 96 : index
      %711 = vector.load %arg4[%c0_232, %c0_233, %c96_234] : memref<1x1x256xf32, #tpu.memory_space<vmem>>, vector<1x1x16xf32>
      %712 = vector.shape_cast %711 : vector<1x1x16xf32> to vector<1x16xf32>
      %713 = vector.shape_cast %710 : vector<1x16xf32> to vector<1x1x16xf32>
      tpu.vector_store %arg4[%c0_232, %c0_233, %c96_234], %713 {strides = array<i32>} : memref<1x1x256xf32, #tpu.memory_space<vmem>>, vector<1x1x16xf32>,
      %714 = vector.extract_strided_slice %678 {offsets = [0, 7, 0], sizes = [1, 1, 16], strides = [1, 1, 1]} : vector<1x16x16xf32> to vector<1x1x16xf32>
      %715 = vector.shape_cast %714 : vector<1x1x16xf32> to vector<1x16xf32>
      %c0_235 = arith.constant 0 : index
      %c0_236 = arith.constant 0 : index
      %c112 = arith.constant 112 : index
      %716 = vector.load %arg4[%c0_235, %c0_236, %c112] : memref<1x1x256xf32, #tpu.memory_space<vmem>>, vector<1x1x16xf32>
      %717 = vector.shape_cast %716 : vector<1x1x16xf32> to vector<1x16xf32>
      %718 = vector.shape_cast %715 : vector<1x16xf32> to vector<1x1x16xf32>
      tpu.vector_store %arg4[%c0_235, %c0_236, %c112], %718 {strides = array<i32>} : memref<1x1x256xf32, #tpu.memory_space<vmem>>, vector<1x1x16xf32>,
      %719 = vector.extract_strided_slice %678 {offsets = [0, 8, 0], sizes = [1, 1, 16], strides = [1, 1, 1]} : vector<1x16x16xf32> to vector<1x1x16xf32>
      %720 = vector.shape_cast %719 : vector<1x1x16xf32> to vector<1x16xf32>
      %c0_237 = arith.constant 0 : index
      %c0_238 = arith.constant 0 : index
      %c128 = arith.constant 128 : index
      %721 = vector.load %arg4[%c0_237, %c0_238, %c128] : memref<1x1x256xf32, #tpu.memory_space<vmem>>, vector<1x1x16xf32>
      %722 = vector.shape_cast %721 : vector<1x1x16xf32> to vector<1x16xf32>
      %723 = vector.shape_cast %720 : vector<1x16xf32> to vector<1x1x16xf32>
      tpu.vector_store %arg4[%c0_237, %c0_238, %c128], %723 {strides = array<i32>} : memref<1x1x256xf32, #tpu.memory_space<vmem>>, vector<1x1x16xf32>,
      %724 = vector.extract_strided_slice %678 {offsets = [0, 9, 0], sizes = [1, 1, 16], strides = [1, 1, 1]} : vector<1x16x16xf32> to vector<1x1x16xf32>
      %725 = vector.shape_cast %724 : vector<1x1x16xf32> to vector<1x16xf32>
      %c0_239 = arith.constant 0 : index
      %c0_240 = arith.constant 0 : index
      %c144 = arith.constant 144 : index
      %726 = vector.load %arg4[%c0_239, %c0_240, %c144] : memref<1x1x256xf32, #tpu.memory_space<vmem>>, vector<1x1x16xf32>
      %727 = vector.shape_cast %726 : vector<1x1x16xf32> to vector<1x16xf32>
      %728 = vector.shape_cast %725 : vector<1x16xf32> to vector<1x1x16xf32>
      tpu.vector_store %arg4[%c0_239, %c0_240, %c144], %728 {strides = array<i32>} : memref<1x1x256xf32, #tpu.memory_space<vmem>>, vector<1x1x16xf32>,
      %729 = vector.extract_strided_slice %678 {offsets = [0, 10, 0], sizes = [1, 1, 16], strides = [1, 1, 1]} : vector<1x16x16xf32> to vector<1x1x16xf32>
      %730 = vector.shape_cast %729 : vector<1x1x16xf32> to vector<1x16xf32>
      %c0_241 = arith.constant 0 : index
      %c0_242 = arith.constant 0 : index
      %c160 = arith.constant 160 : index
      %731 = vector.load %arg4[%c0_241, %c0_242, %c160] : memref<1x1x256xf32, #tpu.memory_space<vmem>>, vector<1x1x16xf32>
      %732 = vector.shape_cast %731 : vector<1x1x16xf32> to vector<1x16xf32>
      %733 = vector.shape_cast %730 : vector<1x16xf32> to vector<1x1x16xf32>
      tpu.vector_store %arg4[%c0_241, %c0_242, %c160], %733 {strides = array<i32>} : memref<1x1x256xf32, #tpu.memory_space<vmem>>, vector<1x1x16xf32>,
      %734 = vector.extract_strided_slice %678 {offsets = [0, 11, 0], sizes = [1, 1, 16], strides = [1, 1, 1]} : vector<1x16x16xf32> to vector<1x1x16xf32>
      %735 = vector.shape_cast %734 : vector<1x1x16xf32> to vector<1x16xf32>
      %c0_243 = arith.constant 0 : index
      %c0_244 = arith.constant 0 : index
      %c176 = arith.constant 176 : index
      %736 = vector.load %arg4[%c0_243, %c0_244, %c176] : memref<1x1x256xf32, #tpu.memory_space<vmem>>, vector<1x1x16xf32>
      %737 = vector.shape_cast %736 : vector<1x1x16xf32> to vector<1x16xf32>
      %738 = vector.shape_cast %735 : vector<1x16xf32> to vector<1x1x16xf32>
      tpu.vector_store %arg4[%c0_243, %c0_244, %c176], %738 {strides = array<i32>} : memref<1x1x256xf32, #tpu.memory_space<vmem>>, vector<1x1x16xf32>,
      %739 = vector.extract_strided_slice %678 {offsets = [0, 12, 0], sizes = [1, 1, 16], strides = [1, 1, 1]} : vector<1x16x16xf32> to vector<1x1x16xf32>
      %740 = vector.shape_cast %739 : vector<1x1x16xf32> to vector<1x16xf32>
      %c0_245 = arith.constant 0 : index
      %c0_246 = arith.constant 0 : index
      %c192 = arith.constant 192 : index
      %741 = vector.load %arg4[%c0_245, %c0_246, %c192] : memref<1x1x256xf32, #tpu.memory_space<vmem>>, vector<1x1x16xf32>
      %742 = vector.shape_cast %741 : vector<1x1x16xf32> to vector<1x16xf32>
      %743 = vector.shape_cast %740 : vector<1x16xf32> to vector<1x1x16xf32>
      tpu.vector_store %arg4[%c0_245, %c0_246, %c192], %743 {strides = array<i32>} : memref<1x1x256xf32, #tpu.memory_space<vmem>>, vector<1x1x16xf32>,
      %744 = vector.extract_strided_slice %678 {offsets = [0, 13, 0], sizes = [1, 1, 16], strides = [1, 1, 1]} : vector<1x16x16xf32> to vector<1x1x16xf32>
      %745 = vector.shape_cast %744 : vector<1x1x16xf32> to vector<1x16xf32>
      %c0_247 = arith.constant 0 : index
      %c0_248 = arith.constant 0 : index
      %c208 = arith.constant 208 : index
      %746 = vector.load %arg4[%c0_247, %c0_248, %c208] : memref<1x1x256xf32, #tpu.memory_space<vmem>>, vector<1x1x16xf32>
      %747 = vector.shape_cast %746 : vector<1x1x16xf32> to vector<1x16xf32>
      %748 = vector.shape_cast %745 : vector<1x16xf32> to vector<1x1x16xf32>
      tpu.vector_store %arg4[%c0_247, %c0_248, %c208], %748 {strides = array<i32>} : memref<1x1x256xf32, #tpu.memory_space<vmem>>, vector<1x1x16xf32>,
      %749 = vector.extract_strided_slice %678 {offsets = [0, 14, 0], sizes = [1, 1, 16], strides = [1, 1, 1]} : vector<1x16x16xf32> to vector<1x1x16xf32>
      %750 = vector.shape_cast %749 : vector<1x1x16xf32> to vector<1x16xf32>
      %c0_249 = arith.constant 0 : index
      %c0_250 = arith.constant 0 : index
      %c224 = arith.constant 224 : index
      %751 = vector.load %arg4[%c0_249, %c0_250, %c224] : memref<1x1x256xf32, #tpu.memory_space<vmem>>, vector<1x1x16xf32>
      %752 = vector.shape_cast %751 : vector<1x1x16xf32> to vector<1x16xf32>
      %753 = vector.shape_cast %750 : vector<1x16xf32> to vector<1x1x16xf32>
      tpu.vector_store %arg4[%c0_249, %c0_250, %c224], %753 {strides = array<i32>} : memref<1x1x256xf32, #tpu.memory_space<vmem>>, vector<1x1x16xf32>,
      %754 = vector.extract_strided_slice %678 {offsets = [0, 15, 0], sizes = [1, 1, 16], strides = [1, 1, 1]} : vector<1x16x16xf32> to vector<1x1x16xf32>
      %755 = vector.shape_cast %754 : vector<1x1x16xf32> to vector<1x16xf32>
      %c0_251 = arith.constant 0 : index
      %c0_252 = arith.constant 0 : index
      %c240 = arith.constant 240 : index
      %756 = vector.load %arg4[%c0_251, %c0_252, %c240] : memref<1x1x256xf32, #tpu.memory_space<vmem>>, vector<1x1x16xf32>
      %757 = vector.shape_cast %756 : vector<1x1x16xf32> to vector<1x16xf32>
      %758 = vector.shape_cast %755 : vector<1x16xf32> to vector<1x1x16xf32>
      tpu.vector_store %arg4[%c0_251, %c0_252, %c240], %758 {strides = array<i32>} : memref<1x1x256xf32, #tpu.memory_space<vmem>>, vector<1x1x16xf32>,
    } else {
    }
    return
  }
  func.func @transform_0(%arg0: i32, %arg1: i32) -> (i32, i32, i32) {
    %c0_i32 = arith.constant 0 : i32
    %c0_i32_0 = arith.constant 0 : i32
    return %arg0, %arg1, %c0_i32 : i32, i32, i32
  }
  func.func @transform_1(%arg0: i32, %arg1: i32) -> i32 {
    %c0_i32 = arith.constant 0 : i32
    %c0_i32_0 = arith.constant 0 : i32
    return %c0_i32 : i32
  }
  func.func @transform_2(%arg0: i32, %arg1: i32) -> (i32, i32, i32) {
    %c0_i32 = arith.constant 0 : i32
    %c0_i32_0 = arith.constant 0 : i32
    %c0_i32_1 = arith.constant 0 : i32
    return %arg0, %c0_i32, %c0_i32_0 : i32, i32, i32
  }
}

</mosaic_0001>

<bundles_post_ra>
// kernel: tpu_custom_call.1
= control target key start
LH: loop header
LB: loop body
LE: loop exit
PB: predicated region body
PF: predicated region fallthrough
CT: control target
= control target key end

     0   :  { %s4185_s0 = inlined_call_operand.hbm [shape: f32[2,4,256], index: 0, kind: input, shape index: {}]   ;;  %s4186_s1 = inlined_call_operand.vmem [shape: f32[98], index: 1, kind: input, shape index: {}]   ;;  %s4187_s2 = inlined_call_operand.hbm [shape: f32[2,1,256], index: 2, kind: output, shape index: {}]  }
   0x1   :  { %4282 = sst [smem:[#allocation53_spill]] %s4185_s0 }
   0x2   :  { %4283 = sst [smem:[#allocation54_spill]] %s4186_s1 }
   0x3   :  { %4284 = sst [smem:[#allocation55_spill]] %s4187_s2 }
   0x4   :  { %7 = vsyncpa [#allocation6], 0 }
   0x5   :  { %9 = vsyncpa [#allocation6 + $0x1], 0 }
   0x6   :  { %10 = vsyncpa [#allocation8], 0 }
   0x7   :  { %11 = vsyncpa [#allocation7], 0 }
   0x8   :  { %13 = vsyncpa [#allocation7 + $0x1], 0  ;;  %s2561_s9 = smov 0   ;;  %s2563_s10 = smov 0  }
   0x9   :  { %s2565_s11 = smov 0   ;;  %s2567_s12 = smov 0  }
   0xa   :  { %s2569_s13 = smov 0   ;;  %s2571_s14 = smov 0  }
   0xb LB: > { %4285 = sst [smem:[#allocation14_spill]] %s2495_s9  ;;  %s2144_s15 = sadd.s32 4294967295, %s2515_s14   ;;  %s2515_s14 = sphi %s2571_s14, %s19_s14   ;;  %s2511_s13 = sphi %s2569_s13, %s4447_s13   ;;  %s2507_s12 = sphi %s2567_s12, %s4446_s12   ;;  %s2503_s11 = sphi %s2565_s11, %s4445_s11   ;;  %s2499_s10 = sphi %s2563_s10, %s4444_s10   ;;  %s2495_s9 = sphi %s2561_s9, %s4443_s9  }
   0xc   : > { %4286 = sst [smem:[#allocation15_spill]] %s2499_s10  ;;  %s2145_s16 = sadd.s32 4294967294, %s2515_s14  }
   0xd   : > { %4287 = sst [smem:[#allocation16_spill]] %s2503_s11  ;;  %p53_p0 = scmp.ne.s32.totalorder %s2499_s10, %s2495_s9 }
   0xe   : > { %4288 = sst [smem:[#allocation17_spill]] %s2507_s12  ;;  %p2595_p1 = scmp.eq.s32.totalorder %s2144_s15, 0 }
   0xf   : > { %4289 = sst [smem:[#allocation18_spill]] %s2511_s13  ;;  %p2599_p2 = scmp.eq.s32.totalorder %s2144_s15, 1 }
  0x10   : > { %4290 = sst [smem:[#allocation19_spill]] %s2515_s14  ;;  %p104_p3 = scmp.eq.s32.totalorder %s2145_s16, 1 }
  0x11   : > { %s4291_s17 = scalar_select %p2595_p1, 1, 0 }
  0x12   : > { %p2605_p4 = por %p2595_p1, %p53_p0  ;;  %p2146_p5 = scmp.ge.s32.totalorder %s2515_s14, 1 }
  0x13   : > { %p2610_p6 = por %p104_p3, %p53_p0  ;;  %p111_p7 = scmp.lt.s32.totalorder %s2515_s14, 3 }
  0x14   : > { %s4293_s19 = scalar_select %p2605_p4, 1, 0 }
  0x15   : > { %s4294_s20 = scalar_select %p2610_p6, 1, 0 }
  0x16   : > { %s4296_s1 = sld [smem:[#allocation54_spill]]  ;;  %p2618_p8 = pnand %p2146_p5, %p111_p7 }
  0x17   : > { %4295 = sst [smem:[#allocation20_spill]] %s4294_s20  ;;  %s31_s26 = sadd.s32 1, %s2511_s13 }
  0x18   : > { %p2270_p10 = pneg %p2618_p8  ;;  %s40_s27 = sadd.s32 1, %s2503_s11 }
  0x19   : > { %p33_p12 = scmp.ge.s32.totalorder %s31_s26, 2 }
  0x1a   : > { %p2627_p11 = pnand %p2270_p10, %p2595_p1 }
  0x1c   : > { %s124_s23 = sshll.u32 %s4296_s1, 4  ;;  %p2386_p0 = pneg %p2627_p11  ;;  %s125_s23 = int_to_ptr.vmem [resolvable:$true] %s124_s23 }
  0x1d   : > { %s2384_s28 = scalar_lea.vmem %s125_s23, 16  ;;  %p2392_p7 = scmp.lt.s32.totalorder %s125_s23, %s125_s23 }
  0x1e   : > { %p2385_p13 = scmp.ne.s32.totalorder %s125_s23, %s2384_s28  ;;  %p2393_p6 = scmp.lt.s32.totalorder %s2384_s28, %s2384_s28 }
  0x20   : > { %p2387_p3 = pnand %p2386_p0, %p2385_p13  ;;  %p2394_p9 = por %p2393_p6, %p2392_p7 }
  0x22   : > { %p2388_p5 = pneg %p2387_p3 }
  0x24   : > { %p2395_p4 = pnand %p2394_p9, %p2388_p5 }
  0x26   : > { %2398 = shalt.err (!%p2395_p4)
}
  0x27   : > { %s2517_s29 = smov [#allocation9]   ;;  %s4449_s26 = smov (%p33_p12, %s31_s26), 0 }
  0x28   : > { %2273 = dma.vmem_to_smem (!%p2627_p11), %s125_s23, 16, %s2517_s29, [#allocation8]  }
  0x29   : > { %4299 = sst [smem:[#allocation21_spill]] %s4449_s26  ;;  %p47_p10 = scmp.ne.s32.totalorder %s2503_s11, %s2499_s10 }
  0x2a   : > { %p48_p6 = scmp.eq.s32.totalorder %s2515_s14, 0  ;;  %s35_s30 = ssub.s32 %s2511_s13, %s4449_s26 }
  0x2b   : > { %p2283_p4 = scmp.lt.s32.totalorder %s2515_s14, 2  ;;  %p38_p9 = scmp.eq.s32.totalorder %s35_s30, 0 }
  0x2c   : > { %p49_p13 = por %p48_p6, %p47_p10  ;;  %p2647_p0 = por %p2599_p2, %p47_p10 }
  0x2d   : > { %s135_s4 = sand.u32 1, %s2503_s11   ;;  %s2260_s7 = sshll.u32 %s2511_s13, 7 }
  0x2e   : > { %s4300_s3 = scalar_select %p2647_p0, 1, 0 }
  0x2f   : > { %s2653_s5 = scalar_select %p38_p9, %s2503_s11, %s40_s27  }
  0x30   : > { %4301 = sst [smem:[#allocation22_spill]] %s4300_s3  ;;  %s2149_s6 = sshll.u32 %s135_s4, 3 }
  0x31   : > { %4302 = sst [smem:[#allocation23_spill]] %s2653_s5  ;;  %s4303_s0 = sld [smem:[#allocation53_spill]] }
  0x32   : > { %s139_s21 = scalar_lea.vmem [#allocation5], %s2149_s6  ;;  %p2663_p2 = pnand %p2283_p4, %p49_p13 }
  0x33   : > { %s149_s18 = sshll.u32 %s139_s21, 4  ;;  %s136_s23 = scalar_lea.sflag [#allocation6], %s135_s4  ;;  %s2661_s18 = int_to_ptr.vmem [resolvable:$true] %s149_s18 }
  0x34   : > { %p2401_p12 = pneg %p2663_p2 }
  0x37   : > { %s2659_s16 = scalar_lea.hbm %s4303_s0, %s2260_s7  ;;  %s2404_s29 = scalar_lea.hbm %s4303_s0, 256 }
  0x38   : > { %s2399_s25 = scalar_lea.hbm %s2659_s16, 128  ;;  %p2405_p7 = scmp.lt.u32.totalorder %s2659_s16, %s4303_s0 }
  0x39   : > { %p2400_p11 = scmp.ne.s32.totalorder %s2659_s16, %s2399_s25  ;;  %p2406_p10 = scmp.lt.u32.totalorder %s2404_s29, %s2399_s25 }
  0x3a   : > { %p2408_p4 = scmp.lt.u32.totalorder %s2399_s25, %s2659_s16 }
  0x3b   : > { %p2402_p3 = pnand %p2401_p12, %p2400_p11  ;;  %p2407_p6 = por %p2406_p10, %p2405_p7 }
  0x3d   : > { %p2403_p5 = pneg %p2402_p3  ;;  %p2409_p9 = por %p2408_p4, %p2407_p6 }
  0x3f   : > { %p2410_p13 = pnand %p2409_p9, %p2403_p5 }
  0x41   : > { %2413 = shalt.err (!%p2410_p13)
}
  0x42   : > { %s2414_s4 = scalar_lea.vmem %s2661_s18, 128  ;;  %s2518_s7 = smov [#allocation5]  }
  0x43   : > { %p2415_p11 = scmp.ne.s32.totalorder %s2661_s18, %s2414_s4  ;;  %s2419_s8 = sshll.u32 %s2518_s7, 4  ;;  %s2420_s8 = int_to_ptr.vmem [resolvable:$false] %s2419_s8 }
  0x44   : > { %s2421_s15 = scalar_lea.vmem %s2420_s8, 256  ;;  %p2422_p1 = scmp.lt.s32.totalorder %s2661_s18, %s2420_s8 }
  0x45   : > { %p2417_p3 = pnand %p2415_p11, %p2401_p12  ;;  %p2423_p7 = scmp.lt.s32.totalorder %s2421_s15, %s2414_s4 }
  0x47   : > { %p2418_p0 = pneg %p2417_p3  ;;  %p2424_p10 = por %p2423_p7, %p2422_p1 }
  0x49   : > { %p2425_p6 = pnand %p2424_p10, %p2418_p0 }
  0x4b   : > { %2428 = shalt.err (!%p2425_p6)
}
  0x4c   : > { %2277 = dma.hbm_to_vmem [thread:$0]  (!%p2663_p2), %s2659_s16, 128, %s2661_s18, %s136_s23  }
  0x4d   : > { %158 = sbr.rel (%p2618_p8) target bundleno = 1052 (0x41c), region = 28 }
  0x54   : > { %s2695_s21 = sand.u32 1, %s2499_s10   ;;  %p4306_p1 = scmp.ne.s32.totalorder %s4293_s19, 0 }
  0x55   : > { %4305 = sst [smem:[#allocation24_spill]] %s2695_s21  ;;  %s2153_s25 = sshll.u32 %s2695_s21, 3 }
  0x56   : > { %s161_s27 = scalar_lea.sflag [#allocation6], %s2695_s21  ;;  %s164_s28 = scalar_lea.vmem [#allocation5], %s2153_s25 }
  0x57   : > { %2482 = dma.done.wait (%p4306_p1), %s161_s27, 128  }
  0x58   : > { %2484 = vsyncadd (%p4306_p1), %s161_s27, 4294967168  ;;  %p4307_p0 = scmp.ne.s32.totalorder %s4291_s17, 0 }
  0x5a   : > { %2486 = dma.done.wait (%p4307_p0), [#allocation8], 16  }
  0x5b   : > { %2488 = vsyncadd (%p4307_p0), [#allocation8], 4294967280 }
  0x5c   : > { %173 = sfence }
  0x5d   : > { %v4248_v0 = vlaneseq  ;;  %v200_v1 = vld [vmem:[%s164_s28] sm:$0xff]  ;;  %vm205_vm0 = vcmask 1043456   ;;  %v2519_v7 = vmov -inf   ;;  %v2520_v11 = vmov 0.0   ;;  %s4194_s17 = smov 96   ;;  %s4192_s19 = smov 112  }
  0x5e   : > { %v203_v2 = vcombine.high %v200_v1, %v200_v1  ;;  %v206_v3 = vsel %vm205_vm0, %v200_v1, 0.0  ;;  %v245_v4 = vsel %vm205_vm0, %v200_v1, -inf  ;;  %v2521_v18 = vmov 1966171168   ;;  %s4200_s24 = smov 64   ;;  %s4196_s16 = smov 80  }
  0x5f   : > { %vm2708_vm1 = vcmp.lt.s32.totalorder %v4248_v0, 256  ;;  %v207_v6 = vrot.slane %v206_v3, 4  ;;  %v246_v9 = vrot.slane %v245_v4, 4  ;;  %v224_v19 = vunpack.c.l.s4 %v2521_v18  ;;  %s2526_s18 = smov 115   ;;  %s4210_s22 = smov 3  }
  0x60   : > { %199 = vst.msk [vmem:[#allocation3] sm:$0x3] %vm2708_vm1, %v2519_v7  ;;  %v213_v8 = vsel %vm205_vm0, %v203_v2, 0.0  ;;  %v252_v10 = vsel %vm205_vm0, %v203_v2, -inf  ;;  %198 = vst.msk [vmem:[#allocation2] sm:$0x3] %vm2708_vm1, %v2520_v11 }
  0x61   : > { %v208_v12 = vadd.f32 %v207_v6, %v206_v3  ;;  %v214_v13 = vrot.slane %v213_v8, 4  ;;  %v253_v14 = vrot.slane %v252_v10, 4  ;;  %v247_v15 = vmax.f32 %v245_v4, %v246_v9  ;;  %s4202_s23 = smov 32   ;;  %s4198_s29 = smov 48  }
  0x62   : > { %v227_v25 = vshrl.u32 %v4248_v0, 7  ;;  %v225_v29 = vunpack.c.0.s8 %v224_v19  ;;  %vm285_vm2 = vcmask 179200   ;;  %s2530_s30 = smov 99   ;;  %s4204_s6 = smov 16   ;;  %vm301_vm3 = vcmask 147480  }
  0x63   : > { %v209_v16 = vrot.slane %v208_v12, 2  ;;  %v215_v17 = vadd.f32 %v214_v13, %v213_v8  ;;  %v254_v20 = vmax.f32 %v252_v10, %v253_v14  ;;  %v248_v21 = vrot.slane %v247_v15, 2  ;;  %290 = vst.msk [vmem:[#allocation4 + $0x18] sm:$0xff] %vm285_vm2, %v2520_v11  ;;  %286 = vst.msk [vmem:[#allocation4] sm:$0xff] %vm285_vm2, %v2520_v11  ;;  %s2532_s4 = smov 83   ;;  %s2533_s7 = smov 67  }
  0x64   : > { %v2718_v37 = vsub.s32 %v225_v29, %v227_v25  ;;  %287 = vst.msk [vmem:[#allocation4 + $0x8] sm:$0xff] %vm285_vm2, %v2520_v11  ;;  %291 = vst.msk [vmem:[#allocation4 + $0x20] sm:$0xff] %vm285_vm2, %v2520_v11  ;;  %v2732_v50 = vsub.s32 0, %v227_v25  ;;  %s2534_s8 = smov 51   ;;  %s2535_s15 = smov 35   ;;  %vm288_vm4 = vcmask 177152  }
  0x65   : > { %v210_v22 = vadd.f32 %v209_v16, %v208_v12  ;;  %v216_v23 = vrot.slane %v215_v17, 2  ;;  %v255_v24 = vrot.slane %v254_v20, 2  ;;  %v249_v26 = vmax.f32 %v247_v15, %v248_v21  ;;  %s2536_s25 = smov 19   ;;  %292 = vst.msk [vmem:[#allocation4 + $0x28] sm:$0x3f] %vm288_vm4, %v2520_v11  ;;  %s2786_s27 = sld [smem:[#allocation9 + $0x33]] }
  0x66   : > { %4310 = vst [vmem:[#allocation25_spill] sm:$0xff] %v2718_v37  ;;  %289 = vst.msk [vmem:[#allocation4 + $0x10] sm:$0x3f] %vm288_vm4, %v2520_v11  ;;  %s2794_s28 = sld [smem:[#allocation9 + $0x37]]  ;;  %s2899_s0 = sld [smem:[#allocation9 + $0x1b]] }
  0x67   : > { %v211_v27 = vrot.slane %v210_v22, 1  ;;  %v217_v28 = vadd.f32 %v216_v23, %v215_v17  ;;  %v256_v30 = vmax.f32 %v254_v20, %v255_v24  ;;  %v250_v31 = vrot.slane %v249_v26, 1  ;;  %v244_v43 = vld [vmem:[#allocation3] sm:$0x3]  ;;  %v201_v44 = vld [vmem:[#allocation2] sm:$0x3] }
  0x68   : > { %s2912_s1 = sld [smem:[#allocation9 + $0xb]]  ;;  %s2914_s26 = sld [smem:[#allocation9 + $0x4f]] }
  0x69   : > { %v212_v32 = vadd.f32 %v211_v27, %v210_v22  ;;  %v218_v33 = vrot.slane %v217_v28, 1  ;;  %v257_v34 = vrot.slane %v256_v30, 1  ;;  %v251_v35 = vmax.f32 %v249_v26, %v250_v31  ;;  %s4314_s13 = smov 127   ;;  %s2925_s5 = sld [smem:[#allocation9 + $0xc]] }
  0x6a   : > { %s2927_s11 = sld [smem:[#allocation9 + $0x53]]  ;;  %s4316_s10 = smov 1  }
  0x6b   : > { %v219_v36 = vadd.f32 %v218_v33, %v217_v28  ;;  %v258_v38 = vmax.f32 %v256_v30, %v257_v34  ;;  %s4318_s14 = smov 125   ;;  %s2951_s20 = sld [smem:[#allocation9 + $0xe]] }
  0x6c   : > { %4311 = sst [smem:[#allocation26_spill]] %s2899_s0  ;;  %s2961_s9 = sld [smem:[#allocation9 + $0xf]] }
  0x6d   : > { %v222_v39 = vcombine.low %v212_v32, %v219_v36  ;;  %v261_v40 = vcombine.low %v251_v35, %v258_v38  ;;  %s4234_s2 = smov 123   ;;  %s2968_s3 = sld [smem:[#allocation9 + $0x10]] }
  0x6e   : > { %4313 = sst [smem:[#allocation27_spill]] %s2912_s1  ;;  %s2975_s12 = sld [smem:[#allocation9 + $0x11]] }
  0x6f   : > { %v229_v41 = vrot.slane %v222_v39, %v2718_v37  ;;  %v268_v42 = vrot.slane %v261_v40, %v2718_v37  ;;  %4315 = sst [smem:[#allocation28_spill]] %s2925_s5  ;;  %s4323_s21 = smov 2  }
  0x71   : > { %v236_v45 = vrot.slane %v229_v41, %v2718_v37  ;;  %v275_v46 = vrot.slane %v268_v42, %v2718_v37  ;;  %4319 = sst [smem:[#allocation30_spill]] %s2951_s20 }
  0x72   : > { %4320 = sst [smem:[#allocation31_spill]] %s2961_s9 }
  0x73   : > { %v277_v47 = vmax.f32 %v244_v43, %v275_v46  ;;  %v238_v48 = vadd.f32 %v236_v45, %v201_v44  ;;  %4321 = sst [smem:[#allocation32_spill]] %s2968_s3 }
  0x74   : > { %4322 = sst [smem:[#allocation33_spill]] %s2975_s12 }
  0x75   : > { %278 = vst.msk [vmem:[#allocation3] sm:$0x3] %vm2708_vm1, %v277_v47  ;;  %243 = vst.msk [vmem:[#allocation2] sm:$0x3] %vm2708_vm1, %v238_v48 }
  0x7c   : > { %v284_v49 = vld [vmem:[#allocation3] sm:$0x3]  ;;  %v282_v52 = vld [vmem:[#allocation2] sm:$0x3] }
  0x7d   : > { %420 = vrot.lane.b32.xlu1 %v284_v49, %s4194_s17  ;;  %398 = vrot.lane.b32.xlu0 %v284_v49, %s4192_s19  ;;  %v307_v51 = vrot.slane %v284_v49, %v2732_v50  ;;  %v283_v53 = vmul.f32 0.25, %v282_v52  ;;  %v378_v55 = vrot.slane %v284_v49, 1 }
  0x7f   : > { %v297_v54 = vrot.slane %v283_v53, %v2732_v50  ;;  %v369_v56 = vrot.slane %v283_v53, 1  ;;  %v382_v57 = vrot.slane %v378_v55, %v2732_v50 }
  0x81   : > { %464 = vrot.lane.b32.xlu1 %v284_v49, %s4200_s24  ;;  %442 = vrot.lane.b32.xlu0 %v284_v49, %s4196_s16  ;;  %v373_v58 = vrot.slane %v369_v56, %v2732_v50 }
  0x85   : > { %317 = vrot.lane.b32.xlu1 %v307_v51, %s2526_s18  ;;  %308 = vrot.lane.b32.xlu0 %v307_v51, %s4210_s22 }
  0x89   : > { %409 = vrot.lane.b32.xlu0 %v283_v53, %s4194_s17  ;;  %387 = vrot.lane.b32.xlu1 %v283_v53, %s4192_s19  ;;  %s4206_s19 = smov 125   ;;  %s2852_s17 = sld [smem:[#allocation9 + $0x4b]] }
  0x8d   : > { %453 = vrot.lane.b32.xlu0 %v283_v53, %s4200_s24  ;;  %431 = vrot.lane.b32.xlu1 %v283_v53, %s4196_s16  ;;  %s2854_s16 = sld [smem:[#allocation9 + $0x7]]  ;;  %s2868_s24 = sld [smem:[#allocation9 + $0x8]] }
  0x91   : > { %497 = vrot.lane.b32.xlu0 %v283_v53, %s4202_s23  ;;  %475 = vrot.lane.b32.xlu1 %v283_v53, %s4198_s29 }
  0x95   : > { %325 = vrot.lane.b32.xlu0 %v307_v51, %s2530_s30  ;;  %519 = vrot.lane.b32.xlu1 %v283_v53, %s4204_s6 }
  0x99   : > { %333 = vrot.lane.b32.xlu0 %v307_v51, %s2532_s4  ;;  %313 = vrot.lane.b32.xlu1 %v297_v54, %s2526_s18  ;;  %s2806_s18 = sld [smem:[#allocation9 + $0x4]] }
  0x9d   : > { %329 = vrot.lane.b32.xlu1 %v297_v54, %s2532_s4  ;;  %298 = vrot.lane.b32.xlu0 %v297_v54, %s4210_s22  ;;  %s2820_s4 = sld [smem:[#allocation9 + $0x5]] }
  0xa1   : > { %337 = vrot.lane.b32.xlu1 %v297_v54, %s2533_s7  ;;  %321 = vrot.lane.b32.xlu0 %v297_v54, %s2530_s30  ;;  %s2808_s30 = sld [smem:[#allocation9 + $0x3f]] }
  0xa5   : > { %508 = vrot.lane.b32.xlu1 %v284_v49, %s4202_s23  ;;  %486 = vrot.lane.b32.xlu0 %v284_v49, %s4198_s29  ;;  %s4214_s29 = smov 124   ;;  %s2870_s23 = sld [smem:[#allocation9 + $0x13]] }
  0xa9   : > { %341 = vrot.lane.b32.xlu1 %v307_v51, %s2533_s7  ;;  %530 = vrot.lane.b32.xlu0 %v284_v49, %s4204_s6  ;;  %s2822_s7 = sld [smem:[#allocation9 + $0x43]]  ;;  %s4212_s6 = smov 127  }
  0xad   : > { %349 = vrot.lane.b32.xlu1 %v307_v51, %s2534_s8  ;;  %345 = vrot.lane.b32.xlu0 %v297_v54, %s2534_s8  ;;  %s4208_s8 = smov 1  }
  0xb1   : > { %357 = vrot.lane.b32.xlu1 %v307_v51, %s2535_s15  ;;  %353 = vrot.lane.b32.xlu0 %v297_v54, %s2535_s15  ;;  %s2838_s15 = sld [smem:[#allocation9 + $0x6]] }
  0xb5   : > { %365 = vrot.lane.b32.xlu1 %v307_v51, %s2536_s25  ;;  %361 = vrot.lane.b32.xlu0 %v297_v54, %s2536_s25  ;;  %v1208_v54 = vstv %s2786_s27  ;;  %s2840_s25 = sld [smem:[#allocation9 + $0x47]]  ;;  %s3645_s27 = sld [smem:[#allocation9 + $0x24]] }
  0xb9   : > { %383 = vrot.lane.b32.xlu1 %v382_v57, %s4210_s22  ;;  %374 = vrot.lane.b32.xlu0 %v373_v58, %s4210_s22 }
  0xef   : > { %v421_v59 = vpop.permute.xlu1 %420  ;;  %v399_v60 = vpop.permute.xlu0 %398 }
  0xf0   : > { %v400_v61 = vrot.slane %v399_v60, 1  ;;  %v422_v62 = vrot.slane %v421_v59, 1  ;;  %v1264_v60 = vstv %s2794_s28  ;;  %s3251_s28 = sld [smem:[#allocation9 + $0x1f]] }
  0xf2   : > { %v404_v63 = vrot.slane %v400_v61, %v2732_v50  ;;  %v426_v5 = vrot.slane %v422_v62, %v2732_v50 }
  0xf3   : > { %v465_v1 = vpop.permute.xlu1 %464  ;;  %v443_v2 = vpop.permute.xlu0 %442 }
  0xf4   : > { %v466_v3 = vrot.slane %v465_v1, 1  ;;  %v444_v4 = vrot.slane %v443_v2, 1  ;;  %405 = vrot.lane.b32.xlu1 %v404_v63, %s4210_s22  ;;  %v568_v1 = vstv %s2806_s18  ;;  %s3256_s18 = sld [smem:[#allocation9 + $0x26]] }
  0xf6   : > { %v470_v6 = vrot.slane %v466_v3, %v2732_v50  ;;  %v448_v9 = vrot.slane %v444_v4, %v2732_v50  ;;  %v1348_v3 = vstv %s2808_s30  ;;  %s3268_s30 = sld [smem:[#allocation9 + $0x29]] }
  0xf7   : > { %v318_v7 = vpop.permute.xlu1 %317  ;;  %v309_v8 = vpop.permute.xlu0 %308 }
  0xf8   : > { %320 = vst.msk [vmem:[#allocation4 + $0x1c] sm:$0x1] %vm301_vm3, %v318_v7  ;;  %312 = vst.msk [vmem:[#allocation4 + $0x1b] sm:$0x1] %vm301_vm3, %v309_v8  ;;  %427 = vrot.lane.b32.xlu1 %v426_v5, %s4210_s22  ;;  %471 = vrot.lane.b32.xlu0 %v470_v6, %s4210_s22  ;;  %v582_v5 = vstv %s2820_s4  ;;  %v1404_v6 = vstv %s2822_s7  ;;  %s3270_s4 = sld [smem:[#allocation9 + $0x1]]  ;;  %s3282_s7 = sld [smem:[#allocation9 + $0x2a]] }
  0xfb   : > { %v410_v10 = vpop.permute.xlu0 %409  ;;  %v388_v12 = vpop.permute.xlu1 %387 }
  0xfc   : > { %449 = vrot.lane.b32.xlu1 %v448_v9, %s4210_s22  ;;  %v389_v29 = vrot.slane %v388_v12, 1  ;;  %v411_v34 = vrot.slane %v410_v10, 1  ;;  %v596_v9 = vstv %s2838_s15  ;;  %v1462_v12 = vstv %s2840_s25  ;;  %s3296_s15 = sld [smem:[#allocation9 + $0x2d]] }
  0xfd   : > { %s3317_s25 = sld [smem:[#allocation9 + $0x1d]] }
  0xfe   : > { %v393_v35 = vrot.slane %v389_v29, %v2732_v50  ;;  %v415_v41 = vrot.slane %v411_v34, %v2732_v50 }
  0xff   : > { %v454_v13 = vpop.permute.xlu0 %453  ;;  %v432_v14 = vpop.permute.xlu1 %431 }
 0x100   : > { %v455_v36 = vrot.slane %v454_v13, 1  ;;  %v433_v43 = vrot.slane %v432_v14, 1 }
 0x102   : > { %v459_v42 = vrot.slane %v455_v36, %v2732_v50  ;;  %v437_v47 = vrot.slane %v433_v43, %v2732_v50 }
 0x103   : > { %v498_v15 = vpop.permute.xlu0 %497  ;;  %v2766_v16 = vpop.permute.xlu1 %475 }
 0x104   : > { %v499_v44 = vrot.slane %v498_v15, 1  ;;  %v477_v49 = vrot.slane %v2766_v16, 1  ;;  %v1518_v15 = vstv %s2852_s17  ;;  %s3362_s17 = sld [smem:[#allocation9 + $0x3e]] }
 0x106   : > { %v503_v48 = vrot.slane %v499_v44, %v2732_v50  ;;  %v481_v55 = vrot.slane %v477_v49, %v2732_v50  ;;  %v740_v49 = vstv %s2968_s3  ;;  %s3000_s3 = sld [smem:[#allocation9 + $0x5b]] }
 0x107   : > { %v326_v17 = vpop.permute.xlu0 %325  ;;  %v2768_v18 = vpop.permute.xlu1 %519 }
 0x108   : > { %328 = vst.msk [vmem:[#allocation4 + $0x1d] sm:$0x1] %vm301_vm3, %v326_v17  ;;  %v521_v56 = vrot.slane %v2768_v18, 1  ;;  %v612_v17 = vstv %s2854_s16  ;;  %s3229_s16 = sld [smem:[#allocation9 + $0x2f]] }
 0x10a   : > { %v525_v61 = vrot.slane %v521_v56, %v2732_v50  ;;  %v4357_v37 = vstv %s3362_s17 }
 0x10b   : > { %v334_v19 = vpop.permute.xlu0 %333  ;;  %v314_v20 = vpop.permute.xlu1 %313 }
 0x10c   : > { %336 = vst.msk [vmem:[#allocation4 + $0x1e] sm:$0x1] %vm301_vm3, %v334_v19  ;;  %316 = vst.msk [vmem:[#allocation4 + $0x4] sm:$0x1] %vm301_vm3, %v314_v20  ;;  %v626_v20 = vstv %s2868_s24  ;;  %s3217_s24 = sld [smem:[#allocation9 + $0x2b]] }
 0x10f   : > { %v330_v21 = vpop.permute.xlu1 %329  ;;  %v299_v22 = vpop.permute.xlu0 %298 }
 0x110   : > { %332 = vst.msk [vmem:[#allocation4 + $0x6] sm:$0x1] %vm301_vm3, %v330_v21  ;;  %302 = vst.msk [vmem:[#allocation4 + $0x3] sm:$0x1] %vm301_vm3, %v299_v22  ;;  %v782_v22 = vstv %s2870_s23  ;;  %s3381_s23 = sld [smem:[#allocation9 + $0x41]] }
 0x113   : > { %v338_v23 = vpop.permute.xlu1 %337  ;;  %v322_v24 = vpop.permute.xlu0 %321 }
 0x114   : > { %340 = vst.msk [vmem:[#allocation4 + $0x7] sm:$0x1] %vm301_vm3, %v338_v23  ;;  %324 = vst.msk [vmem:[#allocation4 + $0x5] sm:$0x1] %vm301_vm3, %v322_v24 }
 0x117   : > { %v509_v25 = vpop.permute.xlu1 %508  ;;  %v487_v26 = vpop.permute.xlu0 %486 }
 0x118   : > { %v510_v27 = vrot.slane %v509_v25, 1  ;;  %v488_v28 = vrot.slane %v487_v26, 1 }
 0x11a   : > { %v514_v30 = vrot.slane %v510_v27, %v2732_v50  ;;  %v492_v11 = vrot.slane %v488_v28, %v2732_v50 }
 0x11b   : > { %v342_v31 = vpop.permute.xlu1 %341  ;;  %v531_v32 = vpop.permute.xlu0 %530  ;;  %v2832_v63 = vld [vmem:[#allocation4] sm:$0xff] }
 0x11c   : > { %344 = vst.msk [vmem:[#allocation4 + $0x1f] sm:$0x1] %vm301_vm3, %v342_v31  ;;  %v532_v33 = vrot.slane %v531_v32, 1  ;;  %515 = vrot.lane.b32.xlu0 %v514_v30, %s4210_s22  ;;  %493 = vrot.lane.b32.xlu1 %v492_v11, %s4210_s22  ;;  %v583_v7 = vmul.f32 %v582_v5, %v2832_v63  ;;  %v597_v13 = vmul.f32 %v596_v9, %v2832_v63  ;;  %v896_v11 = vstv %s2899_s0  ;;  %s3027_s0 = sld [smem:[#allocation9 + $0x31]] }
 0x11e   : > { %v536_v38 = vrot.slane %v532_v33, %v2732_v50  ;;  %v569_v50 = vmul.f32 %v568_v1, %v2832_v63  ;;  %v668_v33 = vstv %s2912_s1  ;;  %s3045_s1 = sld [smem:[#allocation9 + $0x22]] }
 0x11f   : > { %v350_v39 = vpop.permute.xlu1 %349  ;;  %v346_v40 = vpop.permute.xlu0 %345 }
 0x120   : > { %352 = vst.msk [vmem:[#allocation4 + $0x20] sm:$0x1] %vm301_vm3, %v350_v39  ;;  %348 = vst.msk [vmem:[#allocation4 + $0x8] sm:$0x1] %vm301_vm3, %v346_v40  ;;  %394 = vrot.lane.b32.xlu0 %v393_v35, %s4210_s22  ;;  %537 = vrot.lane.b32.xlu1 %v536_v38, %s4210_s22  ;;  %v1576_v35 = vstv %s2914_s26  ;;  %v682_v39 = vstv %s2925_s5  ;;  %s3011_s5 = sld [smem:[#allocation9 + $0x5f]]  ;;  %s3346_s26 = sld [smem:[#allocation9 + $0x3d]] }
 0x121   : > { %v1632_v40 = vstv %s2927_s11  ;;  %s3333_s11 = sld [smem:[#allocation9 + $0x1e]] }
 0x123   : > { %v358_v45 = vpop.permute.xlu1 %357  ;;  %v354_v46 = vpop.permute.xlu0 %353  ;;  %v2803_v53 = vld [vmem:[#allocation4 + $0x18] sm:$0xff] }
 0x124   : > { %360 = vst.msk [vmem:[#allocation4 + $0x21] sm:$0x1] %vm301_vm3, %v358_v45  ;;  %356 = vst.msk [vmem:[#allocation4 + $0x9] sm:$0x1] %vm301_vm3, %v354_v46  ;;  %416 = vrot.lane.b32.xlu0 %v415_v41, %s4210_s22  ;;  %460 = vrot.lane.b32.xlu1 %v459_v42, %s4210_s22  ;;  %v1209_v57 = vmul.f32 %v1208_v54, %v2803_v53  ;;  %v1265_v62 = vmul.f32 %v1264_v60, %v2803_v53  ;;  %v712_v45 = vstv %s2951_s20  ;;  %s4326_s20 = smov 126  }
 0x127   : > { %v366_v51 = vpop.permute.xlu1 %365  ;;  %v362_v52 = vpop.permute.xlu0 %361  ;;  %v609_v16 = vld [vmem:[#allocation4 + $0x1] sm:$0xff] }
 0x128   : > { %368 = vst.msk [vmem:[#allocation4 + $0x22] sm:$0x1] %vm301_vm3, %v366_v51  ;;  %364 = vst.msk [vmem:[#allocation4 + $0xa] sm:$0x1] %vm301_vm3, %v362_v52  ;;  %438 = vrot.lane.b32.xlu0 %v437_v47, %s4210_s22  ;;  %504 = vrot.lane.b32.xlu1 %v503_v48, %s4210_s22  ;;  %v613_v19 = vmul.f32 %v612_v17, %v609_v16  ;;  %v627_v23 = vmul.f32 %v626_v20, %v609_v16  ;;  %v726_v47 = vstv %s2961_s9  ;;  %s2997_s9 = sld [smem:[#allocation9 + $0x16]] }
 0x129   : > { %v669_v36 = vmul.f32 %v668_v33, %v609_v16  ;;  %v683_v41 = vmul.f32 %v682_v39, %v609_v16  ;;  %v754_v52 = vstv %s2975_s12  ;;  %s3008_s12 = sld [smem:[#allocation9 + $0x19]] }
 0x12b   : > { %v384_v58 = vpop.permute.xlu1 %383  ;;  %v375_v59 = vpop.permute.xlu0 %374  ;;  %v2835_v2 = vld [vmem:[#allocation4 + $0x1a] sm:$0xff]  ;;  %v2894_v21 = vld [vmem:[#allocation4 + $0x2] sm:$0xff] }
 0x12c   : > { %386 = vst.msk [vmem:[#allocation4 + $0x23] sm:$0x1] %vm301_vm3, %v384_v58  ;;  %377 = vst.msk [vmem:[#allocation4 + $0xb] sm:$0x1] %vm301_vm3, %v375_v59  ;;  %482 = vrot.lane.b32.xlu0 %v481_v55, %s4210_s22  ;;  %1213 = vrot.lane.b32.xlu1 %v1209_v57, %s4208_s8  ;;  %v1349_v4 = vmul.f32 %v1348_v3, %v2835_v2  ;;  %v1405_v8 = vmul.f32 %v1404_v6, %v2835_v2  ;;  %s2884_s8 = sld [smem:[#allocation9 + $0x17]] }
 0x12d   : > { %v783_v24 = vmul.f32 %v782_v22, %v2894_v21  ;;  %v713_v46 = vmul.f32 %v712_v45, %v2894_v21  ;;  %v727_v48 = vmul.f32 %v726_v47, %v2894_v21  ;;  %v741_v51 = vmul.f32 %v740_v49, %v2894_v21 }
 0x12e   : > { %v755_v56 = vmul.f32 %v754_v52, %v2894_v21  ;;  %4327 = sst [smem:[#allocation36_spill]] %s2997_s9 }
 0x12f   : > { %v2865_v10 = vld [vmem:[#allocation4 + $0x1b] sm:$0xff]  ;;  %v2909_v26 = vld [vmem:[#allocation4 + $0x3] sm:$0xff]  ;;  %4328 = sst [smem:[#allocation37_spill]] %s3008_s12 }
 0x130   : > { %526 = vrot.lane.b32.xlu0 %v525_v61, %s4210_s22  ;;  %1269 = vrot.lane.b32.xlu1 %v1265_v62, %s4206_s19  ;;  %v1463_v14 = vmul.f32 %v1462_v12, %v2865_v10  ;;  %s2882_s19 = sld [smem:[#allocation9 + $0x9]]  ;;  %v1519_v18 = vmul.f32 %v1518_v15, %v2865_v10  ;;  %v897_v32 = vmul.f32 %v896_v11, %v2909_v26 }
 0x132   : > { %v840_v27 = vstv %s2884_s8  ;;  %s3284_s8 = sld [smem:[#allocation9 + $0x2]] }
 0x133   : > { %v841_v29 = vmul.f32 %v840_v27, %v2909_v26  ;;  %v2937_v34 = vld [vmem:[#allocation4 + $0x1c] sm:$0xff] }
 0x134   : > { %573 = vrot.lane.b32.xlu0 %v569_v50, %s4214_s29  ;;  %1353 = vrot.lane.b32.xlu1 %v1349_v4, %s4210_s22  ;;  %s4216_s22 = smov 2   ;;  %v1577_v38 = vmul.f32 %v1576_v35, %v2937_v34  ;;  %v1633_v42 = vmul.f32 %v1632_v40, %v2937_v34 }
 0x136   : > { %v640_v25 = vstv %s2882_s19  ;;  %s4338_s19 = smov 123  }
 0x137   : > { %v641_v28 = vmul.f32 %v640_v25, %v609_v16 }
 0x138   : > { %587 = vrot.lane.b32.xlu0 %v583_v7, %s4214_s29  ;;  %1409 = vrot.lane.b32.xlu1 %v1405_v8, %s4212_s6  ;;  %s2897_s6 = sld [smem:[#allocation9 + $0xa]]  ;;  %v826_v7 = vstv %s2997_s9  ;;  %v1716_v8 = vstv %s3000_s3  ;;  %s3203_s3 = sld [smem:[#allocation9 + $0x27]] }
 0x139   : > { %s2205_s9 = sld [smem:[#allocation9 + $0x32]]  ;;  %v4255_v0 = vstv %s3284_s8 }
 0x13c   : > { %601 = vrot.lane.b32.xlu0 %v597_v13, %s4214_s29  ;;  %1467 = vrot.lane.b32.xlu1 %v1463_v14, %s4216_s22  ;;  %s4222_s29 = smov 126   ;;  %s4312_s22 = smov 3   ;;  %v827_v13 = vmul.f32 %v826_v7, %v2909_v26 }
 0x13e   : > { %v654_v30 = vstv %s2897_s6  ;;  %s3240_s6 = sld [smem:[#allocation9 + $0x25]] }
 0x13f   : > { %v655_v31 = vmul.f32 %v654_v30, %v609_v16 }
 0x140   : > { %1523 = vrot.lane.b32.xlu1 %v1519_v18, %s4222_s29  ;;  %617 = vrot.lane.b32.xlu0 %v613_v19, %s4312_s22  ;;  %v868_v18 = vstv %s3008_s12  ;;  %v1772_v19 = vstv %s3011_s5  ;;  %s2208_s12 = sld [smem:[#allocation9 + $0x35]]  ;;  %s3205_s5 = sld [smem:[#allocation9 + $0x3]] }
 0x144   : > { %631 = vrot.lane.b32.xlu0 %v627_v23, %s4314_s13  ;;  %787 = vrot.lane.b32.xlu1 %v783_v24, %s4222_s29  ;;  %s2940_s29 = sld [smem:[#allocation9 + $0xd]]  ;;  %v869_v23 = vmul.f32 %v868_v18, %v2909_v26 }
 0x148   : > { %645 = vrot.lane.b32.xlu0 %v641_v28, %s4314_s13  ;;  %845 = vrot.lane.b32.xlu1 %v841_v29, %s4316_s10 }
 0x14a   : > { %4317 = sst [smem:[#allocation29_spill]] %s2940_s29  ;;  %v696_v43 = vstv %s2940_s29  ;;  %s2982_s29 = sld [smem:[#allocation9 + $0x12]] }
 0x14b   : > { %v697_v44 = vmul.f32 %v696_v43, %v609_v16 }
 0x14c   : > { %659 = vrot.lane.b32.xlu0 %v655_v31, %s4314_s13  ;;  %901 = vrot.lane.b32.xlu1 %v897_v32, %s4318_s14  ;;  %v1180_v32 = vstv %s3027_s0  ;;  %s3398_s0 = sld [smem:[#allocation9 + $0x42]] }
 0x150   : > { %673 = vrot.lane.b32.xlu0 %v669_v36, %s4314_s13  ;;  %1581 = vrot.lane.b32.xlu1 %v1577_v38, %s4316_s10  ;;  %4324 = sst [smem:[#allocation34_spill]] %s2982_s29  ;;  %v768_v57 = vstv %s2982_s29  ;;  %s3018_s29 = sld [smem:[#allocation9 + $0x1a]]  ;;  %v3056_v38 = vld [vmem:[#allocation4 + $0x4] sm:$0xff] }
 0x151   : > { %v769_v61 = vmul.f32 %v768_v57, %v2894_v21 }
 0x154   : > { %687 = vrot.lane.b32.xlu0 %v683_v41, %s4234_s2  ;;  %1637 = vrot.lane.b32.xlu1 %v1633_v42, %s4318_s14 }
 0x156   : > { %4329 = sst [smem:[#allocation38_spill]] %s3018_s29  ;;  %v882_v28 = vstv %s3018_s29  ;;  %s4330_s29 = smov 124  }
 0x157   : > { %v883_v31 = vmul.f32 %v882_v28, %v2909_v26 }
 0x158   : > { %701 = vrot.lane.b32.xlu0 %v697_v44, %s4234_s2  ;;  %s2989_s2 = sld [smem:[#allocation9 + $0x15]]  ;;  %v1194_v44 = vstv %s2205_s9  ;;  %s3324_s9 = sld [smem:[#allocation9 + $0x36]] }
 0x15c   : > { %717 = vrot.lane.b32.xlu0 %v713_v46, %s4323_s21 }
 0x15e   : > { %4325 = sst [smem:[#allocation35_spill]] %s2989_s2  ;;  %v812_v62 = vstv %s2989_s2  ;;  %s3033_s2 = sld [smem:[#allocation9 + $0x21]] }
 0x15f   : > { %v813_v4 = vmul.f32 %v812_v62, %v2909_v26 }
 0x160   : > { %731 = vrot.lane.b32.xlu0 %v727_v48, %s4323_s21  ;;  %v964_v48 = vstv %s3045_s1  ;;  %s3473_s1 = sld [smem:[#allocation9 + $0x4d]] }
 0x164   : > { %745 = vrot.lane.b32.xlu0 %v741_v51, %s4326_s20  ;;  %v950_v41 = vstv %s3033_s2  ;;  %v965_v51 = vmul.f32 %v964_v48, %v3056_v38  ;;  %s3458_s2 = sld [smem:[#allocation9 + $0x4a]] }
 0x165   : > { %v951_v42 = vmul.f32 %v950_v41, %v3056_v38 }
 0x166   : > { %v406_v55 = vpop.permute.xlu1 %405 }
 0x167   : > { %408 = vst.msk [vmem:[#allocation4 + $0x24] sm:$0x1] %vm301_vm3, %v406_v55  ;;  %v1236_v55 = vstv %s2208_s12  ;;  %s3190_s12 = sld [smem:[#allocation9 + $0x23]] }
 0x168   : > { %759 = vrot.lane.b32.xlu0 %v755_v56, %s4326_s20 }
 0x16a   : > { %v428_v58 = vpop.permute.xlu1 %427  ;;  %v472_v59 = vpop.permute.xlu0 %471 }
 0x16b   : > { %430 = vst.msk [vmem:[#allocation4 + $0x25] sm:$0x1] %vm301_vm3, %v428_v58  ;;  %474 = vst.msk [vmem:[#allocation4 + $0x27] sm:$0x1] %vm301_vm3, %v472_v59  ;;  %v1181_v58 = vmul.f32 %v1180_v32, %v2803_v53  ;;  %v1195_v59 = vmul.f32 %v1194_v44, %v2803_v53 }
 0x16c   : > { %773 = vrot.lane.b32.xlu0 %v769_v61, %s4326_s20 }
 0x16e   : > { %v450_v50 = vpop.permute.xlu1 %449 }
 0x16f   : > { %452 = vst.msk [vmem:[#allocation4 + $0x26] sm:$0x1] %vm301_vm3, %v450_v50 }
 0x170   : > { %817 = vrot.lane.b32.xlu0 %v813_v4, %s4316_s10  ;;  %v1237_v4 = vmul.f32 %v1236_v55, %v2803_v53 }
 0x172   : > { %v3025_v14 = vld [vmem:[#allocation4 + $0x1e] sm:$0xff] }
 0x173   : > { %v1717_v16 = vmul.f32 %v1716_v8, %v3025_v14  ;;  %v1773_v24 = vmul.f32 %v1772_v19, %v3025_v14 }
 0x174   : > { %831 = vrot.lane.b32.xlu0 %v827_v13, %s4316_s10 }
 0x175   : > { %1721 = vrot.lane.b32.xlu1 %v1717_v16, %s4312_s22 }
 0x176   : > { %v3048_v29 = vld [vmem:[#allocation4 + $0x20] sm:$0xff] }
 0x177   : > { %v1182_v36 = vmul.f32 %v1180_v32, %v3048_v29  ;;  %v1196_v46 = vmul.f32 %v1194_v44, %v3048_v29  ;;  %v1238_v56 = vmul.f32 %v1236_v55, %v3048_v29  ;;  %v1266_v32 = vmul.f32 %v1264_v60, %v3048_v29 }
 0x178   : > { %873 = vrot.lane.b32.xlu0 %v869_v23, %s4318_s14  ;;  %v1210_v23 = vmul.f32 %v1208_v54, %v3048_v29 }
 0x179   : > { %1777 = vrot.lane.b32.xlu1 %v1773_v24, %s4314_s13 }
 0x17c   : > { %887 = vrot.lane.b32.xlu0 %v883_v31, %s4318_s14 }
 0x17d   : > { %1187 = vrot.lane.b32.xlu1 %v1182_v36, %s4316_s10 }
 0x180   : > { %955 = vrot.lane.b32.xlu0 %v951_v42, %s4330_s29 }
 0x181   : > { %1201 = vrot.lane.b32.xlu1 %v1196_v46, %s4316_s10 }
 0x184   : > { %969 = vrot.lane.b32.xlu0 %v965_v51, %s4330_s29 }
 0x185   : > { %1243 = vrot.lane.b32.xlu1 %v1238_v56, %s4318_s14 }
 0x188   : > { %1185 = vrot.lane.b32.xlu0 %v1181_v58, %s4316_s10 }
 0x18c   : > { %1199 = vrot.lane.b32.xlu0 %v1195_v59, %s4316_s10 }
 0x18e   : > { %v494_v61 = vpop.permute.xlu1 %493  ;;  %v516_v50 = vpop.permute.xlu0 %515 }
 0x18f   : > { %496 = vst.msk [vmem:[#allocation4 + $0x28] sm:$0x1] %vm301_vm3, %v494_v61  ;;  %518 = vst.msk [vmem:[#allocation4 + $0x29] sm:$0x1] %vm301_vm3, %v516_v50 }
 0x190   : > { %1241 = vrot.lane.b32.xlu0 %v1237_v4, %s4318_s14 }
 0x192   : > { %v538_v13 = vpop.permute.xlu1 %537  ;;  %v395_v16 = vpop.permute.xlu0 %394 }
 0x193   : > { %540 = vst.msk [vmem:[#allocation4 + $0x2a] sm:$0x1] %vm301_vm3, %v538_v13  ;;  %397 = vst.msk [vmem:[#allocation4 + $0xc] sm:$0x1] %vm301_vm3, %v395_v16 }
 0x194   : > { %1215 = vrot.lane.b32.xlu0 %v1210_v23, %s4316_s10 }
 0x196   : > { %v461_v24 = vpop.permute.xlu1 %460  ;;  %v417_v31 = vpop.permute.xlu0 %416  ;;  %v3093_v36 = vld [vmem:[#allocation4 + $0x22] sm:$0xff] }
 0x197   : > { %463 = vst.msk [vmem:[#allocation4 + $0xf] sm:$0x1] %vm301_vm3, %v461_v24  ;;  %419 = vst.msk [vmem:[#allocation4 + $0xd] sm:$0x1] %vm301_vm3, %v417_v31  ;;  %v1350_v44 = vmul.f32 %v1348_v3, %v3093_v36  ;;  %v1406_v46 = vmul.f32 %v1404_v6, %v3093_v36 }
 0x198   : > { %1271 = vrot.lane.b32.xlu0 %v1266_v32, %s4318_s14 }
 0x19a   : > { %v505_v54 = vpop.permute.xlu1 %504  ;;  %v439_v42 = vpop.permute.xlu0 %438  ;;  %v3106_v51 = vld [vmem:[#allocation4 + $0x23] sm:$0xff] }
 0x19b   : > { %507 = vst.msk [vmem:[#allocation4 + $0x11] sm:$0x1] %vm301_vm3, %v505_v54  ;;  %441 = vst.msk [vmem:[#allocation4 + $0xe] sm:$0x1] %vm301_vm3, %v439_v42  ;;  %v1464_v55 = vmul.f32 %v1462_v12, %v3106_v51  ;;  %v1520_v59 = vmul.f32 %v1518_v15, %v3106_v51  ;;  %v3128_v61 = vld [vmem:[#allocation4 + $0x24] sm:$0xff] }
 0x19c   : > { %1355 = vrot.lane.b32.xlu0 %v1350_v44, %s4312_s22  ;;  %v1578_v4 = vmul.f32 %v1576_v35, %v3128_v61  ;;  %v1634_v23 = vmul.f32 %v1632_v40, %v3128_v61  ;;  %v3153_v35 = vld [vmem:[#allocation4 + $0x26] sm:$0xff] }
 0x19d   : > { %v1718_v31 = vmul.f32 %v1716_v8, %v3153_v35  ;;  %v1774_v40 = vmul.f32 %v1772_v19, %v3153_v35 }
 0x19e   : > { %v483_v60 = vpop.permute.xlu0 %482  ;;  %v3130_v50 = vpop.permute.xlu1 %1213 }
 0x19f   : > { %485 = vst.msk [vmem:[#allocation4 + $0x10] sm:$0x1] %vm301_vm3, %v483_v60 }
 0x1a0   : > { %1411 = vrot.lane.b32.xlu0 %v1406_v46, %s4314_s13 }
 0x1a2   : > { %v527_v3 = vpop.permute.xlu0 %526  ;;  %v3112_v56 = vld [vmem:[#allocation4 + $0x8] sm:$0xff]  ;;  %v3144_v13 = vpop.permute.xlu1 %1269 }
 0x1a3   : > { %529 = vst.msk [vmem:[#allocation4 + $0x12] sm:$0x1] %vm301_vm3, %v527_v3  ;;  %v570_v58 = vmul.f32 %v568_v1, %v3112_v56  ;;  %v584_v12 = vmul.f32 %v582_v5, %v3112_v56  ;;  %v598_v15 = vmul.f32 %v596_v9, %v3112_v56 }
 0x1a4   : > { %1469 = vrot.lane.b32.xlu0 %v1464_v55, %s4323_s21 }
 0x1a5   : > { %575 = vrot.lane.b32.xlu1 %v570_v58, %s4330_s29 }
 0x1a6   : > { %v3120_v6 = vpop.permute.xlu0 %573  ;;  %v610_v5 = vld [vmem:[#allocation4 + $0x9] sm:$0xff]  ;;  %v3162_v54 = vpop.permute.xlu1 %1353 }
 0x1a7   : > { %4331 = vst [vmem:[#allocation39_spill] sm:$0xff] %v3120_v6  ;;  %v614_v24 = vmul.f32 %v612_v17, %v610_v5  ;;  %v628_v32 = vmul.f32 %v626_v20, %v610_v5  ;;  %v642_v42 = vmul.f32 %v640_v25, %v610_v5  ;;  %v3173_v44 = vld [vmem:[#allocation4 + $0xa] sm:$0xff]  ;;  %v656_v46 = vmul.f32 %v654_v30, %v610_v5 }
 0x1a8   : > { %1525 = vrot.lane.b32.xlu0 %v1520_v59, %s4326_s20  ;;  %v784_v60 = vmul.f32 %v782_v22, %v3173_v44  ;;  %v670_v55 = vmul.f32 %v668_v33, %v610_v5  ;;  %v980_v59 = vstv %s3190_s12  ;;  %s3413_s12 = sld [smem:[#allocation9 + $0x45]] }
 0x1a9   : > { %589 = vrot.lane.b32.xlu1 %v584_v12, %s4330_s29 }
 0x1aa   : > { %v3134_v1 = vpop.permute.xlu0 %587  ;;  %v3177_v20 = vpop.permute.xlu1 %1409  ;;  %v3186_v19 = vld [vmem:[#allocation4 + $0xb] sm:$0xff] }
 0x1ab   : > { %v842_v3 = vmul.f32 %v840_v27, %v3186_v19  ;;  %v898_v58 = vmul.f32 %v896_v11, %v3186_v19  ;;  %v684_v27 = vmul.f32 %v682_v39, %v610_v5  ;;  %v3212_v33 = vld [vmem:[#allocation4 + $0xd] sm:$0xff]  ;;  %v698_v11 = vmul.f32 %v696_v43, %v610_v5 }
 0x1ac   : > { %1583 = vrot.lane.b32.xlu0 %v1578_v4, %s4316_s10  ;;  %v1036_v39 = vstv %s3203_s3  ;;  %s3428_s3 = sld [smem:[#allocation9 + $0x46]] }
 0x1ad   : > { %603 = vrot.lane.b32.xlu1 %v598_v15, %s4330_s29  ;;  %v982_v15 = vmul.f32 %v980_v59, %v3212_v33 }
 0x1ae   : > { %v3146_v16 = vpop.permute.xlu0 %601  ;;  %v3199_v22 = vpop.permute.xlu1 %1467  ;;  %v4361_v6 = vstv %s3413_s12 }
 0x1b0   : > { %1639 = vrot.lane.b32.xlu0 %v1634_v23, %s4318_s14  ;;  %v4252_v23 = vstv %s3205_s5 }
 0x1b1   : > { %619 = vrot.lane.b32.xlu1 %v614_v24, %s4312_s22  ;;  %v563_v5 = vmul.f32 %v4252_v23, %v2832_v63  ;;  %v1122_v23 = vstv %s3296_s15  ;;  %s3546_s15 = sld [smem:[#allocation9 + $0x5a]] }
 0x1b2   : > { %v618_v9 = vpop.permute.xlu0 %617  ;;  %v3219_v12 = vpop.permute.xlu1 %1523 }
 0x1b4   : > { %1723 = vrot.lane.b32.xlu0 %v1718_v31, %s4312_s22  ;;  %v1038_v31 = vmul.f32 %v1036_v39, %v3212_v33 }
 0x1b5   : > { %633 = vrot.lane.b32.xlu1 %v628_v32, %s4314_s13  ;;  %v714_v32 = vmul.f32 %v712_v45, %v3173_v44 }
 0x1b6   : > { %v3166_v17 = vpop.permute.xlu0 %631  ;;  %v788_v43 = vpop.permute.xlu1 %787 }
 0x1b7   : > { %4332 = vst [vmem:[#allocation40_spill] sm:$0xff] %v3166_v17 }
 0x1b8   : > { %1779 = vrot.lane.b32.xlu0 %v1774_v40, %s4314_s13  ;;  %v3238_v40 = vld [vmem:[#allocation4 + $0xe] sm:$0xff] }
 0x1b9   : > { %647 = vrot.lane.b32.xlu1 %v642_v42, %s4314_s13  ;;  %4341 = vst [vmem:[#allocation42_spill] sm:$0xff] %v3238_v40  ;;  %v1094_v42 = vstv %s3217_s24  ;;  %s3443_s24 = sld [smem:[#allocation9 + $0x49]] }
 0x1ba   : > { %v3179_v8 = vpop.permute.xlu0 %645  ;;  %v1096_v45 = vmul.f32 %v1094_v42, %v3238_v40 }
 0x1bc   : > { %789 = vrot.lane.b32.xlu0 %v784_v60, %s4326_s20 }
 0x1bd   : > { %661 = vrot.lane.b32.xlu1 %v656_v46, %s4314_s13  ;;  %v623_v46 = vadd.f32 %v618_v9, %v563_v5  ;;  %v742_v9 = vmul.f32 %v740_v49, %v3173_v44 }
 0x1be   : > { %v3192_v25 = vpop.permute.xlu0 %659 }
 0x1c0   : > { %847 = vrot.lane.b32.xlu0 %v842_v3, %s4316_s10  ;;  %v728_v3 = vmul.f32 %v726_v47, %v3173_v44  ;;  %v3265_v47 = vld [vmem:[#allocation4 + $0x5] sm:$0xff] }
 0x1c1   : > { %675 = vrot.lane.b32.xlu1 %v670_v55, %s4314_s13 }
 0x1c2   : > { %v674_v30 = vpop.permute.xlu0 %673 }
 0x1c3   : > { %v679_v55 = vadd.f32 %v674_v30, %v623_v46 }
 0x1c4   : > { %903 = vrot.lane.b32.xlu0 %v898_v58, %s4318_s14  ;;  %v1150_v58 = vstv %s3229_s16  ;;  %s3621_s16 = sld [smem:[#allocation9 + $0x18]] }
 0x1c5   : > { %689 = vrot.lane.b32.xlu1 %v684_v27, %s4338_s19  ;;  %v846_v27 = vpop.permute.xlu1 %845 }
 0x1c6   : > { %v3221_v4 = vpop.permute.xlu0 %687 }
 0x1c7   : > { %4339 = vst [vmem:[#allocation41_spill] sm:$0xff] %v3221_v4  ;;  %v4360_v4 = vstv %s3398_s0 }
 0x1c8   : > { %987 = vrot.lane.b32.xlu0 %v982_v15, %s4312_s22  ;;  %v1392_v17 = vmul.f32 %v4360_v4, %v3093_v36 }
 0x1c9   : > { %703 = vrot.lane.b32.xlu1 %v698_v11, %s4338_s19  ;;  %v1152_v11 = vmul.f32 %v1150_v58, %v3238_v40 }
 0x1ca   : > { %v3232_v24 = vpop.permute.xlu0 %701 }
 0x1cc   : > { %1043 = vrot.lane.b32.xlu0 %v1038_v31, %s4314_s13 }
 0x1cd   : > { %719 = vrot.lane.b32.xlu1 %v714_v32, %s4323_s21  ;;  %v1008_v32 = vstv %s3240_s6  ;;  %s3486_s6 = sld [smem:[#allocation9 + $0x4e]] }
 0x1ce   : > { %v3248_v60 = vpop.permute.xlu0 %717  ;;  %v1009_v49 = vmul.f32 %v1008_v32, %v3265_v47 }
 0x1d0   : > { %1101 = vrot.lane.b32.xlu0 %v1096_v45, %s4323_s21  ;;  %v4251_v45 = vstv %s3251_s28 }
 0x1d1   : > { %733 = vrot.lane.b32.xlu1 %v728_v3, %s4323_s21  ;;  %v981_v3 = vmul.f32 %v980_v59, %v3265_v47 }
 0x1d2   : > { %v732_v15 = vpop.permute.xlu0 %731 }
 0x1d3   : > { %v737_v31 = vadd.f32 %v732_v15, %v679_v55  ;;  %v1022_v55 = vstv %s3256_s18  ;;  %v931_v15 = vmul.f32 %v4251_v45, %v3056_v38  ;;  %s3501_s18 = sld [smem:[#allocation9 + $0x51]] }
 0x1d4   : > { %1157 = vrot.lane.b32.xlu0 %v1152_v11, %s4326_s20  ;;  %v1023_v59 = vmul.f32 %v1022_v55, %v3265_v47 }
 0x1d5   : > { %v793_v30 = vadd.f32 %v788_v43, %v737_v31  ;;  %747 = vrot.lane.b32.xlu1 %v742_v9, %s4326_s20  ;;  %v902_v43 = vpop.permute.xlu1 %901  ;;  %v1037_v31 = vmul.f32 %v1036_v39, %v3265_v47  ;;  %v1064_v9 = vstv %s3268_s30  ;;  %s3516_s30 = sld [smem:[#allocation9 + $0x52]] }
 0x1d6   : > { %v3274_v5 = vpop.permute.xlu0 %745 }
 0x1d7   : > { %4343 = vst [vmem:[#allocation43_spill] sm:$0xff] %v3274_v5  ;;  %v851_v46 = vadd.f32 %v846_v27, %v793_v30 }
 0x1d8   : > { %1013 = vrot.lane.b32.xlu0 %v1009_v49, %s4314_s13  ;;  %v4250_v49 = vstv %s3270_s4 }
 0x1d9   : > { %985 = vrot.lane.b32.xlu1 %v981_v3, %s4312_s22  ;;  %v907_v27 = vadd.f32 %v902_v43, %v851_v46  ;;  %v3302_v3 = vld [vmem:[#allocation4 + $0x6] sm:$0xff]  ;;  %v1065_v43 = vmul.f32 %v1064_v9, %v3265_v47  ;;  %v551_v39 = vmul.f32 %v4250_v49, %v2832_v63  ;;  %s3313_s22 = sld [smem:[#allocation9 + $0x2e]] }
 0x1da   : > { %v760_v11 = vpop.permute.xlu0 %759  ;;  %4344 = vst [vmem:[#allocation44_spill] sm:$0xff] %v3302_v3  ;;  %v1151_v45 = vmul.f32 %v1150_v58, %v3302_v3 }
 0x1db   : > { %v3298_v30 = vadd.f32 %v931_v15, %v907_v27  ;;  %v1095_v15 = vmul.f32 %v1094_v42, %v3302_v3  ;;  %v1080_v27 = vstv %s3282_s7  ;;  %v557_v42 = vmul.f32 %v4255_v0, %v2832_v63  ;;  %s3531_s7 = sld [smem:[#allocation9 + $0x59]] }
 0x1dc   : > { %1027 = vrot.lane.b32.xlu0 %v1023_v59, %s4314_s13  ;;  %v593_v59 = vadd.f32 %v3134_v1, %v551_v39  ;;  %v1081_v49 = vmul.f32 %v1080_v27, %v3302_v3  ;;  %v1123_v63 = vmul.f32 %v1122_v23, %v3302_v3  ;;  %v1024_v0 = vmul.f32 %v1022_v55, %v3212_v33 }
 0x1dd   : > { %1041 = vrot.lane.b32.xlu1 %v1037_v31, %s4314_s13  ;;  %v607_v1 = vadd.f32 %v3146_v16, %v557_v42  ;;  %v4254_v16 = vstv %s3317_s25  ;;  %v1066_v55 = vmul.f32 %v1064_v9, %v3212_v33  ;;  %v4261_v9 = vstv %s3486_s6 }
 0x1de   : > { %v774_v46 = vpop.permute.xlu0 %773 }
 0x1e0   : > { %1069 = vrot.lane.b32.xlu0 %v1065_v43, %s4338_s19  ;;  %v651_v43 = vadd.f32 %v3179_v8, %v593_v59  ;;  %v665_v8 = vadd.f32 %v3192_v25, %v607_v1  ;;  %v1136_v59 = vstv %s3313_s22  ;;  %v770_v1 = vmul.f32 %v768_v57, %v3173_v44  ;;  %s3563_s22 = sld [smem:[#allocation9 + $0x5d]] }
 0x1e1   : > { %1099 = vrot.lane.b32.xlu1 %v1095_v15, %s4323_s21  ;;  %v1137_v25 = vmul.f32 %v1136_v59, %v3302_v3 }
 0x1e2   : > { %v818_v31 = vpop.permute.xlu0 %817  ;;  %v707_v39 = vadd.f32 %v3232_v24, %v651_v43  ;;  %v723_v24 = vadd.f32 %v3248_v60, %v665_v8  ;;  %v919_v60 = vmul.f32 %v4254_v16, %v3056_v38 }
 0x1e4   : > { %1085 = vrot.lane.b32.xlu0 %v1081_v49, %s4323_s21  ;;  %v765_v58 = vadd.f32 %v760_v11, %v707_v39  ;;  %v756_v49 = vmul.f32 %v754_v52, %v3173_v44  ;;  %v1250_v11 = vstv %s3324_s9  ;;  %v779_v52 = vadd.f32 %v774_v46, %v723_v24  ;;  %s3578_s9 = sld [smem:[#allocation9 + $0x5e]] }
 0x1e5   : > { %1155 = vrot.lane.b32.xlu1 %v1151_v45, %s4326_s20  ;;  %v1251_v57 = vmul.f32 %v1250_v11, %v2803_v53  ;;  %v1318_v24 = vstv %s3346_s26  ;;  %s3593_s26 = sld [smem:[#allocation9 + $0x61]] }
 0x1e6   : > { %v832_v15 = vpop.permute.xlu0 %831  ;;  %v823_v45 = vadd.f32 %v818_v31, %v765_v58  ;;  %v4253_v31 = vstv %s3333_s11  ;;  %v814_v58 = vmul.f32 %v812_v62, %v3186_v19 }
 0x1e7   : > { %v837_v39 = vadd.f32 %v832_v15, %v779_v52  ;;  %v925_v15 = vmul.f32 %v4253_v31, %v3056_v38  ;;  %v4265_v52 = vstv %s3362_s17  ;;  %v4256_v31 = vstv %s3428_s3  ;;  %s3608_s17 = sld [smem:[#allocation9 + $0x14]] }
 0x1e8   : > { %1127 = vrot.lane.b32.xlu0 %v1123_v63, %s4326_s20 }
 0x1e9   : > { %761 = vrot.lane.b32.xlu1 %v756_v49, %s4326_s20  ;;  %v3375_v49 = vld [vmem:[#allocation4 + $0x19] sm:$0xff] }
 0x1ea   : > { %v874_v42 = vpop.permute.xlu0 %873  ;;  %v4272_v5 = vstv %s3578_s9 }
 0x1eb   : > { %v879_v43 = vadd.f32 %v874_v42, %v823_v45  ;;  %v3384_v45 = vpop.permute.xlu1 %1581  ;;  %v1319_v42 = vmul.f32 %v1318_v24, %v3375_v49 }
 0x1ec   : > { %1141 = vrot.lane.b32.xlu0 %v1137_v25, %s4326_s20  ;;  %v828_v25 = vmul.f32 %v826_v7, %v3186_v19  ;;  %v870_v7 = vmul.f32 %v868_v18, %v3186_v19  ;;  %v884_v18 = vmul.f32 %v882_v28, %v3186_v19 }
 0x1ed   : > { %775 = vrot.lane.b32.xlu1 %v770_v1, %s4326_s20  ;;  %v3367_v63 = vadd.f32 %v919_v60, %v879_v43  ;;  %v1333_v1 = vmul.f32 %v4265_v52, %v3375_v49  ;;  %v4267_v52 = vstv %s3531_s7 }
 0x1ee   : > { %v888_v46 = vpop.permute.xlu0 %887 }
 0x1ef   : > { %v893_v8 = vadd.f32 %v888_v46, %v837_v39  ;;  %v3407_v60 = vpop.permute.xlu1 %1637  ;;  %v4264_v39 = vstv %s3381_s23 }
 0x1f0   : > { %1255 = vrot.lane.b32.xlu0 %v1251_v57, %s4318_s14  ;;  %v1377_v57 = vmul.f32 %v4264_v39, %v2835_v2  ;;  %v3560_v39 = vld [vmem:[#allocation4 + $0x1d] sm:$0xff] }
 0x1f1   : > { %819 = vrot.lane.b32.xlu1 %v814_v58, %s4316_s10  ;;  %v3387_v53 = vadd.f32 %v925_v15, %v893_v8  ;;  %v4262_v58 = vstv %s3398_s0  ;;  %v3431_v15 = vld [vmem:[#allocation4 + $0xc] sm:$0xff]  ;;  %s2544_s0 = smov 122  }
 0x1f2   : > { %v3389_v62 = vpop.permute.xlu0 %955  ;;  %v952_v28 = vmul.f32 %v950_v41, %v3431_v15  ;;  %v966_v41 = vmul.f32 %v964_v48, %v3431_v15  ;;  %v4257_v48 = vstv %s3443_s24 }
 0x1f3   : > { %v3422_v8 = vpop.permute.xlu1 %1721 }
 0x1f4   : > { %1323 = vrot.lane.b32.xlu0 %v1319_v42, %s4330_s29 }
 0x1f5   : > { %833 = vrot.lane.b32.xlu1 %v828_v25, %s4316_s10  ;;  %v1391_v25 = vmul.f32 %v4262_v58, %v2835_v2  ;;  %v1138_v58 = vmul.f32 %v1136_v59, %v3238_v40  ;;  %v1252_v59 = vmul.f32 %v1250_v11, %v3048_v29 }
 0x1f6   : > { %v3402_v43 = vpop.permute.xlu0 %969 }
 0x1f8   : > { %1337 = vrot.lane.b32.xlu0 %v1333_v1, %s4330_s29  ;;  %v4258_v1 = vstv %s3413_s12  ;;  %s3827_s12 = sld [smem:[#allocation9 + $0x3c]] }
 0x1f9   : > { %875 = vrot.lane.b32.xlu1 %v870_v7, %s4318_s14  ;;  %v3446_v7 = vpop.permute.xlu1 %1777 }
 0x1fa   : > { %v3417_v46 = vpop.permute.xlu0 %1185 }
 0x1fc   : > { %1381 = vrot.lane.b32.xlu0 %v1377_v57, %s4314_s13 }
 0x1fd   : > { %889 = vrot.lane.b32.xlu1 %v884_v18, %s4318_s14  ;;  %v1433_v18 = vmul.f32 %v4258_v1, %v2835_v2  ;;  %v3467_v16 = vpop.permute.xlu1 %1187  ;;  %v1010_v2 = vmul.f32 %v1008_v32, %v3212_v33 }
 0x1fe   : > { %v3434_v42 = vpop.permute.xlu0 %1199  ;;  %4351 = vst [vmem:[#allocation45_spill] sm:$0xff] %v3467_v16 }
 0x200   : > { %1395 = vrot.lane.b32.xlu0 %v1391_v25, %s4314_s13 }
 0x201   : > { %957 = vrot.lane.b32.xlu1 %v952_v28, %s4330_s29  ;;  %v1449_v28 = vmul.f32 %v4256_v31, %v2865_v10  ;;  %v4260_v31 = vstv %s3458_s2  ;;  %v3489_v32 = vpop.permute.xlu1 %1201 }
 0x202   : > { %v3449_v57 = vpop.permute.xlu0 %1241  ;;  %4352 = vst [vmem:[#allocation46_spill] sm:$0xff] %v3489_v32  ;;  %v1434_v32 = vmul.f32 %v4361_v6, %v3093_v36  ;;  %v4275_v6 = vstv %s3621_s16 }
 0x204   : > { %1437 = vrot.lane.b32.xlu0 %v1433_v18, %s4338_s19 }
 0x205   : > { %971 = vrot.lane.b32.xlu1 %v966_v41, %s4330_s29  ;;  %v1491_v41 = vmul.f32 %v4257_v48, %v2865_v10  ;;  %v4259_v48 = vstv %s3473_s1  ;;  %v3510_v1 = vpop.permute.xlu1 %1243 }
 0x206   : > { %v3462_v25 = vpop.permute.xlu0 %1215  ;;  %4353 = vst [vmem:[#allocation47_spill] sm:$0xff] %v3510_v1  ;;  %v4273_v1 = vstv %s3608_s17 }
 0x208   : > { %1453 = vrot.lane.b32.xlu0 %v1449_v28, %s4323_s21 }
 0x209   : > { %1015 = vrot.lane.b32.xlu1 %v1010_v2, %s4314_s13  ;;  %v1505_v2 = vmul.f32 %v4260_v31, %v2865_v10  ;;  %v1082_v10 = vmul.f32 %v1080_v27, %v3238_v40  ;;  %v1124_v27 = vmul.f32 %v1122_v23, %v3238_v40  ;;  %v4263_v31 = vstv %s3501_s18 }
 0x20a   : > { %v3477_v18 = vpop.permute.xlu0 %1271  ;;  %v4266_v23 = vstv %s3516_s30 }
 0x20c   : > { %1495 = vrot.lane.b32.xlu0 %v1491_v41, %s4326_s20 }
 0x20d   : > { %1029 = vrot.lane.b32.xlu1 %v1024_v0, %s4314_s13  ;;  %v1549_v0 = vmul.f32 %v4259_v48, %v2937_v34 }
 0x20e   : > { %v3492_v28 = vpop.permute.xlu0 %1355 }
 0x210   : > { %1509 = vrot.lane.b32.xlu0 %v1505_v2, %s4326_s20 }
 0x211   : > { %1071 = vrot.lane.b32.xlu1 %v1066_v55, %s4338_s19  ;;  %v1563_v55 = vmul.f32 %v4261_v9, %v2937_v34 }
 0x212   : > { %v3505_v41 = vpop.permute.xlu0 %1411 }
 0x214   : > { %1553 = vrot.lane.b32.xlu0 %v1549_v0, %s4316_s10 }
 0x215   : > { %1087 = vrot.lane.b32.xlu1 %v1082_v10, %s4323_s21  ;;  %v1605_v10 = vmul.f32 %v4263_v31, %v2937_v34 }
 0x216   : > { %v3520_v2 = vpop.permute.xlu0 %1469 }
 0x217   : > { %v3525_v48 = vpop.permute.xlu1 %575 }
 0x218   : > { %4354 = vst [vmem:[#allocation48_spill] sm:$0xff] %v3525_v48  ;;  %1567 = vrot.lane.b32.xlu0 %v1563_v55, %s4316_s10  ;;  %v4271_v48 = vstv %s3563_s22 }
 0x219   : > { %1129 = vrot.lane.b32.xlu1 %v1124_v27, %s4326_s20  ;;  %v1619_v27 = vmul.f32 %v4266_v23, %v2937_v34  ;;  %v4270_v23 = vstv %s3546_s15 }
 0x21a   : > { %v3535_v0 = vpop.permute.xlu0 %1525 }
 0x21b   : > { %v3540_v9 = vpop.permute.xlu1 %589 }
 0x21c   : > { %1609 = vrot.lane.b32.xlu0 %v1605_v10, %s4318_s14  ;;  %v1687_v10 = vmul.f32 %v4267_v52, %v3560_v39 }
 0x21d   : > { %1143 = vrot.lane.b32.xlu1 %v1138_v58, %s4326_s20  ;;  %v3566_v58 = vld [vmem:[#allocation4 + $0x21] sm:$0xff] }
 0x21e   : > { %v3550_v55 = vpop.permute.xlu0 %1583  ;;  %v1320_v11 = vmul.f32 %v1318_v24, %v3566_v58  ;;  %v1334_v24 = vmul.f32 %v4357_v37, %v3566_v58 }
 0x21f   : > { %v3555_v31 = vpop.permute.xlu1 %603 }
 0x220   : > { %1623 = vrot.lane.b32.xlu0 %v1619_v27, %s4318_s14 }
 0x221   : > { %1257 = vrot.lane.b32.xlu1 %v1252_v59, %s4318_s14  ;;  %v1701_v59 = vmul.f32 %v4270_v23, %v3560_v39 }
 0x222   : > { %v3569_v34 = vpop.permute.xlu0 %1639 }
 0x223   : > { %v620_v29 = vpop.permute.xlu1 %619 }
 0x224   : > { %1691 = vrot.lane.b32.xlu0 %v1687_v10, %s4330_s29 }
 0x225   : > { %1325 = vrot.lane.b32.xlu1 %v1320_v11, %s4330_s29  ;;  %v1745_v11 = vmul.f32 %v4271_v48, %v3025_v14 }
 0x226   : > { %v3582_v27 = vpop.permute.xlu0 %1723 }
 0x227   : > { %4355 = vst [vmem:[#allocation49_spill] sm:$0xff] %v3582_v27  ;;  %v3587_v52 = vpop.permute.xlu1 %633 }
 0x228   : > { %4356 = vst [vmem:[#allocation50_spill] sm:$0xff] %v3587_v52  ;;  %1705 = vrot.lane.b32.xlu0 %v1701_v59, %s4330_s29  ;;  %v4359_v52 = vstv %s3381_s23  ;;  %s3632_s23 = sld [smem:[#allocation9 + $0x20]] }
 0x229   : > { %1339 = vrot.lane.b32.xlu1 %v1334_v24, %s4330_s29  ;;  %v1378_v37 = vmul.f32 %v4359_v52, %v3093_v36  ;;  %v1759_v24 = vmul.f32 %v4272_v5, %v3025_v14  ;;  %v4274_v52 = vstv %s3593_s26 }
 0x22a   : > { %v3597_v10 = vpop.permute.xlu0 %1779 }
 0x22b   : > { %4358 = vst [vmem:[#allocation51_spill] sm:$0xff] %v3597_v10  ;;  %v3602_v23 = vpop.permute.xlu1 %647 }
 0x22c   : > { %1749 = vrot.lane.b32.xlu0 %v1745_v11, %s4314_s13 }
 0x22d   : > { %1383 = vrot.lane.b32.xlu1 %v1378_v37, %s4314_s13  ;;  %v1801_v37 = vmul.f32 %v4274_v52, %v3025_v14 }
 0x22e   : > { %v790_v59 = vpop.permute.xlu0 %789  ;;  %v4280_v52 = vstv %s3632_s23 }
 0x22f   : > { %v3615_v48 = vpop.permute.xlu1 %661  ;;  %v937_v16 = vmul.f32 %v4280_v52, %v3056_v38  ;;  %v4367_v52 = vstv %s3473_s1  ;;  %s3851_s1 = sld [smem:[#allocation9 + $0x48]] }
 0x230   : > { %1763 = vrot.lane.b32.xlu0 %v1759_v24, %s4314_s13  ;;  %v4363_v24 = vstv %s3428_s3  ;;  %v1550_v10 = vmul.f32 %v4367_v52, %v3128_v61  ;;  %s3834_s3 = sld [smem:[#allocation9 + $0x40]] }
 0x231   : > { %1397 = vrot.lane.b32.xlu1 %v1392_v17, %s4314_s13  ;;  %v797_v17 = vmul.f32 %v4273_v1, %v2894_v21  ;;  %v1450_v36 = vmul.f32 %v4363_v24, %v3106_v51  ;;  %v855_v21 = vmul.f32 %v4275_v6, %v2909_v26  ;;  %v4364_v1 = vstv %s3443_s24  ;;  %s3840_s24 = sld [smem:[#allocation9 + $0x44]] }
 0x232   : > { %v848_v11 = vpop.permute.xlu0 %847  ;;  %v1492_v24 = vmul.f32 %v4364_v1, %v3106_v51  ;;  %v4366_v6 = vstv %s3458_s2  ;;  %v4281_v1 = vstv %s3645_s27  ;;  %s3845_s2 = sld [smem:[#allocation9 + $0x55]] }
 0x233   : > { %v676_v5 = vpop.permute.xlu1 %675  ;;  %v1506_v40 = vmul.f32 %v4366_v6, %v3106_v51  ;;  %v4369_v6 = vstv %s3251_s28  ;;  %s3742_s28 = sld [smem:[#allocation9 + $0x57]] }
 0x234   : > { %1805 = vrot.lane.b32.xlu0 %v1801_v37, %s4338_s19  ;;  %v932_v52 = vmul.f32 %v4369_v6, %v3431_v15 }
 0x235   : > { %1439 = vrot.lane.b32.xlu1 %v1434_v32, %s4338_s19 }
 0x236   : > { %v904_v4 = vpop.permute.xlu0 %903 }
 0x237   : > { %v3639_v14 = vpop.permute.xlu1 %689 }
 0x238   : > { %4362 = vst [vmem:[#allocation52_spill] sm:$0xff] %v3639_v14  ;;  %801 = vrot.lane.b32.xlu0 %v797_v17, %s2544_s0  ;;  %v4365_v17 = vstv %s3205_s5  ;;  %s3721_s5 = sld [smem:[#allocation9 + $0x3a]] }
 0x239   : > { %1455 = vrot.lane.b32.xlu1 %v1450_v36, %s4323_s21  ;;  %v564_v14 = vmul.f32 %v4365_v17, %v3112_v56  ;;  %v995_v17 = vmul.f32 %v4281_v1, %v3265_v47  ;;  %s3695_s21 = sld [smem:[#allocation9 + $0x3b]] }
 0x23a   : > { %v988_v32 = vpop.permute.xlu0 %987 }
 0x23b   : > { %v3652_v37 = vpop.permute.xlu1 %703  ;;  %v624_v3 = vadd.f32 %v620_v29, %v564_v14 }
 0x23c   : > { %859 = vrot.lane.b32.xlu0 %v855_v21, %s4318_s14 }
 0x23d   : > { %1497 = vrot.lane.b32.xlu1 %v1492_v24, %s4326_s20  ;;  %v680_v21 = vadd.f32 %v676_v5, %v624_v3  ;;  %v4368_v5 = vstv %s3486_s6  ;;  %s3855_s6 = sld [smem:[#allocation9 + $0x56]] }
 0x23e   : > { %v1044_v36 = vpop.permute.xlu0 %1043  ;;  %v1564_v3 = vmul.f32 %v4368_v5, %v3128_v61 }
 0x23f   : > { %v3666_v26 = vpop.permute.xlu1 %719 }
 0x240   : > { %941 = vrot.lane.b32.xlu0 %v937_v16, %s4330_s29 }
 0x241   : > { %1511 = vrot.lane.b32.xlu1 %v1506_v40, %s4326_s20 }
 0x242   : > { %v1102_v24 = vpop.permute.xlu0 %1101 }
 0x243   : > { %v734_v38 = vpop.permute.xlu1 %733 }
 0x244   : > { %v738_v27 = vadd.f32 %v734_v38, %v680_v21  ;;  %999 = vrot.lane.b32.xlu0 %v995_v17, %s4314_s13  ;;  %v4370_v17 = vstv %s3501_s18  ;;  %s3859_s18 = sld [smem:[#allocation9 + $0x4c]] }
 0x245   : > { %1555 = vrot.lane.b32.xlu1 %v1550_v10, %s4316_s10  ;;  %v1606_v10 = vmul.f32 %v4370_v17, %v3128_v61  ;;  %v4372_v17 = vstv %s3531_s7  ;;  %s3880_s7 = sld [smem:[#allocation9 + $0x58]] }
 0x246   : > { %v794_v51 = vadd.f32 %v790_v59, %v738_v27  ;;  %v1158_v16 = vpop.permute.xlu0 %1157 }
 0x247   : > { %v3682_v40 = vpop.permute.xlu1 %747 }
 0x248   : > { %v852_v29 = vadd.f32 %v848_v11, %v794_v51  ;;  %v4371_v51 = vstv %s3516_s30  ;;  %s3866_s30 = sld [smem:[#allocation9 + $0x50]] }
 0x249   : > { %1569 = vrot.lane.b32.xlu1 %v1564_v3, %s4316_s10  ;;  %v3700_v3 = vld [vmem:[#allocation4 + $0x25] sm:$0xff]  ;;  %s3709_s10 = sld [smem:[#allocation9 + $0x39]] }
 0x24a   : > { %v908_v14 = vadd.f32 %v904_v4, %v852_v29  ;;  %v1014_v21 = vpop.permute.xlu0 %1013  ;;  %v1620_v4 = vmul.f32 %v4371_v51, %v3128_v61 }
 0x24b   : > { %v986_v38 = vpop.permute.xlu1 %985 }
 0x24c   : > { %v934_v27 = vadd.f32 %v932_v52, %v908_v14  ;;  %v991_v6 = vadd.f32 %v986_v38, %v3298_v30 }
 0x24d   : > { %1611 = vrot.lane.b32.xlu1 %v1606_v10, %s4318_s14  ;;  %v1688_v10 = vmul.f32 %v4372_v17, %v3700_v3 }
 0x24e   : > { %v992_v59 = vadd.f32 %v988_v32, %v934_v27  ;;  %v1028_v1 = vpop.permute.xlu0 %1027  ;;  %v975_v32 = vadd.f32 %v3402_v43, %v3387_v53  ;;  %v1298_v53 = vstv %s3695_s21  ;;  %s4407_s21 = smov 96  }
 0x24f   : > { %v1042_v11 = vpop.permute.xlu1 %1041 }
 0x250   : > { %v1048_v5 = vadd.f32 %v1044_v36, %v992_v59  ;;  %v1047_v61 = vadd.f32 %v1042_v11, %v991_v6  ;;  %v961_v36 = vadd.f32 %v3389_v62, %v3367_v63  ;;  %v1033_v59 = vadd.f32 %v1028_v1, %v975_v32 }
 0x251   : > { %1625 = vrot.lane.b32.xlu1 %v1620_v4, %s4318_s14 }
 0x252   : > { %v1106_v29 = vadd.f32 %v1102_v24, %v1048_v5  ;;  %v1070_v14 = vpop.permute.xlu0 %1069  ;;  %v1019_v43 = vadd.f32 %v1014_v21, %v961_v36  ;;  %v1300_v5 = vmul.f32 %v1298_v53, %v3566_v58 }
 0x253   : > { %v1100_v52 = vpop.permute.xlu1 %1099 }
 0x254   : > { %v1162_v27 = vadd.f32 %v1158_v16, %v1106_v29  ;;  %v1105_v24 = vadd.f32 %v1100_v52, %v1047_v61  ;;  %v4373_v16 = vstv %s3546_s15  ;;  %v1075_v1 = vadd.f32 %v1070_v14, %v1019_v43  ;;  %s3894_s15 = sld [smem:[#allocation9 + $0x5c]] }
 0x255   : > { %1693 = vrot.lane.b32.xlu1 %v1688_v10, %s4330_s29  ;;  %v1702_v11 = vmul.f32 %v4373_v16, %v3700_v3  ;;  %v4374_v52 = vstv %s3563_s22  ;;  %v1299_v10 = vmul.f32 %v1298_v53, %v3375_v49  ;;  %s3896_s22 = sld [smem:[#allocation9]] }
 0x256   : > { %v1220_v30 = vadd.f32 %v3462_v25, %v1162_v27  ;;  %v1086_v38 = vpop.permute.xlu0 %1085  ;;  %v1746_v17 = vmul.f32 %v4374_v52, %v3153_v35  ;;  %v1286_v27 = vstv %s3709_s10  ;;  %s4408_s10 = smov 112  }
 0x257   : > { %v1091_v51 = vadd.f32 %v1086_v38, %v1033_v59  ;;  %v1156_v4 = vpop.permute.xlu1 %1155  ;;  %v4375_v38 = vstv %s3578_s9  ;;  %s3905_s9 = sld [smem:[#allocation9 + $0x60]] }
 0x258   : > { %v1276_v63 = vadd.f32 %v3477_v18, %v1220_v30  ;;  %v1161_v62 = vadd.f32 %v1156_v4, %v1105_v24  ;;  %v1760_v43 = vmul.f32 %v4375_v38, %v3153_v35  ;;  %v1292_v4 = vstv %s3721_s5  ;;  %s4429_s5 = sld [smem:[#allocation17_spill]] }
 0x259   : > { %1707 = vrot.lane.b32.xlu1 %v1702_v11, %s4330_s29 }
 0x25a   : > { %v1302_v25 = vadd.f32 %v1300_v5, %v1276_v63  ;;  %v1219_v29 = vadd.f32 %v3130_v50, %v1161_v62  ;;  %v1128_v21 = vpop.permute.xlu0 %1127 }
 0x25b   : > { %v1133_v6 = vadd.f32 %v1128_v21, %v1075_v1  ;;  %v762_v32 = vpop.permute.xlu1 %761 }
 0x25c   : > { %v1360_v18 = vadd.f32 %v3492_v28, %v1302_v25  ;;  %v1275_v14 = vadd.f32 %v3144_v13, %v1219_v29  ;;  %v1287_v13 = vmul.f32 %v1286_v27, %v3375_v49  ;;  %v1293_v29 = vmul.f32 %v1292_v4, %v3375_v49 }
 0x25d   : > { %v1191_v61 = vadd.f32 %v3417_v46, %v1133_v6  ;;  %1751 = vrot.lane.b32.xlu1 %v1746_v17, %s4314_s13  ;;  %v4376_v46 = vstv %s3270_s4  ;;  %s3782_s4 = sld [smem:[#allocation9 + $0x28]] }
 0x25e   : > { %v1416_v50 = vadd.f32 %v3505_v41, %v1360_v18  ;;  %v1301_v36 = vadd.f32 %v1299_v10, %v1275_v14  ;;  %v1142_v59 = vpop.permute.xlu0 %1141  ;;  %v552_v41 = vmul.f32 %v4376_v46, %v3112_v56  ;;  %v4379_v10 = vstv %s3608_s17  ;;  %s4402_s17 = smov 16  }
 0x25f   : > { %v1147_v30 = vadd.f32 %v1142_v59, %v1091_v51  ;;  %v776_v24 = vpop.permute.xlu1 %775  ;;  %v1247_v28 = vadd.f32 %v3449_v57, %v1191_v61  ;;  %v1666_v14 = vstv %s3742_s28  ;;  %s4434_s28 = sld [smem:[#allocation22_spill]] }
 0x260   : > { %v1474_v53 = vadd.f32 %v3520_v2, %v1416_v50  ;;  %v1359_v51 = vadd.f32 %v3162_v54, %v1301_v36  ;;  %v594_v11 = vadd.f32 %v3540_v9, %v552_v41  ;;  %v4377_v54 = vstv %s3593_s26  ;;  %s3924_s26 = sld [smem:[#allocation9 + $0x1c]] }
 0x261   : > { %1765 = vrot.lane.b32.xlu1 %v1760_v43, %s4314_s13  ;;  %v1205_v57 = vadd.f32 %v3434_v42, %v1147_v30  ;;  %v3752_v16 = vadd.f32 %v1287_v13, %v1247_v28  ;;  %v1802_v25 = vmul.f32 %v4377_v54, %v3153_v35  ;;  %v4378_v42 = vstv %s3284_s8  ;;  %s3796_s8 = sld [smem:[#allocation9 + $0x2c]] }
 0x262   : > { %v1415_v5 = vadd.f32 %v3177_v20, %v1359_v51  ;;  %v1256_v63 = vpop.permute.xlu0 %1255  ;;  %v1530_v62 = vadd.f32 %v3535_v0, %v1474_v53  ;;  %v558_v21 = vmul.f32 %v4378_v42, %v3112_v56  ;;  %v652_v9 = vadd.f32 %v3602_v23, %v594_v11  ;;  %v4385_v42 = vld [vmem:[#allocation49_spill] sm:$0xff] }
 0x263   : > { %v1261_v1 = vadd.f32 %v1256_v63, %v1205_v57  ;;  %v820_v2 = vpop.permute.xlu1 %819  ;;  %v798_v56 = vmul.f32 %v4379_v10, %v3173_v44  ;;  %v1667_v44 = vmul.f32 %v1666_v14, %v3560_v39  ;;  %v4382_v41 = vstv %s3632_s23  ;;  %s4404_s23 = smov 64  }
 0x264   : > { %v1473_v20 = vadd.f32 %v3199_v22, %v1415_v5  ;;  %v608_v0 = vadd.f32 %v3555_v31, %v558_v21  ;;  %v708_v52 = vadd.f32 %v3652_v37, %v652_v9  ;;  %v1588_v23 = vadd.f32 %v3550_v55, %v1530_v62 }
 0x265   : > { %1807 = vrot.lane.b32.xlu1 %v1802_v25, %s4338_s19  ;;  %v1295_v6 = vadd.f32 %v1293_v29, %v1261_v1  ;;  %v938_v53 = vmul.f32 %v4382_v41, %v3431_v15  ;;  %v4383_v5 = vstv %s3333_s11  ;;  %v1050_v62 = vstv %s3782_s4  ;;  %s3820_s11 = sld [smem:[#allocation9 + $0x34]]  ;;  %s2261_s4 = sshll.u32 %s4429_s5, 5 }
 0x266   : > { %v1529_v17 = vadd.f32 %v3219_v12, %v1473_v20  ;;  %v3772_v35 = vpop.permute.xlu0 %1323  ;;  %v666_v22 = vadd.f32 %v3615_v48, %v608_v0  ;;  %v766_v61 = vadd.f32 %v762_v32, %v708_v52  ;;  %v4380_v48 = vstv %s3621_s16  ;;  %v4386_v0 = vld [vmem:[#allocation51_spill] sm:$0xff]  ;;  %s4403_s16 = smov 32   ;;  %p4437_p2 = scmp.ne.s32.totalorder %s4434_s28, 0 }
 0x267   : > { %v834_v18 = vpop.permute.xlu1 %833  ;;  %v856_v32 = vmul.f32 %v4380_v48, %v3186_v19  ;;  %v926_v63 = vmul.f32 %v4383_v5, %v3431_v15  ;;  %v4384_v25 = vstv %s3645_s27  ;;  %v1051_v21 = vmul.f32 %v1050_v62, %v3265_v47  ;;  %s4405_s27 = smov 48  }
 0x268   : > { %v1587_v31 = vadd.f32 %v3384_v45, %v1529_v17  ;;  %v724_v12 = vadd.f32 %v3666_v26, %v666_v22  ;;  %v824_v37 = vadd.f32 %v820_v2, %v766_v61  ;;  %v1644_v45 = vadd.f32 %v3569_v34, %v1588_v23  ;;  %v4387_v17 = vld [vmem:[#allocation44_spill] sm:$0xff] }
 0x269   : > { %803 = vrot.lane.b32.xlu1 %v798_v56, %s2544_s0  ;;  %v4381_v26 = vstv %s3317_s25  ;;  %s3810_s25 = sld [smem:[#allocation9 + $0x30]]  ;;  %v996_v29 = vmul.f32 %v4384_v25, %v3212_v33  ;;  %v1108_v9 = vstv %s3796_s8  ;;  %v1052_v23 = vmul.f32 %v1050_v62, %v3212_v33 }
 0x26a   : > { %v1338_v50 = vpop.permute.xlu0 %1337  ;;  %v1643_v36 = vadd.f32 %v3407_v60, %v1587_v31  ;;  %v780_v30 = vadd.f32 %v776_v24, %v724_v12  ;;  %v920_v28 = vmul.f32 %v4381_v26, %v3431_v15  ;;  %v1668_v60 = vmul.f32 %v1666_v14, %v3700_v3 }
 0x26b   : > { %v1343_v59 = vadd.f32 %v1338_v50, %v1295_v6  ;;  %v876_v55 = vpop.permute.xlu1 %875  ;;  %v1222_v61 = vstv %s3820_s11  ;;  %v1476_v25 = vstv %s3851_s1 }
 0x26c   : > { %v880_v38 = vadd.f32 %v876_v55, %v824_v37  ;;  %v1669_v43 = vadd.f32 %v1667_v44, %v1643_v36  ;;  %v838_v13 = vadd.f32 %v834_v18, %v780_v30  ;;  %v1670_v51 = vadd.f32 %v1668_v60, %v1644_v45  ;;  %v4388_v37 = vld [vmem:[#allocation42_spill] sm:$0xff]  ;;  %v2370_v36 = vld [vmem:[#allocation4 + $0x18] sm:$0xff] }
 0x26d   : > { %861 = vrot.lane.b32.xlu1 %v856_v32, %s4318_s14  ;;  %v1109_v18 = vmul.f32 %v1108_v9, %v4387_v17  ;;  %v1110_v50 = vmul.f32 %v1108_v9, %v4388_v37  ;;  %v1223_v44 = vmul.f32 %v2370_v36, %v1222_v61 }
 0x26e   : > { %v3798_v46 = vpop.permute.xlu0 %1381  ;;  %v1727_v19 = vadd.f32 %v3422_v8, %v1669_v43  ;;  %v922_v34 = vadd.f32 %v920_v28, %v880_v38  ;;  %v1329_v38 = vadd.f32 %v3772_v35, %v3752_v16  ;;  %v1362_v43 = vstv %s3834_s3  ;;  %v2372_v35 = vld [vmem:[#allocation4 + $0x1a] sm:$0xff] }
 0x26f   : > { %v890_v24 = vpop.permute.xlu1 %889  ;;  %v1164_v10 = vstv %s3810_s25 }
 0x270   : > { %v894_v57 = vadd.f32 %v890_v24, %v838_v13  ;;  %v1783_v11 = vadd.f32 %v3446_v7, %v1727_v19  ;;  %v1728_v7 = vadd.f32 %v4385_v42, %v1670_v51  ;;  %v1165_v22 = vmul.f32 %v1164_v10, %v4387_v17 }
 0x271   : > { %943 = vrot.lane.b32.xlu1 %v938_v53, %s4330_s29  ;;  %v1166_v32 = vmul.f32 %v1164_v10, %v4388_v37  ;;  %v1387_v13 = vadd.f32 %v3798_v46, %v1329_v38  ;;  %v1363_v53 = vmul.f32 %v2372_v35, %v1362_v43 }
 0x272   : > { %1825 = vrot.lane.b32.xlu0 %v1783_v11, %s4314_s13  ;;  %v1396_v8 = vpop.permute.xlu0 %1395  ;;  %v928_v1 = vadd.f32 %v926_v63, %v894_v57  ;;  %v1784_v52 = vadd.f32 %v4386_v0, %v1728_v7 }
 0x273   : > { %v1401_v2 = vadd.f32 %v1396_v8, %v1343_v59  ;;  %v958_v54 = vpop.permute.xlu1 %957  ;;  %v1304_v59 = vstv %s3827_s12  ;;  %s4435_s12 = sld [smem:[#allocation55_spill]] }
 0x274   : > { %v1305_v30 = vmul.f32 %v1304_v59, %v3375_v49  ;;  %v962_v26 = vadd.f32 %v958_v54, %v922_v34  ;;  %v2371_v49 = vld [vmem:[#allocation4 + $0x20] sm:$0xff]  ;;  %v1418_v34 = vstv %s3840_s24  ;;  %v1306_v62 = vmul.f32 %v1304_v59, %v3566_v58 }
 0x275   : > { %1001 = vrot.lane.b32.xlu1 %v996_v29, %s4314_s13  ;;  %v1224_v24 = vmul.f32 %v2371_v49, %v1222_v61  ;;  %v4389_v29 = vld [vmem:[#allocation45_spill] sm:$0xff] }
 0x276   : > { %1055 = vrot.lane.b32.xlu0 %v1051_v21, %s4338_s19  ;;  %v1438_v20 = vpop.permute.xlu0 %1437 }
 0x277   : > { %v972_v6 = vpop.permute.xlu1 %971  ;;  %v1443_v51 = vadd.f32 %v1438_v20, %v1387_v13  ;;  %v2373_v20 = vld [vmem:[#allocation4 + $0x22] sm:$0xff] }
 0x278   : > { %v976_v45 = vadd.f32 %v972_v6, %v928_v1  ;;  %v1419_v1 = vmul.f32 %v2372_v35, %v1418_v34  ;;  %v1364_v6 = vmul.f32 %v2373_v20, %v1362_v43  ;;  %v2375_v43 = vld [vmem:[#allocation4 + $0x23] sm:$0xff]  ;;  %v544_v35 = vstv %s3896_s22 }
 0x279   : > { %1827 = vrot.lane.b32.xlu1 %v1784_v52, %s4314_s13  ;;  %v1660_v52 = vstv %s3855_s6  ;;  %s4436_s3 = smov %s4435_s12  ;;  %s4135_s24 = scalar_lea.hbm %s4435_s12, %s2261_s4 }
 0x27a   : > { %1113 = vrot.lane.b32.xlu0 %v1109_v18, %s4326_s20  ;;  %v1454_v47 = vpop.permute.xlu0 %1453  ;;  %v2374_v18 = vld [vmem:[#allocation4 + $0x1b] sm:$0xff]  ;;  %s2545_s6 = smov [#allocation10]  }
 0x27b   : > { %v1459_v56 = vadd.f32 %v1454_v47, %v1401_v2  ;;  %v1016_v14 = vpop.permute.xlu1 %1015  ;;  %v1654_v2 = vstv %s3845_s2  ;;  %v1477_v10 = vmul.f32 %v2374_v18, %v1476_v25  ;;  %v4390_v47 = vld [vmem:[#allocation47_spill] sm:$0xff] }
 0x27c   : > { %v1020_v41 = vadd.f32 %v1016_v14, %v962_v26  ;;  %v1655_v0 = vmul.f32 %v1654_v2, %v3560_v39  ;;  %v1288_v14 = vmul.f32 %v1286_v27, %v3566_v58  ;;  %v1661_v27 = vmul.f32 %v1660_v52, %v3560_v39 }
 0x27d   : > { %1057 = vrot.lane.b32.xlu1 %v1052_v23, %s4338_s19  ;;  %v1532_v23 = vstv %s3859_s18  ;;  %v1478_v26 = vmul.f32 %v2375_v43, %v1476_v25  ;;  %s2433_s18 = sshll.u32 %s2545_s6, 4  ;;  %s2434_s18 = int_to_ptr.vmem [resolvable:$false] %s2433_s18 }
 0x27e   : > { %1169 = vrot.lane.b32.xlu0 %v1165_v22, %s2544_s0  ;;  %v1496_v31 = vpop.permute.xlu0 %1495 }
 0x27f   : > { %v1030_v12 = vpop.permute.xlu1 %1029  ;;  %v1501_v11 = vadd.f32 %v1496_v31, %v1443_v51  ;;  %v4391_v31 = vld [vmem:[#allocation46_spill] sm:$0xff] }
 0x280   : > { %v1034_v28 = vadd.f32 %v1030_v12, %v976_v45 }
 0x281   : > { %1115 = vrot.lane.b32.xlu1 %v1110_v50, %s4326_s20 }
 0x282   : > { %1227 = vrot.lane.b32.xlu0 %v1223_v44, %s4318_s14  ;;  %v1510_v33 = vpop.permute.xlu0 %1509  ;;  %v1420_v44 = vmul.f32 %v2373_v20, %v1418_v34  ;;  %v2377_v34 = vld [vmem:[#allocation4 + $0x24] sm:$0xff] }
 0x283   : > { %v1515_v55 = vadd.f32 %v1510_v33, %v1459_v56  ;;  %v1072_v48 = vpop.permute.xlu1 %1071  ;;  %v1533_v33 = vmul.f32 %v2374_v18, %v1532_v23 }
 0x284   : > { %v1076_v57 = vadd.f32 %v1072_v48, %v1020_v41  ;;  %v1590_v48 = vstv %s3866_s30  ;;  %s2435_s30 = scalar_lea.vmem %s2434_s18, 64 }
 0x285   : > { %1171 = vrot.lane.b32.xlu1 %v1166_v32, %s2544_s0 }
 0x286   : > { %1309 = vrot.lane.b32.xlu0 %v1305_v30, %s4330_s29  ;;  %v1554_v60 = vpop.permute.xlu0 %1553 }
 0x287   : > { %v1088_v19 = vpop.permute.xlu1 %1087  ;;  %v1559_v54 = vadd.f32 %v1554_v60, %v1501_v11  ;;  %v1672_v60 = vstv %s3880_s7 }
 0x288   : > { %v1092_v16 = vadd.f32 %v1088_v19, %v1034_v28  ;;  %v1673_v41 = vmul.f32 %v1672_v60, %v3560_v39 }
 0x289   : > { %1229 = vrot.lane.b32.xlu1 %v1224_v24, %s4318_s14  ;;  %v1534_v24 = vmul.f32 %v2375_v43, %v1532_v23 }
 0x28a   : > { %1367 = vrot.lane.b32.xlu0 %v1363_v53, %s4314_s13  ;;  %v1568_v46 = vpop.permute.xlu0 %1567 }
 0x28b   : > { %v1573_v5 = vadd.f32 %v1568_v46, %v1515_v55  ;;  %v1130_v63 = vpop.permute.xlu1 %1129  ;;  %v1294_v55 = vmul.f32 %v1292_v4, %v3566_v58  ;;  %v2376_v4 = vld [vmem:[#allocation4 + $0x1c] sm:$0xff] }
 0x28c   : > { %v1134_v8 = vadd.f32 %v1130_v63, %v1076_v57  ;;  %v1591_v28 = vmul.f32 %v2376_v4, %v1590_v48  ;;  %v1592_v57 = vmul.f32 %v2377_v34, %v1590_v48  ;;  %v2378_v46 = vld [vmem:[#allocation4 + $0x1e] sm:$0xff] }
 0x28d   : > { %1311 = vrot.lane.b32.xlu1 %v1306_v62, %s4330_s29  ;;  %v1786_v62 = vstv %s3905_s9 }
 0x28e   : > { %v1192_v42 = vadd.f32 %v4389_v29, %v1134_v8  ;;  %1423 = vrot.lane.b32.xlu0 %v1419_v1, %s4338_s19  ;;  %v1610_v7 = vpop.permute.xlu0 %1609  ;;  %v4392_v1 = vld [vmem:[#allocation39_spill] sm:$0xff] }
 0x28f   : > { %v1615_v21 = vadd.f32 %v1610_v7, %v1559_v54  ;;  %v1144_v9 = vpop.permute.xlu1 %1143  ;;  %v1787_v7 = vmul.f32 %v2378_v46, %v1786_v62 }
 0x290   : > { %v1148_v17 = vadd.f32 %v1144_v9, %v1092_v16  ;;  %v1248_v56 = vadd.f32 %v4390_v47, %v1192_v42  ;;  %v1730_v16 = vstv %s3894_s15  ;;  %v1674_v42 = vmul.f32 %v1672_v60, %v3700_v3  ;;  %v2380_v47 = vld [vmem:[#allocation4 + $0x26] sm:$0xff] }
 0x291   : > { %1369 = vrot.lane.b32.xlu1 %v1364_v6, %s4314_s13  ;;  %v1657_v22 = vadd.f32 %v1655_v0, %v1615_v21  ;;  %v1731_v11 = vmul.f32 %v2378_v46, %v1730_v16  ;;  %v4393_v21 = vld [vmem:[#allocation40_spill] sm:$0xff]  ;;  %v4394_v0 = vld [vmem:[#allocation41_spill] sm:$0xff] }
 0x292   : > { %1481 = vrot.lane.b32.xlu0 %v1477_v10, %s4326_s20  ;;  %v1624_v61 = vpop.permute.xlu0 %1623  ;;  %v1206_v12 = vadd.f32 %v4391_v31, %v1148_v17  ;;  %v3884_v37 = vadd.f32 %v1288_v14, %v1248_v56  ;;  %v1732_v56 = vmul.f32 %v2380_v47, %v1730_v16  ;;  %v4395_v14 = vld [vmem:[#allocation43_spill] sm:$0xff] }
 0x293   : > { %v1629_v50 = vadd.f32 %v1624_v61, %v1573_v5  ;;  %v1258_v36 = vpop.permute.xlu1 %1257  ;;  %v2379_v5 = vld [vmem:[#allocation4] sm:$0xff] }
 0x294   : > { %v1262_v59 = vadd.f32 %v1258_v36, %v1206_v12  ;;  %v545_v63 = vmul.f32 %v2379_v5, %v544_v35  ;;  %v1788_v12 = vmul.f32 %v2380_v47, %v1786_v62 }
 0x295   : > { %1425 = vrot.lane.b32.xlu1 %v1420_v44, %s4338_s19  ;;  %v1663_v32 = vadd.f32 %v1661_v27, %v1629_v50  ;;  %v912_v50 = vstv %s3924_s26 }
 0x296   : > { %1537 = vrot.lane.b32.xlu0 %v1533_v33, %s2544_s0  ;;  %v1692_v45 = vpop.permute.xlu0 %1691  ;;  %v3899_v30 = vadd.f32 %v1294_v55, %v1262_v59  ;;  %v579_v54 = vadd.f32 %v4392_v1, %v545_v63  ;;  %v2381_v59 = vld [vmem:[#allocation4 + $0x4] sm:$0xff] }
 0x297   : > { %v3901_v38 = vpop.permute.xlu1 %1325  ;;  %v1697_v25 = vadd.f32 %v1692_v45, %v1657_v22  ;;  %v913_v33 = vmul.f32 %v2381_v59, %v912_v50 }
 0x298   : > { %v637_v9 = vadd.f32 %v4393_v21, %v579_v54  ;;  %v1330_v43 = vadd.f32 %v3901_v38, %v3884_v37  ;;  %v1656_v37 = vmul.f32 %v1654_v2, %v3700_v3  ;;  %v4396_v21 = vld [vmem:[#allocation48_spill] sm:$0xff] }
 0x299   : > { %1483 = vrot.lane.b32.xlu1 %v1478_v26, %s4326_s20 }
 0x29a   : > { %1595 = vrot.lane.b32.xlu0 %v1591_v28, %s4318_s14  ;;  %v1706_v13 = vpop.permute.xlu0 %1705  ;;  %v693_v17 = vadd.f32 %v4394_v0, %v637_v9 }
 0x29b   : > { %v3908_v19 = vadd.f32 %v1706_v13, %v1663_v32  ;;  %v1340_v49 = vpop.permute.xlu1 %1339 }
 0x29c   : > { %v751_v23 = vadd.f32 %v4395_v14, %v693_v17  ;;  %v1344_v13 = vadd.f32 %v1340_v49, %v3899_v30  ;;  %v1662_v30 = vmul.f32 %v1660_v52, %v3700_v3 }
 0x29d   : > { %1539 = vrot.lane.b32.xlu1 %v1534_v24, %s2544_s0  ;;  %s4406_s0 = smov 80  }
 0x29e   : > { %1677 = vrot.lane.b32.xlu0 %v1673_v41, %s4330_s29  ;;  %v1750_v53 = vpop.permute.xlu0 %1749 }
 0x29f   : > { %v1384_v51 = vpop.permute.xlu1 %1383  ;;  %v1755_v20 = vadd.f32 %v1750_v53, %v1697_v25 }
 0x2a0   : > { %v1388_v60 = vadd.f32 %v1384_v51, %v1330_v43 }
 0x2a1   : > { %1597 = vrot.lane.b32.xlu1 %v1592_v57, %s4318_s14  ;;  %s2239_s14 = sld [smem:[#allocation9 + $0x54]] }
 0x2a2   : > { %1735 = vrot.lane.b32.xlu0 %v1731_v11, %s4314_s13  ;;  %v3920_v8 = vpop.permute.xlu0 %1763 }
 0x2a3   : > { %v1398_v29 = vpop.permute.xlu1 %1397 }
 0x2a4   : > { %v1402_v16 = vadd.f32 %v1398_v29, %v1344_v13  ;;  %v2382_v29 = vld [vmem:[#allocation4 + $0x8] sm:$0xff] }
 0x2a5   : > { %1679 = vrot.lane.b32.xlu1 %v1674_v42, %s4330_s29  ;;  %v546_v42 = vmul.f32 %v2382_v29, %v544_v35  ;;  %v914_v35 = vmul.f32 %v912_v50, %v3431_v15 }
 0x2a6   : > { %1791 = vrot.lane.b32.xlu0 %v1787_v7, %s4338_s19  ;;  %v1806_v6 = vpop.permute.xlu0 %1805 }
 0x2a7   : > { %v1811_v18 = vadd.f32 %v1806_v6, %v1755_v20  ;;  %v1440_v10 = vpop.permute.xlu1 %1439  ;;  %v580_v9 = vadd.f32 %v4396_v21, %v546_v42  ;;  %v4397_v6 = vld [vmem:[#allocation50_spill] sm:$0xff] }
 0x2a8   : > { %v1444_v24 = vadd.f32 %v1440_v10, %v1388_v60 }
 0x2a9   : > { %1737 = vrot.lane.b32.xlu1 %v1732_v56, %s4314_s13  ;;  %v638_v2 = vadd.f32 %v4397_v6, %v580_v9 }
 0x2aa   : > { %1815 = vrot.lane.b32.xlu0 %v1811_v18, %s4314_s13  ;;  %v802_v22 = vpop.permute.xlu0 %801  ;;  %v4398_v18 = vld [vmem:[#allocation52_spill] sm:$0xff] }
 0x2ab   : > { %v807_v61 = vadd.f32 %v802_v22, %v751_v23  ;;  %v1456_v31 = vpop.permute.xlu1 %1455  ;;  %v694_v10 = vadd.f32 %v4398_v18, %v638_v2 }
 0x2ac   : > { %v1460_v34 = vadd.f32 %v1456_v31, %v1402_v16  ;;  %v1769_v31 = vadd.f32 %v3920_v8, %v3908_v19 }
 0x2ad   : > { %1793 = vrot.lane.b32.xlu1 %v1788_v12, %s4338_s19  ;;  %v752_v52 = vadd.f32 %v3682_v40, %v694_v10 }
 0x2ae   : > { %v860_v36 = vpop.permute.xlu0 %859 }
 0x2af   : > { %v865_v44 = vadd.f32 %v860_v36, %v807_v61  ;;  %v1498_v27 = vpop.permute.xlu1 %1497 }
 0x2b0   : > { %v1502_v53 = vadd.f32 %v1498_v27, %v1444_v24 }
 0x2b1   : > { %v915_v55 = vadd.f32 %v913_v33, %v865_v44 }
 0x2b2   : > { %v942_v48 = vpop.permute.xlu0 %941 }
 0x2b3   : > { %v947_v32 = vadd.f32 %v942_v48, %v915_v55  ;;  %v1512_v45 = vpop.permute.xlu1 %1511 }
 0x2b4   : > { %v1516_v11 = vadd.f32 %v1512_v45, %v1460_v34 }
 0x2b6   : > { %v1000_v26 = vpop.permute.xlu0 %999 }
 0x2b7   : > { %v1005_v4 = vadd.f32 %v1000_v26, %v947_v32  ;;  %v1556_v28 = vpop.permute.xlu1 %1555 }
 0x2b8   : > { %v1560_v57 = vadd.f32 %v1556_v28, %v1502_v53 }
 0x2bb   : > { %v1570_v41 = vpop.permute.xlu1 %1569 }
 0x2bc   : > { %v1574_v38 = vadd.f32 %v1570_v41, %v1516_v11  ;;  %v2383_v41 = vld [vmem:[#allocation4 + $0x19] sm:$0xff] }
 0x2bf   : > { %v1612_v46 = vpop.permute.xlu1 %1611 }
 0x2c0   : > { %v1616_v5 = vadd.f32 %v1612_v46, %v1560_v57 }
 0x2c2   : > { %v1658_v63 = vadd.f32 %v1656_v37, %v1616_v5 }
 0x2c3   : > { %v1626_v62 = vpop.permute.xlu1 %1625 }
 0x2c4   : > { %v1630_v51 = vadd.f32 %v1626_v62, %v1574_v38 }
 0x2c6   : > { %v1664_v49 = vadd.f32 %v1662_v30, %v1630_v51 }
 0x2c7   : > { %v1694_v1 = vpop.permute.xlu1 %1693 }
 0x2c8   : > { %v1698_v20 = vadd.f32 %v1694_v1, %v1658_v63 }
 0x2cb   : > { %v1708_v54 = vpop.permute.xlu1 %1707 }
 0x2cc   : > { %v1712_v40 = vadd.f32 %v1708_v54, %v1664_v49 }
 0x2cf   : > { %v1752_v25 = vpop.permute.xlu1 %1751 }
 0x2d0   : > { %v1756_v0 = vadd.f32 %v1752_v25, %v1698_v20  ;;  %v1648_v20 = vstv %s2239_s14 }
 0x2d3   : > { %v1766_v7 = vpop.permute.xlu1 %1765 }
 0x2d4   : > { %v1770_v48 = vadd.f32 %v1766_v7, %v1712_v40 }
 0x2d7   : > { %v1808_v17 = vpop.permute.xlu1 %1807 }
 0x2d8   : > { %v1812_v47 = vadd.f32 %v1808_v17, %v1756_v0 }
 0x2da   : > { %1817 = vrot.lane.b32.xlu1 %v1812_v47, %s4314_s13  ;;  %s2211_s13 = sld [smem:[#allocation9 + $0x38]] }
 0x2db   : > { %v804_v56 = vpop.permute.xlu1 %803 }
 0x2dc   : > { %v808_v14 = vadd.f32 %v804_v56, %v752_v52 }
 0x2df   : > { %v862_v23 = vpop.permute.xlu1 %861 }
 0x2e0   : > { %v866_v22 = vadd.f32 %v862_v23, %v808_v14  ;;  %v1280_v26 = vstv %s2211_s13 }
 0x2e1   : > { %v1281_v16 = vmul.f32 %v2383_v41, %v1280_v26 }
 0x2e2   : > { %v916_v61 = vadd.f32 %v914_v35, %v866_v22  ;;  %v1650_v35 = vmul.f32 %v1648_v20, %v3700_v3 }
 0x2e3   : > { %v944_v12 = vpop.permute.xlu1 %943 }
 0x2e4   : > { %v948_v36 = vadd.f32 %v944_v12, %v916_v61  ;;  %v1826_v44 = vpop.permute.xlu0 %1825 }
 0x2e5   : > { %v1831_v27 = vadd.f32 %v1826_v44, %v1769_v31 }
 0x2e7   : > { %v1002_v59 = vpop.permute.xlu1 %1001  ;;  %1835 = vrot.lane.b32.xlu0 %v1831_v27, %s4326_s20 }
 0x2e8   : > { %v1006_v33 = vadd.f32 %v1002_v59, %v948_v36  ;;  %v1056_v55 = vpop.permute.xlu0 %1055 }
 0x2e9   : > { %v1061_v15 = vadd.f32 %v1056_v55, %v1005_v4  ;;  %v1282_v4 = vmul.f32 %v1280_v26, %v3566_v58  ;;  %v1649_v58 = vmul.f32 %v1648_v20, %v3560_v39 }
 0x2eb   : > { %v1828_v32 = vpop.permute.xlu1 %1827 }
 0x2ec   : > { %v1832_v45 = vadd.f32 %v1828_v32, %v1770_v48  ;;  %v1114_v43 = vpop.permute.xlu0 %1113 }
 0x2ed   : > { %v1119_v8 = vadd.f32 %v1114_v43, %v1061_v15 }
 0x2ee   : > { %1837 = vrot.lane.b32.xlu1 %v1832_v45, %s4326_s20  ;;  %s4399_s20 = sld [smem:[#allocation24_spill]] }
 0x2ef   : > { %v1058_v50 = vpop.permute.xlu1 %1057 }
 0x2f0   : > { %v1170_v19 = vpop.permute.xlu0 %1169  ;;  %v1062_v53 = vadd.f32 %v1058_v50, %v1006_v33 }
 0x2f1   : > { %v1175_v28 = vadd.f32 %v1170_v19, %v1119_v8 }
 0x2f3   : > { %v1116_v60 = vpop.permute.xlu1 %1115 }
 0x2f4   : > { %v1228_v13 = vpop.permute.xlu0 %1227  ;;  %v1120_v46 = vadd.f32 %v1116_v60, %v1062_v53  ;;  %s2155_s29 = sshll.u32 %s4399_s20, 1  ;;  %v4400_v53 = vlaneseq  ;;  %s2037_s2 = scalar_lea.sflag [#allocation7], %s4399_s20 }
 0x2f5   : > { %v1233_v24 = vadd.f32 %v1228_v13, %v1175_v28  ;;  %s3962_s19 = scalar_lea.vmem [#allocation10], %s2155_s29 }
 0x2f6   : > { %vm1855_vm5 = vcmp.lt.s32.totalorder %v4400_v53, 16  ;;  %vm1884_vm6 = vcmp.ge.s32.totalorder %v4400_v53, 16  ;;  %vm1885_vm7 = vcmp.lt.s32.totalorder %v4400_v53, 32  ;;  %vm3994_vm9 = vcmp.ge.s32.totalorder %v4400_v53, 32  ;;  %s2051_s8 = sshll.u32 %s3962_s19, 4  ;;  %s4137_s8 = int_to_ptr.vmem [resolvable:$true] %s2051_s8 }
 0x2f7   : > { %v1172_v34 = vpop.permute.xlu1 %1171  ;;  %v1283_v57 = vadd.f32 %v1281_v16, %v1233_v24  ;;  %vm1886_vm8 = vmand %vm1884_vm6, %vm1885_vm7  ;;  %vm3999_vm10 = vcmp.lt.s32.totalorder %v4400_v53, 48  ;;  %vm4010_vm12 = vcmp.ge.s32.totalorder %v4400_v53, 48  ;;  %vm4015_vm13 = vcmp.lt.s32.totalorder %v4400_v53, 64  ;;  %s2429_s1 = scalar_lea.vmem %s4137_s8, 32  ;;  %p2436_p4 = scmp.lt.s32.totalorder %s4137_s8, %s2434_s18 }
 0x2f8   : > { %v1310_v11 = vpop.permute.xlu0 %1309  ;;  %v1176_v5 = vadd.f32 %v1172_v34, %v1120_v46  ;;  %vm1894_vm11 = vmand %vm3994_vm9, %vm3999_vm10  ;;  %vm4021_vm14 = vcmp.ge.s32.totalorder %v4400_v53, 64  ;;  %vm4026_vm15 = vcmp.lt.s32.totalorder %v4400_v53, 80  ;;  %vm4039_vm2 = vcmp.ge.s32.totalorder %v4400_v53, 80  ;;  %p2430_p8 = scmp.ne.s32.totalorder %s4137_s8, %s2429_s1  ;;  %p2437_p9 = scmp.lt.s32.totalorder %s2435_s30, %s2429_s1 }
 0x2f9   : > { %v1315_v49 = vadd.f32 %v1310_v11, %v1283_v57  ;;  %v4401_v57 = vld [vmem:[#allocation25_spill] sm:$0xff]  ;;  %vm1902_vm0 = vmand %vm4010_vm12, %vm4015_vm13  ;;  %vm4044_vm3 = vcmp.lt.s32.totalorder %v4400_v53, 96  ;;  %vm4071_vm6 = vcmp.lt.s32.totalorder %v4400_v53, 112  ;;  %vm4091_vm9 = vcmp.lt.s32.totalorder %v4400_v53, 128 }
 0x2fa   : > { %vm1924_vm1 = vmand %vm4021_vm14, %vm4026_vm15  ;;  %p2431_p12 = pnand %p2430_p8, %p4437_p2  ;;  %p2438_p13 = por %p2437_p9, %p2436_p4 }
 0x2fb   : > { %v1230_v37 = vpop.permute.xlu1 %1229  ;;  %vm1939_vm4 = vmand %vm4039_vm2, %vm4044_vm3 }
 0x2fc   : > { %v1234_v38 = vadd.f32 %v1230_v37, %v1176_v5  ;;  %v1368_v63 = vpop.permute.xlu0 %1367  ;;  %p2432_p5 = pneg %p2431_p12 }
 0x2fd   : > { %v1373_v25 = vadd.f32 %v1368_v63, %v1315_v49 }
 0x2fe   : > { %v1284_v62 = vadd.f32 %v1282_v4, %v1234_v38  ;;  %p2439_p11 = pnand %p2438_p13, %p2432_p5 }
 0x2ff   : > { %v1312_v51 = vpop.permute.xlu1 %1311 }
 0x300   : > { %v1424_v30 = vpop.permute.xlu0 %1423  ;;  %v1316_v9 = vadd.f32 %v1312_v51, %v1284_v62 }
 0x301   : > { %v1429_v29 = vadd.f32 %v1424_v30, %v1373_v25 }
 0x303   : > { %v1370_v1 = vpop.permute.xlu1 %1369 }
 0x304   : > { %v1482_v54 = vpop.permute.xlu0 %1481  ;;  %v1374_v0 = vadd.f32 %v1370_v1, %v1316_v9 }
 0x305   : > { %v1487_v21 = vadd.f32 %v1482_v54, %v1429_v29 }
 0x307   : > { %v1426_v42 = vpop.permute.xlu1 %1425 }
 0x308   : > { %v1538_v7 = vpop.permute.xlu0 %1537  ;;  %v1430_v10 = vadd.f32 %v1426_v42, %v1374_v0 }
 0x309   : > { %v1543_v6 = vadd.f32 %v1538_v7, %v1487_v21 }
 0x30b   : > { %v1484_v2 = vpop.permute.xlu1 %1483 }
 0x30c   : > { %v1596_v17 = vpop.permute.xlu0 %1595  ;;  %v1488_v56 = vadd.f32 %v1484_v2, %v1430_v10 }
 0x30d   : > { %v1601_v18 = vadd.f32 %v1596_v17, %v1543_v6 }
 0x30f   : > { %v1540_v47 = vpop.permute.xlu1 %1539  ;;  %v1651_v52 = vadd.f32 %v1649_v58, %v1601_v18 }
 0x310   : > { %v1544_v14 = vadd.f32 %v1540_v47, %v1488_v56  ;;  %v1678_v31 = vpop.permute.xlu0 %1677 }
 0x311   : > { %v1683_v27 = vadd.f32 %v1678_v31, %v1651_v52 }
 0x313   : > { %v1598_v23 = vpop.permute.xlu1 %1597 }
 0x314   : > { %v1602_v22 = vadd.f32 %v1598_v23, %v1544_v14  ;;  %v1736_v12 = vpop.permute.xlu0 %1735 }
 0x315   : > { %v1741_v40 = vadd.f32 %v1736_v12, %v1683_v27 }
 0x316   : > { %v1652_v61 = vadd.f32 %v1650_v35, %v1602_v22 }
 0x317   : > { %v1680_v36 = vpop.permute.xlu1 %1679 }
 0x318   : > { %v1792_v44 = vpop.permute.xlu0 %1791  ;;  %v1684_v32 = vadd.f32 %v1680_v36, %v1652_v61 }
 0x319   : > { %v1797_v55 = vadd.f32 %v1792_v44, %v1741_v40 }
 0x31b   : > { %v1738_v59 = vpop.permute.xlu1 %1737 }
 0x31c   : > { %v1816_v33 = vpop.permute.xlu0 %1815  ;;  %v1742_v15 = vadd.f32 %v1738_v59, %v1684_v32 }
 0x31d   : > { %v1821_v39 = vadd.f32 %v1816_v33, %v1797_v55 }
 0x31f   : > { %v1794_v48 = vpop.permute.xlu1 %1793 }
 0x320   : > { %v1798_v3 = vadd.f32 %v1794_v48, %v1742_v15 }
 0x34c   : > { %v1818_v50 = vpop.permute.xlu1 %1817 }
 0x34d   : > { %v1822_v8 = vadd.f32 %v1818_v50, %v1798_v3 }
 0x359   : > { %v1836_v45 = vpop.permute.xlu0 %1835 }
 0x35a   : > { %v1841_v43 = vadd.f32 %v1836_v45, %v1821_v39 }
 0x35c   : > { %v2253_v19 = vmul.f32 -1.442695, %v1841_v43 }
 0x35e   : > { %2362 = vpow2.f32 %v2253_v19 }
 0x360   : > { %v1838_v26 = vpop.permute.xlu1 %1837 }
 0x361   : > { %v1842_v28 = vadd.f32 %v1838_v26, %v1822_v8 }
 0x363   : > { %v2254_v60 = vmul.f32 -1.442695, %v1842_v28 }
 0x365   : > { %2364 = vpow2.f32 %v2254_v60 }
 0x368   : > { %v2363_v13 = vpop.eup %2362 }
 0x369   : > { %v1849_v24 = vadd.f32 1.0, %v2363_v13 }
 0x36b   : > { %2366 = vrcp.f32 %v1849_v24 }
 0x36f   : > { %v2365_v41 = vpop.eup %2364 }
 0x370   : > { %v1850_v16 = vadd.f32 1.0, %v2365_v41 }
 0x372   : > { %2368 = vrcp.f32 %v1850_v16 }
 0x375   : > { %v2367_v34 = vpop.eup %2366 }
 0x376   : > { %v1865_v46 = vrot.slane %v2367_v34, %v4401_v57  ;;  %1857 = vst.msk [vmem:[%s3962_s19] sm:$0x1] %vm1855_vm5, %v2367_v34  ;;  %v1904_v38 = vcombine.high %v2367_v34, %v2367_v34 }
 0x378   : > { %v1866_v11 = vcombine.high %v1865_v46, %v1865_v46  ;;  %v1873_v37 = vrot.slane %v1865_v46, %v4401_v57  ;;  %v1911_v51 = vrot.slane %v1904_v38, %v4401_v57 }
 0x37a   : > { %v1880_v5 = vrot.slane %v1866_v11, %v4401_v57  ;;  %v1888_v62 = vcombine.high %v1873_v37, %v1873_v37  ;;  %v1918_v25 = vrot.slane %v1911_v51, %v4401_v57  ;;  %v1926_v21 = vcombine.high %v1911_v51, %v1911_v51 }
 0x37c   : > { %v2369_v63 = vpop.eup %2368  ;;  %1881 = vrot.lane.b32.xlu0 %v1880_v5, %s4402_s17  ;;  %v1896_v7 = vcombine.high %v1880_v5, %v1880_v5  ;;  %v1933_v20 = vrot.slane %v1926_v21, %v4401_v57  ;;  %v1941_v0 = vcombine.high %v1918_v25, %v1918_v25 }
 0x37d   : > { %v1965_v4 = vrot.slane %v2369_v63, %v4401_v57  ;;  %1957 = vst.msk [vmem:[%s3962_s19 + $0x1] sm:$0x1] %vm1855_vm5, %v2369_v63  ;;  %v1995_v54 = vcombine.high %v2369_v63, %v2369_v63  ;;  %vm4066_vm5 = vcmp.ge.s32.totalorder %v4400_v53, 96 }
 0x37e   : > { %v1949_v18 = vcombine.high %v1933_v20, %v1933_v20  ;;  %vm1947_vm7 = vmand %vm4066_vm5, %vm4071_vm6 }
 0x37f   : > { %v1966_v30 = vcombine.high %v1965_v4, %v1965_v4  ;;  %v1973_v1 = vrot.slane %v1965_v4, %v4401_v57  ;;  %v2002_v42 = vrot.slane %v1995_v54, %v4401_v57 }
 0x380   : > { %1889 = vrot.lane.b32.xlu0 %v1888_v62, %s4403_s16 }
 0x381   : > { %v1980_v49 = vrot.slane %v1966_v30, %v4401_v57  ;;  %v1985_v29 = vcombine.high %v1973_v1, %v1973_v1  ;;  %v2009_v9 = vrot.slane %v2002_v42, %v4401_v57  ;;  %v2014_v2 = vcombine.high %v2002_v42, %v2002_v42 }
 0x383   : > { %1981 = vrot.lane.b32.xlu1 %v1980_v49, %s4402_s17  ;;  %v1990_v6 = vcombine.high %v1980_v49, %v1980_v49  ;;  %v2021_v17 = vrot.slane %v2014_v2, %v4401_v57  ;;  %v2026_v58 = vcombine.high %v2009_v9, %v2009_v9 }
 0x384   : > { %1919 = vrot.lane.b32.xlu0 %v1918_v25, %s4404_s23 }
 0x385   : > { %v2031_v10 = vcombine.high %v2021_v17, %v2021_v17 }
 0x387   : > { %1986 = vrot.lane.b32.xlu1 %v1985_v29, %s4403_s16 }
 0x388   : > { %1897 = vrot.lane.b32.xlu0 %v1896_v7, %s4405_s27 }
 0x38b   : > { %2010 = vrot.lane.b32.xlu1 %v2009_v9, %s4404_s23 }
 0x38c   : > { %1934 = vrot.lane.b32.xlu0 %v1933_v20, %s4406_s0 }
 0x38f   : > { %1991 = vrot.lane.b32.xlu1 %v1990_v6, %s4405_s27 }
 0x390   : > { %1942 = vrot.lane.b32.xlu0 %v1941_v0, %s4407_s21 }
 0x393   : > { %2022 = vrot.lane.b32.xlu1 %v2021_v17, %s4406_s0 }
 0x394   : > { %1950 = vrot.lane.b32.xlu0 %v1949_v18, %s4408_s10 }
 0x397   : > { %2027 = vrot.lane.b32.xlu1 %v2026_v58, %s4407_s21 }
 0x39b   : > { %2032 = vrot.lane.b32.xlu1 %v2031_v10, %s4408_s10 }
 0x3ee   : > { %v1882_v56 = vpop.permute.xlu0 %1881 }
 0x3ef   : > { %1887 = vst.msk [vmem:[%s3962_s19] sm:$0x1] %vm1886_vm8, %v1882_v56 }
 0x3f2   : > { %v1890_v14 = vpop.permute.xlu0 %1889 }
 0x3f3   : > { %1895 = vst.msk [vmem:[%s3962_s19] sm:$0x1] %vm1894_vm11, %v1890_v14 }
 0x3f5   : > { %v1982_v23 = vpop.permute.xlu1 %1981 }
 0x3f6   : > { %1984 = vst.msk [vmem:[%s3962_s19 + $0x1] sm:$0x1] %vm1886_vm8, %v1982_v23  ;;  %v1920_v61 = vpop.permute.xlu0 %1919  ;;  %vm4086_vm8 = vcmp.ge.s32.totalorder %v4400_v53, 112 }
 0x3f7   : > { %vm1955_vm10 = vmand %vm4086_vm8, %vm4091_vm9 }
 0x3f9   : > { %v1987_v36 = vpop.permute.xlu1 %1986 }
 0x3fa   : > { %1989 = vst.msk [vmem:[%s3962_s19 + $0x1] sm:$0x1] %vm1894_vm11, %v1987_v36  ;;  %v1898_v59 = vpop.permute.xlu0 %1897 }
 0x3fb   : > { %1903 = vst.msk [vmem:[%s3962_s19] sm:$0x1] %vm1902_vm0, %v1898_v59 }
 0x3fc   : > { %1925 = vst.msk [vmem:[%s3962_s19] sm:$0x1] %vm1924_vm1, %v1920_v61 }
 0x3fd   : > { %v2011_v40 = vpop.permute.xlu1 %2010 }
 0x3fe   : > { %v1935_v39 = vpop.permute.xlu0 %1934 }
 0x3ff   : > { %1940 = vst.msk [vmem:[%s3962_s19] sm:$0x1] %vm1939_vm4, %v1935_v39 }
 0x401   : > { %v1992_v48 = vpop.permute.xlu1 %1991 }
 0x402   : > { %1994 = vst.msk [vmem:[%s3962_s19 + $0x1] sm:$0x1] %vm1902_vm0, %v1992_v48  ;;  %v1943_v43 = vpop.permute.xlu0 %1942 }
 0x403   : > { %2013 = vst.msk [vmem:[%s3962_s19 + $0x1] sm:$0x1] %vm1924_vm1, %v2011_v40 }
 0x404   : > { %1948 = vst.msk [vmem:[%s3962_s19] sm:$0x1] %vm1947_vm7, %v1943_v43 }
 0x405   : > { %v2023_v15 = vpop.permute.xlu1 %2022 }
 0x406   : > { %2025 = vst.msk [vmem:[%s3962_s19 + $0x1] sm:$0x1] %vm1939_vm4, %v2023_v15  ;;  %v1951_v50 = vpop.permute.xlu0 %1950 }
 0x407   : > { %1956 = vst.msk [vmem:[%s3962_s19] sm:$0x1] %vm1955_vm10, %v1951_v50 }
 0x409   : > { %v2028_v19 = vpop.permute.xlu1 %2027 }
 0x40a   : > { %2030 = vst.msk [vmem:[%s3962_s19 + $0x1] sm:$0x1] %vm1947_vm7, %v2028_v19 }
 0x40d   : > { %v2033_v3 = vpop.permute.xlu1 %2032 }
 0x40e   : > { %2035 = vst.msk [vmem:[%s3962_s19 + $0x1] sm:$0x1] %vm1955_vm10, %v2033_v3 }
 0x40f   : > { %2442 = shalt.err (!%p2439_p11)
}
 0x410   : > { %s2443_s7 = scalar_lea.hbm %s4135_s24, 32  ;;  %s2447_s9 = scalar_lea.hbm %s4436_s3, 64 }
 0x411   : > { %p2444_p3 = scmp.ne.s32.totalorder %s4135_s24, %s2443_s7  ;;  %p2448_p6 = scmp.lt.u32.totalorder %s4135_s24, %s4436_s3 }
 0x412   : > { %p2449_p1 = scmp.lt.u32.totalorder %s2447_s9, %s2443_s7  ;;  %p2451_p8 = scmp.lt.u32.totalorder %s2443_s7, %s4135_s24 }
 0x413   : > { %p2445_p7 = pnand %p2444_p3, %p4437_p2 }
 0x414   : > { %p2450_p0 = por %p2449_p1, %p2448_p6 }
 0x415   : > { %p2446_p10 = pneg %p2445_p7 }
 0x416   : > { %p2452_p12 = por %p2451_p8, %p2450_p0 }
 0x418   : > { %p2453_p5 = pnand %p2452_p12, %p2446_p10 }
 0x41a   : > { %2456 = shalt.err (!%p2453_p5)
}
 0x41b   : > { %2268 = dma.vmem_to_hbm [thread:$0]  (%p4437_p2), %s4137_s8, 32, %s4135_s24, %s2037_s2  }
 0x41c PF: > { %s4438_s14 = sld [smem:[#allocation14_spill]]  ;;  %s4439_s20 = sld [smem:[#allocation20_spill]] }
 0x41d   : > { %s4440_s29 = sld [smem:[#allocation19_spill]] }
 0x422   : > { %s2063_s19 = sand.u32 1, %s4438_s14   ;;  %p4441_p4 = scmp.ne.s32.totalorder %s4439_s20, 0 }
 0x423   : > { %p4442_p9 = scmp.ge.s32.totalorder %s4440_s29, 2  ;;  %s2064_s17 = scalar_lea.sflag [#allocation7], %s2063_s19 }
 0x425   : > { %p2279_p13 = pnand %p4442_p9, %p4441_p4 }
 0x427   : > { %2490 = dma.done.wait (!%p2279_p13), %s2064_s17, 32  }
 0x428   : > { %2492 = vsyncadd (!%p2279_p13), %s2064_s17, 4294967264  ;;  %s19_s14 = sadd.s32 1, %s4440_s29   ;;  %s4443_s9 = sld [smem:[#allocation15_spill]] }
 0x429   : > { %p16_p11 = scmp.ge.s32.totalorder %s19_s14, 4   ;;  %s4444_s10 = sld [smem:[#allocation16_spill]] }
 0x42a   : > { %s4445_s11 = sld [smem:[#allocation23_spill]]  ;;  %s4446_s12 = sld [smem:[#allocation18_spill]] }
 0x42b   : > { %s4447_s13 = sld [smem:[#allocation21_spill]]  ;;  %18 = sbr.rel (!%p16_p11) target bundleno = 11 (0xb), region = 87 }
 0x432   :  { %2069 = vsyncpa [#allocation6], 1 }
 0x433   :  { %2071 = vsyncpa [#allocation6 + $0x1], 1 }
 0x434   :  { %2072 = vsyncpa [#allocation7], 1 }
 0x435   :  { %2074 = vsyncpa [#allocation7 + $0x1], 1 }
 0x436   :  { %2075 = vsyncpa [#allocation8], 1 }
 0x437   :  { %2077 = vsyncpa [#allocation8 + $0x1], 1 }

</bundles_post_ra>
